<compile_context>
chip_gen: v5e
topology: v5e:2x2
jax: 0.10.0
libtpu: 0.0.40
codegen_flags: <defaults>
</compile_context>

<pallas_src>
import functools

import jax
import jax.numpy as jnp
from jax import lax
from jax.experimental import pallas as pl
from jax.experimental.pallas import tpu as pltpu

SELU_ALPHA = 1.6732632423543772
SELU_SCALE = 1.0507009873554805
MASK_VALUE = -1e30
LANE = 128


def _selu(x):
    return SELU_SCALE * jnp.where(x > 0, x, SELU_ALPHA * (jnp.exp(x) - 1.0))


def _round_up(x, m):
    return (x + m - 1) // m * m


def _pick_block(n, cap):
    """Largest multiple of 128 that divides n (n is a multiple of 128) and is <= cap."""
    b = max(LANE, min(cap, n) // LANE * LANE)
    while n % b:
        b -= LANE
    return b


def _pad2(a, rows, cols):
    return jnp.pad(a, ((0, rows - a.shape[0]), (0, cols - a.shape[1])))


def attn_tiles(n_pad, block_dst=1024, block_src=2048):
    return _pick_block(n_pad, block_dst), _pick_block(n_pad, block_src)


# ------------------------------------------------------------------
# Kernel 1: feature projection  h = x @ W  plus per-node attention scores.
#   a_src[i] = sum_k h[i,k] * att_src[k]   (PyG GATConv alpha_src)
#   a_dst[i] = sum_k h[i,k] * att_dst[k]   (PyG GATConv alpha_dst)
# ------------------------------------------------------------------
def _project_kernel(x_ref, w_ref, asw_ref, adw_ref, h_ref, asrc_ref, adst_ref):
    h = jnp.dot(x_ref[...], w_ref[...], preferred_element_type=jnp.float32)
    h_ref[...] = h.astype(h_ref.dtype)
    asrc_ref[...] = jnp.sum(h * asw_ref[...], axis=-1, keepdims=True)
    adst_ref[...] = jnp.sum(h * adw_ref[...], axis=-1, keepdims=True)


def linear_project(x, w, att_src, att_dst, *, block_rows=1024):
    n, fin = x.shape
    fo = w.shape[1]
    blk = _pick_block(n, block_rows)
    return pl.pallas_call(
        _project_kernel,
        out_shape=(jax.ShapeDtypeStruct((n, fo), jnp.bfloat16),
                   jax.ShapeDtypeStruct((n, 1), jnp.float32),
                   jax.ShapeDtypeStruct((n, 1), jnp.float32)),
        grid_spec=pltpu.PrefetchScalarGridSpec(
            num_scalar_prefetch=0,
            grid=(n // blk,),
            in_specs=[pl.BlockSpec((blk, fin), lambda i: (i, 0)),
                      pl.BlockSpec((fin, fo), lambda i: (0, 0)),
                      pl.BlockSpec((1, fo), lambda i: (0, 0)),
                      pl.BlockSpec((1, fo), lambda i: (0, 0))],
            out_specs=(pl.BlockSpec((blk, fo), lambda i: (i, 0)),
                       pl.BlockSpec((blk, 1), lambda i: (i, 0)),
                       pl.BlockSpec((blk, 1), lambda i: (i, 0)))),
        compiler_params=pltpu.CompilerParams(
            dimension_semantics=("parallel",)),
    )(x, w, att_src, att_dst)


# ------------------------------------------------------------------
# Kernel 2: GAT attention + aggregation + bias + SELU.
# Tiled (dst, src) grid with online softmax; src blocks are visited through a
# scalar-prefetched per-dst-block schedule so empty blocks are skipped.
#   e[i,j] = LeakyReLU( a_dst[i] + a_src[j] , 0.2 )   where adj[i,j]=1
#   out[i] = selu( sum_j softmax_j(e[i,:]) * h[j] + bias )
# ------------------------------------------------------------------
def _gat_attn_kernel(cnt_ref, idx_ref, adst_ref, asrc_ref, bias_ref, hs_ref, adj_ref,
                     out_ref, m_sc, l_sc, acc_sc):
    d = pl.program_id(0)
    s = pl.program_id(1)

    @pl.when(s == 0)
    def _():
        m_sc[...] = jnp.full(m_sc.shape, MASK_VALUE, jnp.float32)
        l_sc[...] = jnp.zeros(l_sc.shape, jnp.float32)
        acc_sc[...] = jnp.zeros(acc_sc.shape, jnp.float32)

    @pl.when(s < cnt_ref[d])            # skip empty (dst, src) blocks entirely
    def _():
        logits = adst_ref[...] + asrc_ref[...]               # (TD,1)+(1,TS) -> (TD,TS)
        logits = jnp.maximum(logits, 0.2 * logits)           # LeakyReLU(0.2)
        masked = jnp.where(adj_ref[...] != 0, logits, MASK_VALUE)   # int8 compared directly

        # online softmax over incoming edges of each dst row
        m_prev = m_sc[...]
        m_new = jnp.maximum(m_prev, jnp.max(masked, axis=-1, keepdims=True))
        alpha = jnp.exp(m_prev - m_new)
        p = jnp.exp(masked - m_new)       # exactly 0 on masked entries (underflow)
        l_sc[...] = alpha * l_sc[...] + jnp.sum(p, axis=-1, keepdims=True)
        acc_sc[...] = alpha * acc_sc[...] + jnp.dot(
            p.astype(jnp.bfloat16), hs_ref[...], preferred_element_type=jnp.float32)
        m_sc[...] = m_new

    @pl.when(s == pl.num_programs(1) - 1)
    def _():
        inv_l = pl.reciprocal(l_sc[...], approx=False)
        out = acc_sc[...] * inv_l + bias_ref[...]
        out_ref[...] = _selu(out).astype(out_ref.dtype)


def gat_attention_selu(h, a_src, a_dst, bias, adj, blk_cnt, blk_idx, td, ts):
    n, fo = h.shape
    nd, ns = n // td, n // ts
    a_src_row = a_src.reshape(1, n)      # (n,1) -> (1,n): contiguous, cheap
    return pl.pallas_call(
        _gat_attn_kernel,
        out_shape=jax.ShapeDtypeStruct((n, fo), jnp.bfloat16),
        grid_spec=pltpu.PrefetchScalarGridSpec(
            num_scalar_prefetch=2,       # (blk_cnt, blk_idx) land in SMEM
            grid=(nd, ns),
            in_specs=[
                pl.BlockSpec((td, 1), lambda d, s, cnt, idx: (d, 0)),            # a_dst
                pl.BlockSpec((1, ts), lambda d, s, cnt, idx: (0, idx[d, s])),    # a_src
                pl.BlockSpec((1, fo), lambda d, s, cnt, idx: (0, 0)),            # bias
                pl.BlockSpec((ts, fo), lambda d, s, cnt, idx: (idx[d, s], 0)),   # h (src rows)
                pl.BlockSpec((td, ts), lambda d, s, cnt, idx: (d, idx[d, s])),   # adj int8
            ],
            out_specs=pl.BlockSpec((td, fo), lambda d, s, cnt, idx: (d, 0)),
            scratch_shapes=[
                pltpu.VMEM((td, 1), jnp.float32),   # running max
                pltpu.VMEM((td, 1), jnp.float32),   # running denom
                pltpu.VMEM((td, fo), jnp.float32),  # running weighted sum
            ]),
        compiler_params=pltpu.CompilerParams(
            dimension_semantics=("parallel", "arbitrary"),
            vmem_limit_bytes=32 * 1024 * 1024),
    )(blk_cnt, blk_idx, a_dst, a_src_row, bias, h, adj)


# ------------------------------------------------------------------
# Kernel 3: global_mean_pool (P @ h, tiled over nodes) + SELU + fc1 + SELU + fc2.
# ------------------------------------------------------------------
def _pool_mlp_kernel(pool_ref, h_ref, w1_ref, b1_ref, w2_ref, b2_ref,
                     logits_ref, feat_ref, acc_sc):
    s = pl.program_id(0)

    @pl.when(s == 0)
    def _():
        acc_sc[...] = jnp.zeros(acc_sc.shape, jnp.float32)

    acc_sc[...] += jnp.dot(pool_ref[...], h_ref[...],
                           preferred_element_type=jnp.float32)      # bf16 MXU

    @pl.when(s == pl.num_programs(0) - 1)
    def _():
        pooled = _selu(acc_sc[...])
        feat = _selu(jnp.dot(pooled.astype(jnp.bfloat16), w1_ref[...],
                             preferred_element_type=jnp.float32) + b1_ref[...])
        feat_ref[...] = feat
        logits_ref[...] = jnp.dot(feat.astype(jnp.bfloat16), w2_ref[...],
                                  preferred_element_type=jnp.float32) + b2_ref[...]


def pool_mlp(pool, h, w1, b1, w2, b2, *, block_n=2048):
    gp, n = pool.shape
    fo = h.shape[1]
    hid = w1.shape[1]
    c = w2.shape[1]
    tn = _pick_block(n, block_n)
    return pl.pallas_call(
        _pool_mlp_kernel,
        out_shape=(jax.ShapeDtypeStruct((gp, c), jnp.float32),
                   jax.ShapeDtypeStruct((gp, hid), jnp.float32)),
        grid_spec=pltpu.PrefetchScalarGridSpec(
            num_scalar_prefetch=0,
            grid=(n // tn,),
            in_specs=[pl.BlockSpec((gp, tn), lambda i: (0, i)),
                      pl.BlockSpec((tn, fo), lambda i: (i, 0)),
                      pl.BlockSpec((fo, hid), lambda i: (0, 0)),
                      pl.BlockSpec((1, hid), lambda i: (0, 0)),
                      pl.BlockSpec((hid, c), lambda i: (0, 0)),
                      pl.BlockSpec((1, c), lambda i: (0, 0))],
            out_specs=(pl.BlockSpec((gp, c), lambda i: (0, 0)),
                       pl.BlockSpec((gp, hid), lambda i: (0, 0))),
            scratch_shapes=[pltpu.VMEM((gp, fo), jnp.float32)]),
        compiler_params=pltpu.CompilerParams(
            dimension_semantics=("arbitrary",),
            vmem_limit_bytes=32 * 1024 * 1024),
    )(pool, h, w1, b1, w2, b2)


# ------------------------------------------------------------------
# Glue (plain JAX, graph-structure constants built once outside the kernels).
# ------------------------------------------------------------------
def build_adjacency(edge_index, padded_nodes):
    src, dst = edge_index[0], edge_index[1]
    adj = jnp.zeros((padded_nodes, padded_nodes), jnp.int8)
    adj = adj.at[dst, src].set(1)                     # message flows src -> dst
    diag = jnp.arange(padded_nodes)
    adj = adj.at[diag, diag].set(1)                   # self loops (every row non-empty, incl. padded)
    return adj


def build_block_schedule(edge_index, padded_nodes, td, ts):
    """Per-dst-block count and (padded-with-last-valid) list of nonzero src blocks."""
    nd, ns = padded_nodes // td, padded_nodes // ts
    src, dst = edge_index[0], edge_index[1]
    nz = jnp.zeros((nd, ns), jnp.bool_)
    nz = nz.at[dst // td, src // ts].set(True)
    diag = jnp.arange(padded_nodes)
    nz = nz.at[diag // td, diag // ts].set(True)       # self-loop blocks => cnt >= 1 everywhere
    cnt = jnp.maximum(jnp.sum(nz, axis=1).astype(jnp.int32), 1)
    col = jnp.arange(ns, dtype=jnp.int32)[None, :]
    key = jnp.where(nz, col, ns + col)                 # nonzero block ids first, in order
    order = jnp.argsort(key, axis=1).astype(jnp.int32)
    pos = jnp.arange(ns, dtype=jnp.int32)[None, :]
    safe = jnp.minimum(pos, cnt[:, None] - 1)          # repeat last valid block for skipped steps
    blk_idx = jnp.take_along_axis(order, safe, axis=1)
    return cnt, blk_idx


def build_pool_matrix(batch, padded_graphs, padded_nodes):
    n = batch.shape[0]
    onehot = (batch[None, :] == jnp.arange(padded_graphs)[:, None]).astype(jnp.float32)
    counts = jnp.sum(onehot, axis=1, keepdims=True)
    pool = onehot / jnp.maximum(counts, 1.0)           # [Gp, N] mean pooling
    return jnp.pad(pool, ((0, 0), (0, padded_nodes - n))).astype(jnp.bfloat16)


def init_params(key, num_features, nhid, num_classes):
    h2 = 2 * nhid
    fin_p = _round_up(num_features, LANE)
    fo_p = _round_up(h2, LANE)
    hid_p = _round_up(nhid, LANE)
    c_p = _round_up(num_classes, LANE)
    ks = jax.random.split(key, 12)
    s = 0.1

    def rnd(k, shape):
        return jax.random.normal(k, shape, jnp.float32) * s

    return dict(
        conv1_w=_pad2(rnd(ks[0], (num_features, h2)), fin_p, fo_p).astype(jnp.bfloat16),
        conv1_att_src=_pad2(rnd(ks[1], (1, h2)), 1, fo_p),            # f32: VPU use only
        conv1_att_dst=_pad2(rnd(ks[2], (1, h2)), 1, fo_p),
        conv1_b=_pad2(rnd(ks[3], (1, h2)), 1, fo_p),
        conv2_w=_pad2(rnd(ks[4], (h2, h2)), fo_p, fo_p).astype(jnp.bfloat16),
        conv2_att_src=_pad2(rnd(ks[5], (1, h2)), 1, fo_p),
        conv2_att_dst=_pad2(rnd(ks[6], (1, h2)), 1, fo_p),
        conv2_b=_pad2(rnd(ks[7], (1, h2)), 1, fo_p),
        fc1_w=_pad2(rnd(ks[8], (h2, nhid)), fo_p, hid_p).astype(jnp.bfloat16),
        fc1_b=_pad2(rnd(ks[9], (1, nhid)), 1, hid_p),
        fc2_w=_pad2(rnd(ks[10], (nhid, num_classes)), hid_p, c_p).astype(jnp.bfloat16),
        fc2_b=_pad2(rnd(ks[11], (1, num_classes)), 1, c_p),
    )


def gat_forward(params, x, adj, pool, blk_cnt, blk_idx,
                td, ts, num_graphs, nhid, num_classes):
    # conv1 + SELU
    h, a_s, a_d = linear_project(x, params["conv1_w"],
                                 params["conv1_att_src"], params["conv1_att_dst"])
    h = gat_attention_selu(h, a_s, a_d, params["conv1_b"], adj, blk_cnt, blk_idx, td, ts)
    # conv2 + SELU
    h, a_s, a_d = linear_project(h, params["conv2_w"],
                                 params["conv2_att_src"], params["conv2_att_dst"])
    h = gat_attention_selu(h, a_s, a_d, params["conv2_b"], adj, blk_cnt, blk_idx, td, ts)
    # global_mean_pool + SELU + fc1 + SELU + (dropout = id in eval) + fc2
    logits_p, feat_p = pool_mlp(pool, h, params["fc1_w"], params["fc1_b"],
                                params["fc2_w"], params["fc2_b"])
    return logits_p[:num_graphs, :num_classes], feat_p[:num_graphs, :nhid]


if __name__ == "__main__":
    num_features, nhid, num_classes = 4, 8, 3
    num_graphs, nodes_per_graph = 2, 8
    num_nodes = num_graphs * nodes_per_graph

    fin_p = _round_up(num_features, LANE)
    np_nodes = _round_up(num_nodes, LANE)
    gp = _round_up(num_graphs, 8)

    key = jax.random.PRNGKey(0)
    k_x, k_p = jax.random.split(key)

    # node features (padded to lane-dense layout, bf16 MXU operands)
    x = jax.random.normal(k_x, (num_nodes, num_features), jnp.float32)
    x_p = _pad2(x, np_nodes, fin_p).astype(jnp.bfloat16)

    # bidirectional ring edges within each graph
    src_list, dst_list = [], []
    for g in range(num_graphs):
        base = g * nodes_per_graph
        for i in range(nodes_per_graph):
            j = (i + 1) % nodes_per_graph
            src_list += [base + i, base + j]
            dst_list += [base + j, base + i]
    edge_index = jnp.array([src_list, dst_list], dtype=jnp.int32)
    batch = jnp.array([g for g in range(num_graphs) for _ in range(nodes_per_graph)],
                      dtype=jnp.int32)

    td, ts = attn_tiles(np_nodes)
    adj = build_adjacency(edge_index, np_nodes)
    blk_cnt, blk_idx = build_block_schedule(edge_index, np_nodes, td, ts)
    pool = build_pool_matrix(batch, gp, np_nodes)
    params = init_params(k_p, num_features, nhid, num_classes)

    fwd = jax.jit(functools.partial(gat_forward, td=td, ts=ts,
                                    num_graphs=num_graphs, nhid=nhid,
                                    num_classes=num_classes))
    logits, features = fwd(params, x_p, adj, pool, blk_cnt, blk_idx)
    jax.block_until_ready((logits, features))

    assert logits.shape == (num_graphs, num_classes)
    assert features.shape == (num_graphs, nhid)
    assert bool(jnp.all(jnp.isfinite(logits))) and bool(jnp.all(jnp.isfinite(features)))
    print("KERNEL_OK")
</pallas_src>

<mosaic_0001>
module attributes {stable_mosaic.version = 11 : i64} {
  func.func @_project_kernel(%arg0: i32, %arg1: memref<128x128xbf16, #tpu.memory_space<vmem>>, %arg2: memref<128x128xbf16, #tpu.memory_space<vmem>>, %arg3: memref<1x128xf32, #tpu.memory_space<vmem>>, %arg4: memref<1x128xf32, #tpu.memory_space<vmem>>, %arg5: memref<128x128xbf16, #tpu.memory_space<vmem>>, %arg6: memref<128x1xf32, #tpu.memory_space<vmem>>, %arg7: memref<128x1xf32, #tpu.memory_space<vmem>>) attributes {dimension_semantics = [#tpu.dimension_semantics<parallel>], iteration_bounds = array<i64: 1>, scalar_prefetch = 0 : i64, scratch_operands = 0 : i64, tpu.core_type = #tpu.core_type<tc>, window_params = [{transform_indices = @transform_0, window_bounds = array<i64: 128, 128>}, {pipeline_mode = #tpu.pipeline_mode<synchronous>, transform_indices = @transform_1, window_bounds = array<i64: 128, 128>}, {pipeline_mode = #tpu.pipeline_mode<synchronous>, transform_indices = @transform_2, window_bounds = array<i64: 1, 128>}, {pipeline_mode = #tpu.pipeline_mode<synchronous>, transform_indices = @transform_3, window_bounds = array<i64: 1, 128>}, {transform_indices = @transform_4, window_bounds = array<i64: 128, 128>}, {transform_indices = @transform_5, window_bounds = array<i64: 128, 1>}, {transform_indices = @transform_6, window_bounds = array<i64: 128, 1>}]} {
    %c0 = arith.constant 0 : index
    %c0_0 = arith.constant 0 : index
    %0 = vector.load %arg1[%c0, %c0_0] : memref<128x128xbf16, #tpu.memory_space<vmem>>, vector<128x128xbf16>
    %c0_1 = arith.constant 0 : index
    %c0_2 = arith.constant 0 : index
    %1 = vector.load %arg2[%c0_1, %c0_2] : memref<128x128xbf16, #tpu.memory_space<vmem>>, vector<128x128xbf16>
    %cst = arith.constant dense<0.000000e+00> : vector<128x128xf32>
    %2 = tpu.matmul %0, %1, %cst {dimension_numbers = #tpu.dot_dimension_numbers<[1], [0], [0], [1], [0, 0, 1, 1], [], []>} : vector<128x128xbf16>, vector<128x128xbf16>, vector<128x128xf32> -> vector<128x128xf32>
    %3 = arith.truncf %2 : vector<128x128xf32> to vector<128x128xbf16>
    %c0_3 = arith.constant 0 : index
    %c0_4 = arith.constant 0 : index
    %4 = vector.load %arg5[%c0_3, %c0_4] : memref<128x128xbf16, #tpu.memory_space<vmem>>, vector<128x128xbf16>
    tpu.vector_store %arg5[%c0_3, %c0_4], %3 {strides = array<i32>} : memref<128x128xbf16, #tpu.memory_space<vmem>>, vector<128x128xbf16>,
    %c0_5 = arith.constant 0 : index
    %c0_6 = arith.constant 0 : index
    %5 = vector.load %arg3[%c0_5, %c0_6] : memref<1x128xf32, #tpu.memory_space<vmem>>, vector<1x128xf32>
    %6 = vector.broadcast %5 : vector<1x128xf32> to vector<128x128xf32>
    %7 = arith.mulf %2, %6 : vector<128x128xf32>
    %cst_7 = arith.constant dense<0.000000e+00> : vector<128xf32>
    %8 = vector.multi_reduction <add>, %7, %cst_7 [1] : vector<128x128xf32> to vector<128xf32>
    %9 = vector.shape_cast %8 : vector<128xf32> to vector<128x1xf32>
    %c0_8 = arith.constant 0 : index
    %c0_9 = arith.constant 0 : index
    %10 = vector.load %arg6[%c0_8, %c0_9] : memref<128x1xf32, #tpu.memory_space<vmem>>, vector<128x1xf32>
    tpu.vector_store %arg6[%c0_8, %c0_9], %9 {strides = array<i32>} : memref<128x1xf32, #tpu.memory_space<vmem>>, vector<128x1xf32>,
    %c0_10 = arith.constant 0 : index
    %c0_11 = arith.constant 0 : index
    %11 = vector.load %arg4[%c0_10, %c0_11] : memref<1x128xf32, #tpu.memory_space<vmem>>, vector<1x128xf32>
    %12 = vector.broadcast %11 : vector<1x128xf32> to vector<128x128xf32>
    %13 = arith.mulf %2, %12 : vector<128x128xf32>
    %cst_12 = arith.constant dense<0.000000e+00> : vector<128xf32>
    %14 = vector.multi_reduction <add>, %13, %cst_12 [1] : vector<128x128xf32> to vector<128xf32>
    %15 = vector.shape_cast %14 : vector<128xf32> to vector<128x1xf32>
    %c0_13 = arith.constant 0 : index
    %c0_14 = arith.constant 0 : index
    %16 = vector.load %arg7[%c0_13, %c0_14] : memref<128x1xf32, #tpu.memory_space<vmem>>, vector<128x1xf32>
    tpu.vector_store %arg7[%c0_13, %c0_14], %15 {strides = array<i32>} : memref<128x1xf32, #tpu.memory_space<vmem>>, vector<128x1xf32>,
    return
  }
  func.func @transform_0(%arg0: i32) -> (i32, i32) {
    %c0_i32 = arith.constant 0 : i32
    %c0_i32_0 = arith.constant 0 : i32
    return %arg0, %c0_i32 : i32, i32
  }
  func.func @transform_1(%arg0: i32) -> (i32, i32) {
    %c0_i32 = arith.constant 0 : i32
    %c0_i32_0 = arith.constant 0 : i32
    %c0_i32_1 = arith.constant 0 : i32
    return %c0_i32, %c0_i32_0 : i32, i32
  }
  func.func @transform_2(%arg0: i32) -> (i32, i32) {
    %c0_i32 = arith.constant 0 : i32
    %c0_i32_0 = arith.constant 0 : i32
    %c0_i32_1 = arith.constant 0 : i32
    return %c0_i32, %c0_i32_0 : i32, i32
  }
  func.func @transform_3(%arg0: i32) -> (i32, i32) {
    %c0_i32 = arith.constant 0 : i32
    %c0_i32_0 = arith.constant 0 : i32
    %c0_i32_1 = arith.constant 0 : i32
    return %c0_i32, %c0_i32_0 : i32, i32
  }
  func.func @transform_4(%arg0: i32) -> (i32, i32) {
    %c0_i32 = arith.constant 0 : i32
    %c0_i32_0 = arith.constant 0 : i32
    return %arg0, %c0_i32 : i32, i32
  }
  func.func @transform_5(%arg0: i32) -> (i32, i32) {
    %c0_i32 = arith.constant 0 : i32
    %c0_i32_0 = arith.constant 0 : i32
    return %arg0, %c0_i32 : i32, i32
  }
  func.func @transform_6(%arg0: i32) -> (i32, i32) {
    %c0_i32 = arith.constant 0 : i32
    %c0_i32_0 = arith.constant 0 : i32
    return %arg0, %c0_i32 : i32, i32
  }
}

module attributes {stable_mosaic.version = 11 : i64} {
  func.func @_gat_attn_kernel(%arg0: i32, %arg1: i32, %arg2: memref<1xi32, #tpu.memory_space<smem>>, %arg3: memref<1x1xi32, #tpu.memory_space<smem>>, %arg4: memref<128x1xf32, #tpu.memory_space<vmem>>, %arg5: memref<1x128xf32, #tpu.memory_space<vmem>>, %arg6: memref<1x128xf32, #tpu.memory_space<vmem>>, %arg7: memref<128x128xbf16, #tpu.memory_space<vmem>>, %arg8: memref<128x128xi8, #tpu.memory_space<vmem>>, %arg9: memref<128x128xbf16, #tpu.memory_space<vmem>>, %arg10: memref<128x1xf32, #tpu.memory_space<vmem>>, %arg11: memref<128x1xf32, #tpu.memory_space<vmem>>, %arg12: memref<128x128xf32, #tpu.memory_space<vmem>>) attributes {dimension_semantics = [#tpu.dimension_semantics<parallel>, #tpu.dimension_semantics<arbitrary>], iteration_bounds = array<i64: 1, 1>, scalar_prefetch = 2 : i64, scratch_operands = 3 : i64, tpu.core_type = #tpu.core_type<tc>, window_params = [{transform_indices = @transform_0, window_bounds = array<i64: 128, 1>}, {transform_indices = @transform_1, window_bounds = array<i64: 1, 128>}, {pipeline_mode = #tpu.pipeline_mode<synchronous>, transform_indices = @transform_2, window_bounds = array<i64: 1, 128>}, {transform_indices = @transform_3, window_bounds = array<i64: 128, 128>}, {transform_indices = @transform_4, window_bounds = array<i64: 128, 128>}, {transform_indices = @transform_5, window_bounds = array<i64: 128, 128>}]} {
    %c0_i32 = arith.constant 0 : i32
    %0 = arith.cmpi eq, %arg1, %c0_i32 : i32
    %1 = arith.extui %0 : i1 to i32
    %c0_i32_0 = arith.constant 0 : i32
    %2 = arith.cmpi ne, %1, %c0_i32_0 : i32
    scf.if %2 {
      %cst = arith.constant -1.000000e+30 : f32
      %11 = vector.broadcast %cst : f32 to vector<128x1xf32>
      %c0 = arith.constant 0 : index
      %c0_4 = arith.constant 0 : index
      %12 = vector.load %arg10[%c0, %c0_4] : memref<128x1xf32, #tpu.memory_space<vmem>>, vector<128x1xf32>
      tpu.vector_store %arg10[%c0, %c0_4], %11 {strides = array<i32>} : memref<128x1xf32, #tpu.memory_space<vmem>>, vector<128x1xf32>,
      %cst_5 = arith.constant 0.000000e+00 : f32
      %13 = vector.broadcast %cst_5 : f32 to vector<128x1xf32>
      %c0_6 = arith.constant 0 : index
      %c0_7 = arith.constant 0 : index
      %14 = vector.load %arg11[%c0_6, %c0_7] : memref<128x1xf32, #tpu.memory_space<vmem>>, vector<128x1xf32>
      tpu.vector_store %arg11[%c0_6, %c0_7], %13 {strides = array<i32>} : memref<128x1xf32, #tpu.memory_space<vmem>>, vector<128x1xf32>,
      %cst_8 = arith.constant 0.000000e+00 : f32
      %15 = vector.broadcast %cst_8 : f32 to vector<128x128xf32>
      %c0_9 = arith.constant 0 : index
      %c0_10 = arith.constant 0 : index
      %16 = vector.load %arg12[%c0_9, %c0_10] : memref<128x128xf32, #tpu.memory_space<vmem>>, vector<128x128xf32>
      tpu.vector_store %arg12[%c0_9, %c0_10], %15 {strides = array<i32>} : memref<128x128xf32, #tpu.memory_space<vmem>>, vector<128x128xf32>,
    } else {
    }
    %3 = arith.index_cast %arg0 : i32 to index
    %4 = memref.load %arg2[%3] : memref<1xi32, #tpu.memory_space<smem>>
    %5 = arith.cmpi slt, %arg1, %4 : i32
    %6 = arith.extui %5 : i1 to i32
    %c0_i32_1 = arith.constant 0 : i32
    %7 = arith.cmpi ne, %6, %c0_i32_1 : i32
    scf.if %7 {
      %c0 = arith.constant 0 : index
      %c0_4 = arith.constant 0 : index
      %11 = vector.load %arg4[%c0, %c0_4] : memref<128x1xf32, #tpu.memory_space<vmem>>, vector<128x1xf32>
      %c0_5 = arith.constant 0 : index
      %c0_6 = arith.constant 0 : index
      %12 = vector.load %arg5[%c0_5, %c0_6] : memref<1x128xf32, #tpu.memory_space<vmem>>, vector<1x128xf32>
      %13 = vector.broadcast %11 : vector<128x1xf32> to vector<128x128xf32>
      %14 = vector.broadcast %12 : vector<1x128xf32> to vector<128x128xf32>
      %15 = arith.addf %13, %14 : vector<128x128xf32>
      %cst = arith.constant 2.000000e-01 : f32
      %16 = vector.broadcast %cst : f32 to vector<128x128xf32>
      %17 = arith.mulf %16, %15 : vector<128x128xf32>
      %18 = arith.maximumf %15, %17 : vector<128x128xf32>
      %c0_7 = arith.constant 0 : index
      %c0_8 = arith.constant 0 : index
      %19 = vector.load %arg8[%c0_7, %c0_8] : memref<128x128xi8, #tpu.memory_space<vmem>>, vector<128x128xi8>
      %c0_i8 = arith.constant 0 : i8
      %20 = vector.broadcast %c0_i8 : i8 to vector<128x128xi8>
      %21 = arith.cmpi ne, %19, %20 : vector<128x128xi8>
      %cst_9 = arith.constant -1.000000e+30 : f32
      %22 = vector.broadcast %cst_9 : f32 to vector<128x128xf32>
      %23 = arith.select %21, %18, %22 : vector<128x128xi1>, vector<128x128xf32>
      %c0_10 = arith.constant 0 : index
      %c0_11 = arith.constant 0 : index
      %24 = vector.load %arg10[%c0_10, %c0_11] : memref<128x1xf32, #tpu.memory_space<vmem>>, vector<128x1xf32>
      %cst_12 = arith.constant dense<0xFF800000> : vector<128xf32>
      %25 = vector.multi_reduction <maximumf>, %23, %cst_12 [1] : vector<128x128xf32> to vector<128xf32>
      %26 = vector.shape_cast %25 : vector<128xf32> to vector<128x1xf32>
      %27 = arith.maximumf %24, %26 : vector<128x1xf32>
      %28 = arith.subf %24, %27 : vector<128x1xf32>
      %29 = math.exp %28 : vector<128x1xf32>
      %30 = vector.broadcast %27 : vector<128x1xf32> to vector<128x128xf32>
      %31 = arith.subf %23, %30 : vector<128x128xf32>
      %32 = math.exp %31 : vector<128x128xf32>
      %c0_13 = arith.constant 0 : index
      %c0_14 = arith.constant 0 : index
      %33 = vector.load %arg11[%c0_13, %c0_14] : memref<128x1xf32, #tpu.memory_space<vmem>>, vector<128x1xf32>
      %34 = arith.mulf %29, %33 : vector<128x1xf32>
      %cst_15 = arith.constant dense<0.000000e+00> : vector<128xf32>
      %35 = vector.multi_reduction <add>, %32, %cst_15 [1] : vector<128x128xf32> to vector<128xf32>
      %36 = vector.shape_cast %35 : vector<128xf32> to vector<128x1xf32>
      %37 = arith.addf %34, %36 : vector<128x1xf32>
      %c0_16 = arith.constant 0 : index
      %c0_17 = arith.constant 0 : index
      %38 = vector.load %arg11[%c0_16, %c0_17] : memref<128x1xf32, #tpu.memory_space<vmem>>, vector<128x1xf32>
      tpu.vector_store %arg11[%c0_16, %c0_17], %37 {strides = array<i32>} : memref<128x1xf32, #tpu.memory_space<vmem>>, vector<128x1xf32>,
      %c0_18 = arith.constant 0 : index
      %c0_19 = arith.constant 0 : index
      %39 = vector.load %arg12[%c0_18, %c0_19] : memref<128x128xf32, #tpu.memory_space<vmem>>, vector<128x128xf32>
      %40 = vector.broadcast %29 : vector<128x1xf32> to vector<128x128xf32>
      %41 = arith.mulf %40, %39 : vector<128x128xf32>
      %42 = arith.truncf %32 : vector<128x128xf32> to vector<128x128xbf16>
      %c0_20 = arith.constant 0 : index
      %c0_21 = arith.constant 0 : index
      %43 = vector.load %arg7[%c0_20, %c0_21] : memref<128x128xbf16, #tpu.memory_space<vmem>>, vector<128x128xbf16>
      %cst_22 = arith.constant dense<0.000000e+00> : vector<128x128xf32>
      %44 = tpu.matmul %42, %43, %cst_22 {dimension_numbers = #tpu.dot_dimension_numbers<[1], [0], [0], [1], [0, 0, 1, 1], [], []>} : vector<128x128xbf16>, vector<128x128xbf16>, vector<128x128xf32> -> vector<128x128xf32>
      %45 = arith.addf %41, %44 : vector<128x128xf32>
      %c0_23 = arith.constant 0 : index
      %c0_24 = arith.constant 0 : index
      %46 = vector.load %arg12[%c0_23, %c0_24] : memref<128x128xf32, #tpu.memory_space<vmem>>, vector<128x128xf32>
      tpu.vector_store %arg12[%c0_23, %c0_24], %45 {strides = array<i32>} : memref<128x128xf32, #tpu.memory_space<vmem>>, vector<128x128xf32>,
      %c0_25 = arith.constant 0 : index
      %c0_26 = arith.constant 0 : index
      %47 = vector.load %arg10[%c0_25, %c0_26] : memref<128x1xf32, #tpu.memory_space<vmem>>, vector<128x1xf32>
      tpu.vector_store %arg10[%c0_25, %c0_26], %27 {strides = array<i32>} : memref<128x1xf32, #tpu.memory_space<vmem>>, vector<128x1xf32>,
    } else {
    }
    %c0_i32_2 = arith.constant 0 : i32
    %8 = arith.cmpi eq, %arg1, %c0_i32_2 : i32
    %9 = arith.extui %8 : i1 to i32
    %c0_i32_3 = arith.constant 0 : i32
    %10 = arith.cmpi ne, %9, %c0_i32_3 : i32
    scf.if %10 {
      %c0 = arith.constant 0 : index
      %c0_4 = arith.constant 0 : index
      %11 = vector.load %arg11[%c0, %c0_4] : memref<128x1xf32, #tpu.memory_space<vmem>>, vector<128x1xf32>
      %12 = tpu.reciprocal %11 : vector<128x1xf32> -> vector<128x1xf32>
      %c0_5 = arith.constant 0 : index
      %c0_6 = arith.constant 0 : index
      %13 = vector.load %arg12[%c0_5, %c0_6] : memref<128x128xf32, #tpu.memory_space<vmem>>, vector<128x128xf32>
      %14 = vector.broadcast %12 : vector<128x1xf32> to vector<128x128xf32>
      %15 = arith.mulf %13, %14 : vector<128x128xf32>
      %c0_7 = arith.constant 0 : index
      %c0_8 = arith.constant 0 : index
      %16 = vector.load %arg6[%c0_7, %c0_8] : memref<1x128xf32, #tpu.memory_space<vmem>>, vector<1x128xf32>
      %17 = vector.broadcast %16 : vector<1x128xf32> to vector<128x128xf32>
      %18 = arith.addf %15, %17 : vector<128x128xf32>
      %cst = arith.constant 0.000000e+00 : f32
      %19 = vector.broadcast %cst : f32 to vector<128x128xf32>
      %20 = arith.cmpf ogt, %18, %19 : vector<128x128xf32>
      %21 = math.exp %18 : vector<128x128xf32>
      %cst_9 = arith.constant 1.000000e+00 : f32
      %22 = vector.broadcast %cst_9 : f32 to vector<128x128xf32>
      %23 = arith.subf %21, %22 : vector<128x128xf32>
      %cst_10 = arith.constant 1.67326319 : f32
      %24 = vector.broadcast %cst_10 : f32 to vector<128x128xf32>
      %25 = arith.mulf %24, %23 : vector<128x128xf32>
      %26 = arith.select %20, %18, %25 : vector<128x128xi1>, vector<128x128xf32>
      %cst_11 = arith.constant 1.05070102 : f32
      %27 = vector.broadcast %cst_11 : f32 to vector<128x128xf32>
      %28 = arith.mulf %27, %26 : vector<128x128xf32>
      %29 = arith.truncf %28 : vector<128x128xf32> to vector<128x128xbf16>
      %c0_12 = arith.constant 0 : index
      %c0_13 = arith.constant 0 : index
      %30 = vector.load %arg9[%c0_12, %c0_13] : memref<128x128xbf16, #tpu.memory_space<vmem>>, vector<128x128xbf16>
      tpu.vector_store %arg9[%c0_12, %c0_13], %29 {strides = array<i32>} : memref<128x128xbf16, #tpu.memory_space<vmem>>, vector<128x128xbf16>,
    } else {
    }
    return
  }
  func.func @transform_0(%arg0: i32, %arg1: i32, %arg2: memref<1xi32, #tpu.memory_space<smem>>, %arg3: memref<1x1xi32, #tpu.memory_space<smem>>) -> (i32, i32) {
    %c0_i32 = arith.constant 0 : i32
    %c0_i32_0 = arith.constant 0 : i32
    return %arg0, %c0_i32 : i32, i32
  }
  func.func @transform_1(%arg0: i32, %arg1: i32, %arg2: memref<1xi32, #tpu.memory_space<smem>>, %arg3: memref<1x1xi32, #tpu.memory_space<smem>>) -> (i32, i32) {
    %0 = arith.index_cast %arg0 : i32 to index
    %1 = arith.index_cast %arg1 : i32 to index
    %2 = memref.load %arg3[%0, %1] : memref<1x1xi32, #tpu.memory_space<smem>>
    %c0_i32 = arith.constant 0 : i32
    %c0_i32_0 = arith.constant 0 : i32
    return %c0_i32, %2 : i32, i32
  }
  func.func @transform_2(%arg0: i32, %arg1: i32, %arg2: memref<1xi32, #tpu.memory_space<smem>>, %arg3: memref<1x1xi32, #tpu.memory_space<smem>>) -> (i32, i32) {
    %c0_i32 = arith.constant 0 : i32
    %c0_i32_0 = arith.constant 0 : i32
    %c0_i32_1 = arith.constant 0 : i32
    return %c0_i32, %c0_i32_0 : i32, i32
  }
  func.func @transform_3(%arg0: i32, %arg1: i32, %arg2: memref<1xi32, #tpu.memory_space<smem>>, %arg3: memref<1x1xi32, #tpu.memory_space<smem>>) -> (i32, i32) {
    %0 = arith.index_cast %arg0 : i32 to index
    %1 = arith.index_cast %arg1 : i32 to index
    %2 = memref.load %arg3[%0, %1] : memref<1x1xi32, #tpu.memory_space<smem>>
    %c0_i32 = arith.constant 0 : i32
    %c0_i32_0 = arith.constant 0 : i32
    return %2, %c0_i32 : i32, i32
  }
  func.func @transform_4(%arg0: i32, %arg1: i32, %arg2: memref<1xi32, #tpu.memory_space<smem>>, %arg3: memref<1x1xi32, #tpu.memory_space<smem>>) -> (i32, i32) {
    %0 = arith.index_cast %arg0 : i32 to index
    %1 = arith.index_cast %arg1 : i32 to index
    %2 = memref.load %arg3[%0, %1] : memref<1x1xi32, #tpu.memory_space<smem>>
    %c0_i32 = arith.constant 0 : i32
    return %arg0, %2 : i32, i32
  }
  func.func @transform_5(%arg0: i32, %arg1: i32, %arg2: memref<1xi32, #tpu.memory_space<smem>>, %arg3: memref<1x1xi32, #tpu.memory_space<smem>>) -> (i32, i32) {
    %c0_i32 = arith.constant 0 : i32
    %c0_i32_0 = arith.constant 0 : i32
    return %arg0, %c0_i32 : i32, i32
  }
}

module attributes {stable_mosaic.version = 11 : i64} {
  func.func @_project_kernel(%arg0: i32, %arg1: memref<128x128xbf16, #tpu.memory_space<vmem>>, %arg2: memref<128x128xbf16, #tpu.memory_space<vmem>>, %arg3: memref<1x128xf32, #tpu.memory_space<vmem>>, %arg4: memref<1x128xf32, #tpu.memory_space<vmem>>, %arg5: memref<128x128xbf16, #tpu.memory_space<vmem>>, %arg6: memref<128x1xf32, #tpu.memory_space<vmem>>, %arg7: memref<128x1xf32, #tpu.memory_space<vmem>>) attributes {dimension_semantics = [#tpu.dimension_semantics<parallel>], iteration_bounds = array<i64: 1>, scalar_prefetch = 0 : i64, scratch_operands = 0 : i64, tpu.core_type = #tpu.core_type<tc>, window_params = [{transform_indices = @transform_0, window_bounds = array<i64: 128, 128>}, {pipeline_mode = #tpu.pipeline_mode<synchronous>, transform_indices = @transform_1, window_bounds = array<i64: 128, 128>}, {pipeline_mode = #tpu.pipeline_mode<synchronous>, transform_indices = @transform_2, window_bounds = array<i64: 1, 128>}, {pipeline_mode = #tpu.pipeline_mode<synchronous>, transform_indices = @transform_3, window_bounds = array<i64: 1, 128>}, {transform_indices = @transform_4, window_bounds = array<i64: 128, 128>}, {transform_indices = @transform_5, window_bounds = array<i64: 128, 1>}, {transform_indices = @transform_6, window_bounds = array<i64: 128, 1>}]} {
    %c0 = arith.constant 0 : index
    %c0_0 = arith.constant 0 : index
    %0 = vector.load %arg1[%c0, %c0_0] : memref<128x128xbf16, #tpu.memory_space<vmem>>, vector<128x128xbf16>
    %c0_1 = arith.constant 0 : index
    %c0_2 = arith.constant 0 : index
    %1 = vector.load %arg2[%c0_1, %c0_2] : memref<128x128xbf16, #tpu.memory_space<vmem>>, vector<128x128xbf16>
    %cst = arith.constant dense<0.000000e+00> : vector<128x128xf32>
    %2 = tpu.matmul %0, %1, %cst {dimension_numbers = #tpu.dot_dimension_numbers<[1], [0], [0], [1], [0, 0, 1, 1], [], []>} : vector<128x128xbf16>, vector<128x128xbf16>, vector<128x128xf32> -> vector<128x128xf32>
    %3 = arith.truncf %2 : vector<128x128xf32> to vector<128x128xbf16>
    %c0_3 = arith.constant 0 : index
    %c0_4 = arith.constant 0 : index
    %4 = vector.load %arg5[%c0_3, %c0_4] : memref<128x128xbf16, #tpu.memory_space<vmem>>, vector<128x128xbf16>
    tpu.vector_store %arg5[%c0_3, %c0_4], %3 {strides = array<i32>} : memref<128x128xbf16, #tpu.memory_space<vmem>>, vector<128x128xbf16>,
    %c0_5 = arith.constant 0 : index
    %c0_6 = arith.constant 0 : index
    %5 = vector.load %arg3[%c0_5, %c0_6] : memref<1x128xf32, #tpu.memory_space<vmem>>, vector<1x128xf32>
    %6 = vector.broadcast %5 : vector<1x128xf32> to vector<128x128xf32>
    %7 = arith.mulf %2, %6 : vector<128x128xf32>
    %cst_7 = arith.constant dense<0.000000e+00> : vector<128xf32>
    %8 = vector.multi_reduction <add>, %7, %cst_7 [1] : vector<128x128xf32> to vector<128xf32>
    %9 = vector.shape_cast %8 : vector<128xf32> to vector<128x1xf32>
    %c0_8 = arith.constant 0 : index
    %c0_9 = arith.constant 0 : index
    %10 = vector.load %arg6[%c0_8, %c0_9] : memref<128x1xf32, #tpu.memory_space<vmem>>, vector<128x1xf32>
    tpu.vector_store %arg6[%c0_8, %c0_9], %9 {strides = array<i32>} : memref<128x1xf32, #tpu.memory_space<vmem>>, vector<128x1xf32>,
    %c0_10 = arith.constant 0 : index
    %c0_11 = arith.constant 0 : index
    %11 = vector.load %arg4[%c0_10, %c0_11] : memref<1x128xf32, #tpu.memory_space<vmem>>, vector<1x128xf32>
    %12 = vector.broadcast %11 : vector<1x128xf32> to vector<128x128xf32>
    %13 = arith.mulf %2, %12 : vector<128x128xf32>
    %cst_12 = arith.constant dense<0.000000e+00> : vector<128xf32>
    %14 = vector.multi_reduction <add>, %13, %cst_12 [1] : vector<128x128xf32> to vector<128xf32>
    %15 = vector.shape_cast %14 : vector<128xf32> to vector<128x1xf32>
    %c0_13 = arith.constant 0 : index
    %c0_14 = arith.constant 0 : index
    %16 = vector.load %arg7[%c0_13, %c0_14] : memref<128x1xf32, #tpu.memory_space<vmem>>, vector<128x1xf32>
    tpu.vector_store %arg7[%c0_13, %c0_14], %15 {strides = array<i32>} : memref<128x1xf32, #tpu.memory_space<vmem>>, vector<128x1xf32>,
    return
  }
  func.func @transform_0(%arg0: i32) -> (i32, i32) {
    %c0_i32 = arith.constant 0 : i32
    %c0_i32_0 = arith.constant 0 : i32
    return %arg0, %c0_i32 : i32, i32
  }
  func.func @transform_1(%arg0: i32) -> (i32, i32) {
    %c0_i32 = arith.constant 0 : i32
    %c0_i32_0 = arith.constant 0 : i32
    %c0_i32_1 = arith.constant 0 : i32
    return %c0_i32, %c0_i32_0 : i32, i32
  }
  func.func @transform_2(%arg0: i32) -> (i32, i32) {
    %c0_i32 = arith.constant 0 : i32
    %c0_i32_0 = arith.constant 0 : i32
    %c0_i32_1 = arith.constant 0 : i32
    return %c0_i32, %c0_i32_0 : i32, i32
  }
  func.func @transform_3(%arg0: i32) -> (i32, i32) {
    %c0_i32 = arith.constant 0 : i32
    %c0_i32_0 = arith.constant 0 : i32
    %c0_i32_1 = arith.constant 0 : i32
    return %c0_i32, %c0_i32_0 : i32, i32
  }
  func.func @transform_4(%arg0: i32) -> (i32, i32) {
    %c0_i32 = arith.constant 0 : i32
    %c0_i32_0 = arith.constant 0 : i32
    return %arg0, %c0_i32 : i32, i32
  }
  func.func @transform_5(%arg0: i32) -> (i32, i32) {
    %c0_i32 = arith.constant 0 : i32
    %c0_i32_0 = arith.constant 0 : i32
    return %arg0, %c0_i32 : i32, i32
  }
  func.func @transform_6(%arg0: i32) -> (i32, i32) {
    %c0_i32 = arith.constant 0 : i32
    %c0_i32_0 = arith.constant 0 : i32
    return %arg0, %c0_i32 : i32, i32
  }
}

module attributes {stable_mosaic.version = 11 : i64} {
  func.func @_pool_mlp_kernel(%arg0: i32, %arg1: memref<8x128xbf16, #tpu.memory_space<vmem>>, %arg2: memref<128x128xbf16, #tpu.memory_space<vmem>>, %arg3: memref<128x128xbf16, #tpu.memory_space<vmem>>, %arg4: memref<1x128xf32, #tpu.memory_space<vmem>>, %arg5: memref<128x128xbf16, #tpu.memory_space<vmem>>, %arg6: memref<1x128xf32, #tpu.memory_space<vmem>>, %arg7: memref<8x128xf32, #tpu.memory_space<vmem>>, %arg8: memref<8x128xf32, #tpu.memory_space<vmem>>, %arg9: memref<8x128xf32, #tpu.memory_space<vmem>>) attributes {dimension_semantics = [#tpu.dimension_semantics<arbitrary>], iteration_bounds = array<i64: 1>, scalar_prefetch = 0 : i64, scratch_operands = 1 : i64, tpu.core_type = #tpu.core_type<tc>, window_params = [{transform_indices = @transform_0, window_bounds = array<i64: 8, 128>}, {transform_indices = @transform_1, window_bounds = array<i64: 128, 128>}, {pipeline_mode = #tpu.pipeline_mode<synchronous>, transform_indices = @transform_2, window_bounds = array<i64: 128, 128>}, {pipeline_mode = #tpu.pipeline_mode<synchronous>, transform_indices = @transform_3, window_bounds = array<i64: 1, 128>}, {pipeline_mode = #tpu.pipeline_mode<synchronous>, transform_indices = @transform_4, window_bounds = array<i64: 128, 128>}, {pipeline_mode = #tpu.pipeline_mode<synchronous>, transform_indices = @transform_5, window_bounds = array<i64: 1, 128>}, {pipeline_mode = #tpu.pipeline_mode<synchronous>, transform_indices = @transform_6, window_bounds = array<i64: 8, 128>}, {pipeline_mode = #tpu.pipeline_mode<synchronous>, transform_indices = @transform_7, window_bounds = array<i64: 8, 128>}]} {
    %c0_i32 = arith.constant 0 : i32
    %0 = arith.cmpi eq, %arg0, %c0_i32 : i32
    %1 = arith.extui %0 : i1 to i32
    %c0_i32_0 = arith.constant 0 : i32
    %2 = arith.cmpi ne, %1, %c0_i32_0 : i32
    scf.if %2 {
      %cst_10 = arith.constant 0.000000e+00 : f32
      %12 = vector.broadcast %cst_10 : f32 to vector<8x128xf32>
      %c0_11 = arith.constant 0 : index
      %c0_12 = arith.constant 0 : index
      %13 = vector.load %arg9[%c0_11, %c0_12] : memref<8x128xf32, #tpu.memory_space<vmem>>, vector<8x128xf32>
      tpu.vector_store %arg9[%c0_11, %c0_12], %12 {strides = array<i32>} : memref<8x128xf32, #tpu.memory_space<vmem>>, vector<8x128xf32>,
    } else {
    }
    %c0 = arith.constant 0 : index
    %c0_1 = arith.constant 0 : index
    %3 = vector.load %arg9[%c0, %c0_1] : memref<8x128xf32, #tpu.memory_space<vmem>>, vector<8x128xf32>
    %c0_2 = arith.constant 0 : index
    %c0_3 = arith.constant 0 : index
    %4 = vector.load %arg1[%c0_2, %c0_3] : memref<8x128xbf16, #tpu.memory_space<vmem>>, vector<8x128xbf16>
    %c0_4 = arith.constant 0 : index
    %c0_5 = arith.constant 0 : index
    %5 = vector.load %arg2[%c0_4, %c0_5] : memref<128x128xbf16, #tpu.memory_space<vmem>>, vector<128x128xbf16>
    %cst = arith.constant dense<0.000000e+00> : vector<8x128xf32>
    %6 = tpu.matmul %4, %5, %cst {dimension_numbers = #tpu.dot_dimension_numbers<[1], [0], [0], [1], [0, 0, 1, 1], [], []>} : vector<8x128xbf16>, vector<128x128xbf16>, vector<8x128xf32> -> vector<8x128xf32>
    %7 = arith.addf %3, %6 : vector<8x128xf32>
    %c0_6 = arith.constant 0 : index
    %c0_7 = arith.constant 0 : index
    %8 = vector.load %arg9[%c0_6, %c0_7] : memref<8x128xf32, #tpu.memory_space<vmem>>, vector<8x128xf32>
    tpu.vector_store %arg9[%c0_6, %c0_7], %7 {strides = array<i32>} : memref<8x128xf32, #tpu.memory_space<vmem>>, vector<8x128xf32>,
    %c0_i32_8 = arith.constant 0 : i32
    %9 = arith.cmpi eq, %arg0, %c0_i32_8 : i32
    %10 = arith.extui %9 : i1 to i32
    %c0_i32_9 = arith.constant 0 : i32
    %11 = arith.cmpi ne, %10, %c0_i32_9 : i32
    scf.if %11 {
      %c0_10 = arith.constant 0 : index
      %c0_11 = arith.constant 0 : index
      %12 = vector.load %arg9[%c0_10, %c0_11] : memref<8x128xf32, #tpu.memory_space<vmem>>, vector<8x128xf32>
      %cst_12 = arith.constant 0.000000e+00 : f32
      %13 = vector.broadcast %cst_12 : f32 to vector<8x128xf32>
      %14 = arith.cmpf ogt, %12, %13 : vector<8x128xf32>
      %15 = math.exp %12 : vector<8x128xf32>
      %cst_13 = arith.constant 1.000000e+00 : f32
      %16 = vector.broadcast %cst_13 : f32 to vector<8x128xf32>
      %17 = arith.subf %15, %16 : vector<8x128xf32>
      %cst_14 = arith.constant 1.67326319 : f32
      %18 = vector.broadcast %cst_14 : f32 to vector<8x128xf32>
      %19 = arith.mulf %18, %17 : vector<8x128xf32>
      %20 = arith.select %14, %12, %19 : vector<8x128xi1>, vector<8x128xf32>
      %cst_15 = arith.constant 1.05070102 : f32
      %21 = vector.broadcast %cst_15 : f32 to vector<8x128xf32>
      %22 = arith.mulf %21, %20 : vector<8x128xf32>
      %23 = arith.truncf %22 : vector<8x128xf32> to vector<8x128xbf16>
      %c0_16 = arith.constant 0 : index
      %c0_17 = arith.constant 0 : index
      %24 = vector.load %arg3[%c0_16, %c0_17] : memref<128x128xbf16, #tpu.memory_space<vmem>>, vector<128x128xbf16>
      %cst_18 = arith.constant dense<0.000000e+00> : vector<8x128xf32>
      %25 = tpu.matmul %23, %24, %cst_18 {dimension_numbers = #tpu.dot_dimension_numbers<[1], [0], [0], [1], [0, 0, 1, 1], [], []>} : vector<8x128xbf16>, vector<128x128xbf16>, vector<8x128xf32> -> vector<8x128xf32>
      %c0_19 = arith.constant 0 : index
      %c0_20 = arith.constant 0 : index
      %26 = vector.load %arg4[%c0_19, %c0_20] : memref<1x128xf32, #tpu.memory_space<vmem>>, vector<1x128xf32>
      %27 = vector.broadcast %26 : vector<1x128xf32> to vector<8x128xf32>
      %28 = arith.addf %25, %27 : vector<8x128xf32>
      %cst_21 = arith.constant 0.000000e+00 : f32
      %29 = vector.broadcast %cst_21 : f32 to vector<8x128xf32>
      %30 = arith.cmpf ogt, %28, %29 : vector<8x128xf32>
      %31 = math.exp %28 : vector<8x128xf32>
      %cst_22 = arith.constant 1.000000e+00 : f32
      %32 = vector.broadcast %cst_22 : f32 to vector<8x128xf32>
      %33 = arith.subf %31, %32 : vector<8x128xf32>
      %cst_23 = arith.constant 1.67326319 : f32
      %34 = vector.broadcast %cst_23 : f32 to vector<8x128xf32>
      %35 = arith.mulf %34, %33 : vector<8x128xf32>
      %36 = arith.select %30, %28, %35 : vector<8x128xi1>, vector<8x128xf32>
      %cst_24 = arith.constant 1.05070102 : f32
      %37 = vector.broadcast %cst_24 : f32 to vector<8x128xf32>
      %38 = arith.mulf %37, %36 : vector<8x128xf32>
      %c0_25 = arith.constant 0 : index
      %c0_26 = arith.constant 0 : index
      %39 = vector.load %arg8[%c0_25, %c0_26] : memref<8x128xf32, #tpu.memory_space<vmem>>, vector<8x128xf32>
      tpu.vector_store %arg8[%c0_25, %c0_26], %38 {strides = array<i32>} : memref<8x128xf32, #tpu.memory_space<vmem>>, vector<8x128xf32>,
      %40 = arith.truncf %38 : vector<8x128xf32> to vector<8x128xbf16>
      %c0_27 = arith.constant 0 : index
      %c0_28 = arith.constant 0 : index
      %41 = vector.load %arg5[%c0_27, %c0_28] : memref<128x128xbf16, #tpu.memory_space<vmem>>, vector<128x128xbf16>
      %cst_29 = arith.constant dense<0.000000e+00> : vector<8x128xf32>
      %42 = tpu.matmul %40, %41, %cst_29 {dimension_numbers = #tpu.dot_dimension_numbers<[1], [0], [0], [1], [0, 0, 1, 1], [], []>} : vector<8x128xbf16>, vector<128x128xbf16>, vector<8x128xf32> -> vector<8x128xf32>
      %c0_30 = arith.constant 0 : index
      %c0_31 = arith.constant 0 : index
      %43 = vector.load %arg6[%c0_30, %c0_31] : memref<1x128xf32, #tpu.memory_space<vmem>>, vector<1x128xf32>
      %44 = vector.broadcast %43 : vector<1x128xf32> to vector<8x128xf32>
      %45 = arith.addf %42, %44 : vector<8x128xf32>
      %c0_32 = arith.constant 0 : index
      %c0_33 = arith.constant 0 : index
      %46 = vector.load %arg7[%c0_32, %c0_33] : memref<8x128xf32, #tpu.memory_space<vmem>>, vector<8x128xf32>
      tpu.vector_store %arg7[%c0_32, %c0_33], %45 {strides = array<i32>} : memref<8x128xf32, #tpu.memory_space<vmem>>, vector<8x128xf32>,
    } else {
    }
    return
  }
  func.func @transform_0(%arg0: i32) -> (i32, i32) {
    %c0_i32 = arith.constant 0 : i32
    %c0_i32_0 = arith.constant 0 : i32
    return %c0_i32, %arg0 : i32, i32
  }
  func.func @transform_1(%arg0: i32) -> (i32, i32) {
    %c0_i32 = arith.constant 0 : i32
    %c0_i32_0 = arith.constant 0 : i32
    return %arg0, %c0_i32 : i32, i32
  }
  func.func @transform_2(%arg0: i32) -> (i32, i32) {
    %c0_i32 = arith.constant 0 : i32
    %c0_i32_0 = arith.constant 0 : i32
    %c0_i32_1 = arith.constant 0 : i32
    return %c0_i32, %c0_i32_0 : i32, i32
  }
  func.func @transform_3(%arg0: i32) -> (i32, i32) {
    %c0_i32 = arith.constant 0 : i32
    %c0_i32_0 = arith.constant 0 : i32
    %c0_i32_1 = arith.constant 0 : i32
    return %c0_i32, %c0_i32_0 : i32, i32
  }
  func.func @transform_4(%arg0: i32) -> (i32, i32) {
    %c0_i32 = arith.constant 0 : i32
    %c0_i32_0 = arith.constant 0 : i32
    %c0_i32_1 = arith.constant 0 : i32
    return %c0_i32, %c0_i32_0 : i32, i32
  }
  func.func @transform_5(%arg0: i32) -> (i32, i32) {
    %c0_i32 = arith.constant 0 : i32
    %c0_i32_0 = arith.constant 0 : i32
    %c0_i32_1 = arith.constant 0 : i32
    return %c0_i32, %c0_i32_0 : i32, i32
  }
  func.func @transform_6(%arg0: i32) -> (i32, i32) {
    %c0_i32 = arith.constant 0 : i32
    %c0_i32_0 = arith.constant 0 : i32
    %c0_i32_1 = arith.constant 0 : i32
    return %c0_i32, %c0_i32_0 : i32, i32
  }
  func.func @transform_7(%arg0: i32) -> (i32, i32) {
    %c0_i32 = arith.constant 0 : i32
    %c0_i32_0 = arith.constant 0 : i32
    %c0_i32_1 = arith.constant 0 : i32
    return %c0_i32, %c0_i32_0 : i32, i32
  }
}

</mosaic_0001>

<bundles_post_ra>
// kernel: gat_forward.5
= control target key start
LH: loop header
LB: loop body
LE: loop exit
PB: predicated region body
PF: predicated region fallthrough
CT: control target
= control target key end

     0   :  { %12 = vsyncpa [#allocation3], 0  ;;  %s865_s0 = inlined_call_operand.hbm [shape: bf16[128,128], index: 0, kind: input, shape index: {}]   ;;  %s866_s1 = inlined_call_operand.hbm [shape: bf16[128,128], index: 1, kind: input, shape index: {}]   ;;  %s867_s2 = inlined_call_operand.vmem [shape: f32[1,128], index: 2, kind: input, shape index: {}]   ;;  %s868_s3 = inlined_call_operand.vmem [shape: f32[1,128], index: 3, kind: input, shape index: {}]   ;;  %s869_s4 = inlined_call_operand.vmem [shape: bf16[128,128], index: 4, kind: output, shape index: {0}]   ;;  %s870_s5 = inlined_call_operand.vmem [shape: f32[128,1], index: 5, kind: output, shape index: {1}]   ;;  %s871_s6 = inlined_call_operand.vmem [shape: f32[128,1], index: 6, kind: output, shape index: {2}]  }
   0x1   :  { %s18_s23 = sshll.u32 %s865_s0, 4  ;;  %s19_s23 = int_to_ptr.hbm [resolvable:$true] %s18_s23 }
   0x2   :  { %13 = vsyncpa [#allocation5], 0  ;;  %s621_s24 = smov [#allocation2]   ;;  %s31_s28 = sshll.u32 %s866_s1, 4  ;;  %s32_s28 = int_to_ptr.hbm [resolvable:$true] %s31_s28 }
   0x3   :  { %s20_s25 = sshll.u32 %s621_s24, 4  ;;  %s622_s29 = smov 64   ;;  %s21_s25 = int_to_ptr.vmem [resolvable:$true] %s20_s25 }
   0x4   :  { %s623_s30 = smov 4   ;;  %s624_s7 = smov [#allocation4]  }
   0x5   :  { %26 = dma.hbm_to_vmem [thread:$0]  %s19_s23, 1024, %s21_s25, [#allocation3], %s622_s29, %s622_s29, %s623_s30  }
   0x6   :  { %s33_s8 = sshll.u32 %s624_s7, 4  ;;  %s34_s8 = int_to_ptr.vmem [resolvable:$true] %s33_s8 }
   0x7   :  { %39 = dma.hbm_to_vmem [thread:$0]  %s32_s28, 1024, %s34_s8, [#allocation5], %s622_s29, %s622_s29, %s623_s30  }
   0x8   :  { %617 = dma.done.wait [#allocation3], 1024  }
   0x9   :  { %618 = vsyncadd [#allocation3], 4294966272 }
   0xa   :  { %619 = dma.done.wait [#allocation5], 1024  }
   0xb   :  { %620 = vsyncadd [#allocation5], 4294966272  ;;  %v491_v0 = vld [vmem:[#allocation4 + $0x38] sm:$0xff]  ;;  %v490_v1 = vld [vmem:[#allocation4 + $0x30] sm:$0xff]  ;;  %vm313_vm0 = vcmask 7168  }
   0xc   :  { %180 = vmatpush.bf16.msra.mxu0 %v491_v0  ;;  %539 = vmatpush.bf16.msra.mxu1 %v491_v0  ;;  %v489_v2 = vld [vmem:[#allocation4 + $0x28] sm:$0xff]  ;;  %v488_v3 = vld [vmem:[#allocation4 + $0x20] sm:$0xff]  ;;  %v487_v4 = vld [vmem:[#allocation4 + $0x18] sm:$0xff] }
   0xd   :  { %541 = vmatpush.bf16.msra.mxu3 %v491_v0  ;;  %540 = vmatpush.bf16.msra.mxu2 %v491_v0  ;;  %v486_v5 = vld [vmem:[#allocation4 + $0x10] sm:$0xff]  ;;  %v485_v6 = vld [vmem:[#allocation4 + $0x8] sm:$0xff]  ;;  %v484_v7 = vld [vmem:[#allocation4] sm:$0xff] }
   0xe   :  { %v476_v8 = vld [vmem:[#allocation2] sm:$0xff]  ;;  %v478_v9 = vld [vmem:[#allocation2 + $0x10] sm:$0xff]  ;;  %v477_v12 = vld [vmem:[#allocation2 + $0x8] sm:$0xff] }
   0xf   :  { %v482_v10 = vld [vmem:[#allocation2 + $0x30] sm:$0xff]  ;;  %v480_v11 = vld [vmem:[#allocation2 + $0x20] sm:$0xff]  ;;  %v479_v13 = vld [vmem:[#allocation2 + $0x18] sm:$0xff] }
  0x10   :  { %181 = vmatpush.bf16.msra.mxu0 %v490_v1  ;;  %542 = vmatpush.bf16.msra.mxu1 %v490_v1  ;;  %v481_v14 = vld [vmem:[#allocation2 + $0x28] sm:$0xff]  ;;  %v483_v15 = vld [vmem:[#allocation2 + $0x38] sm:$0xff]  ;;  %v669_v16 = vld [vmem:[%s867_s2] ss:$0 sm:$0xff] }
  0x11   :  { %544 = vmatpush.bf16.msra.mxu3 %v490_v1  ;;  %543 = vmatpush.bf16.msra.mxu2 %v490_v1  ;;  %v674_v17 = vld [vmem:[%s868_s3] ss:$0 sm:$0xff] }
  0x14   :  { %182 = vmatpush.bf16.msra.mxu0 %v489_v2  ;;  %545 = vmatpush.bf16.msra.mxu1 %v489_v2 }
  0x15   :  { %547 = vmatpush.bf16.msra.mxu3 %v489_v2  ;;  %546 = vmatpush.bf16.msra.mxu2 %v489_v2 }
  0x18   :  { %183 = vmatpush.bf16.msra.mxu0 %v488_v3  ;;  %548 = vmatpush.bf16.msra.mxu1 %v488_v3 }
  0x19   :  { %550 = vmatpush.bf16.msra.mxu3 %v488_v3  ;;  %549 = vmatpush.bf16.msra.mxu2 %v488_v3 }
  0x1c   :  { %184 = vmatpush.bf16.msra.mxu0 %v487_v4  ;;  %551 = vmatpush.bf16.msra.mxu1 %v487_v4 }
  0x1d   :  { %553 = vmatpush.bf16.msra.mxu3 %v487_v4  ;;  %552 = vmatpush.bf16.msra.mxu2 %v487_v4 }
  0x20   :  { %185 = vmatpush.bf16.msra.mxu0 %v486_v5  ;;  %554 = vmatpush.bf16.msra.mxu1 %v486_v5 }
  0x21   :  { %556 = vmatpush.bf16.msra.mxu3 %v486_v5  ;;  %555 = vmatpush.bf16.msra.mxu2 %v486_v5 }
  0x24   :  { %186 = vmatpush.bf16.msra.mxu0 %v485_v6  ;;  %557 = vmatpush.bf16.msra.mxu1 %v485_v6 }
  0x25   :  { %559 = vmatpush.bf16.msra.mxu3 %v485_v6  ;;  %558 = vmatpush.bf16.msra.mxu2 %v485_v6 }
  0x28   :  { %187 = vmatpush.bf16.msra.mxu0 %v484_v7  ;;  %560 = vmatpush.bf16.msra.mxu1 %v484_v7 }
  0x29   :  { %562 = vmatpush.bf16.msra.mxu3 %v484_v7  ;;  %561 = vmatpush.bf16.msra.mxu2 %v484_v7 }
  0x2b   :  { %188 = vmatmul.bf16.vlgmr.msra.gmra.mxu0 %v476_v8  ;;  %198 = vmatmul.bf16.vlgmr.msra.gmra.mxu1 %v478_v9 }
  0x2c   :  { %218 = vmatmul.bf16.vlgmr.msra.gmra.mxu3 %v482_v10  ;;  %208 = vmatmul.bf16.vlgmr.msra.gmra.mxu2 %v480_v11 }
  0x3b   :  { %193 = vmatmul.bf16.gmra.mxu0 %v477_v12  ;;  %203 = vmatmul.bf16.gmra.mxu1 %v479_v13 }
  0x3c   :  { %213 = vmatmul.bf16.gmra.mxu2 %v481_v14  ;;  %223 = vmatmul.bf16.gmra.mxu3 %v483_v15 }
  0xa8   :  { %v189_v18 = vpop.f32.mrf.mxu0  ;;  %v199_v19 = vpop.f32.mrf.mxu1 }
  0xa9   :  { %v269_v20 = vmul.f32 %v669_v16, %v199_v19  ;;  %v334_v21 = vmul.f32 %v674_v17, %v189_v18  ;;  %v265_v22 = vmul.f32 %v669_v16, %v189_v18  ;;  %v338_v25 = vmul.f32 %v674_v17, %v199_v19 }
  0xab   :  { %289 = vadd.xlane.f32.xlu2 %v269_v20  ;;  %350 = vadd.xlane.f32.xlu1 %v334_v21 }
  0xac   :  { %281 = vadd.xlane.f32.xlu0 %v265_v22 }
  0xaf   :  { %v219_v23 = vpop.f32.mrf.mxu3  ;;  %v209_v24 = vpop.f32.mrf.mxu2 }
  0xb0   :  { %v191_v26 = vpop.f32.mrf.mxu0  ;;  %v201_v27 = vpop.f32.mrf.mxu1  ;;  %v346_v28 = vmul.f32 %v674_v17, %v219_v23  ;;  %v277_v29 = vmul.f32 %v669_v16, %v219_v23  ;;  %v273_v34 = vmul.f32 %v669_v16, %v209_v24  ;;  %v342_v37 = vmul.f32 %v674_v17, %v209_v24 }
  0xb1   :  { %v495_v30 = vpack.c.bf16 %v191_v26, %v189_v18  ;;  %v505_v31 = vpack.c.bf16 %v201_v27, %v199_v19  ;;  %v270_v45 = vmul.f32 %v669_v16, %v201_v27  ;;  %v266_v49 = vmul.f32 %v669_v16, %v191_v26 }
  0xb2   :  { %v335_v55 = vmul.f32 %v674_v17, %v191_v26  ;;  %v339_v56 = vmul.f32 %v674_v17, %v201_v27 }
  0xb3   :  { %496 = vst [vmem:[%s869_s4] sm:$0xff] %v495_v30   ;;  %358 = vadd.xlane.f32.xlu2 %v338_v25  ;;  %374 = vadd.xlane.f32.xlu1 %v346_v28 }
  0xb4   :  { %533 = vst [vmem:[%s869_s4 + $0x10] sm:$0xff] %v505_v31   ;;  %305 = vadd.xlane.f32.xlu0 %v277_v29 }
  0xb7   :  { %v688_v32 = vpop.f32.mrf.mxu3  ;;  %v211_v33 = vpop.f32.mrf.mxu2 }
  0xb8   :  { %v525_v35 = vpack.c.bf16 %v688_v32, %v219_v23  ;;  %v515_v36 = vpack.c.bf16 %v211_v33, %v209_v24  ;;  %v194_v38 = vpop.f32.mrf.mxu0  ;;  %v204_v39 = vpop.f32.mrf.mxu1  ;;  %v278_v40 = vmul.f32 %v669_v16, %v688_v32  ;;  %v343_v46 = vmul.f32 %v674_v17, %v211_v33 }
  0xb9   :  { %v267_v50 = vmul.f32 %v669_v16, %v194_v38  ;;  %v340_v58 = vmul.f32 %v674_v17, %v204_v39  ;;  %v274_v59 = vmul.f32 %v669_v16, %v211_v33  ;;  %v271_v62 = vmul.f32 %v669_v16, %v204_v39 }
  0xba   :  { %537 = vst [vmem:[%s869_s4 + $0x30] sm:$0xff] %v525_v35   ;;  %v336_v1 = vmul.f32 %v674_v17, %v194_v38  ;;  %v347_v5 = vmul.f32 %v674_v17, %v688_v32 }
  0xbb   :  { %535 = vst [vmem:[%s869_s4 + $0x20] sm:$0xff] %v515_v36   ;;  %297 = vadd.xlane.f32.xlu2 %v273_v34  ;;  %307 = vadd.xlane.f32.xlu1 %v278_v40 }
  0xbc   :  { %366 = vadd.xlane.f32.xlu0 %v342_v37 }
  0xbf   :  { %v214_v41 = vpop.f32.mrf.mxu2  ;;  %v224_v42 = vpop.f32.mrf.mxu3 }
  0xc0   :  { %v196_v43 = vpop.f32.mrf.mxu0  ;;  %v206_v44 = vpop.f32.mrf.mxu1  ;;  %v279_v57 = vmul.f32 %v669_v16, %v224_v42  ;;  %v344_v60 = vmul.f32 %v674_v17, %v214_v41  ;;  %v275_v61 = vmul.f32 %v669_v16, %v214_v41  ;;  %v348_v9 = vmul.f32 %v674_v17, %v224_v42 }
  0xc1   :  { %v500_v47 = vpack.c.bf16 %v196_v43, %v194_v38  ;;  %v510_v48 = vpack.c.bf16 %v206_v44, %v204_v39  ;;  %v341_v63 = vmul.f32 %v674_v17, %v206_v44  ;;  %v268_v0 = vmul.f32 %v669_v16, %v196_v43 }
  0xc2   :  { %v272_v3 = vmul.f32 %v669_v16, %v206_v44  ;;  %v337_v6 = vmul.f32 %v674_v17, %v196_v43 }
  0xc3   :  { %291 = vadd.xlane.f32.xlu2 %v270_v45  ;;  %368 = vadd.xlane.f32.xlu1 %v343_v46  ;;  %532 = vst [vmem:[%s869_s4 + $0x8] sm:$0xff] %v500_v47  }
  0xc4   :  { %283 = vadd.xlane.f32.xlu0 %v266_v49  ;;  %534 = vst [vmem:[%s869_s4 + $0x18] sm:$0xff] %v510_v48  }
  0xc7   :  { %v216_v51 = vpop.f32.mrf.mxu2  ;;  %v226_v52 = vpop.f32.mrf.mxu3 }
  0xc8   :  { %v520_v53 = vpack.c.bf16 %v216_v51, %v214_v41  ;;  %v530_v54 = vpack.c.bf16 %v226_v52, %v224_v42  ;;  %v276_v2 = vmul.f32 %v669_v16, %v216_v51  ;;  %v280_v4 = vmul.f32 %v669_v16, %v226_v52 }
  0xc9   :  { %v345_v7 = vmul.f32 %v674_v17, %v216_v51  ;;  %v349_v8 = vmul.f32 %v674_v17, %v226_v52 }
  0xca   :  { %536 = vst [vmem:[%s869_s4 + $0x28] sm:$0xff] %v520_v53  }
  0xcb   :  { %352 = vadd.xlane.f32.xlu2 %v335_v55  ;;  %285 = vadd.xlane.f32.xlu1 %v267_v50  ;;  %538 = vst [vmem:[%s869_s4 + $0x38] sm:$0xff] %v530_v54  }
  0xcc   :  { %360 = vadd.xlane.f32.xlu0 %v339_v56 }
  0xd3   :  { %309 = vadd.xlane.f32.xlu2 %v279_v57  ;;  %362 = vadd.xlane.f32.xlu1 %v340_v58 }
  0xd4   :  { %299 = vadd.xlane.f32.xlu0 %v274_v59 }
  0xdb   :  { %370 = vadd.xlane.f32.xlu2 %v344_v60  ;;  %301 = vadd.xlane.f32.xlu1 %v275_v61 }
  0xdc   :  { %293 = vadd.xlane.f32.xlu0 %v271_v62 }
  0xe3   :  { %364 = vadd.xlane.f32.xlu2 %v341_v63  ;;  %287 = vadd.xlane.f32.xlu1 %v268_v0 }
  0xe4   :  { %354 = vadd.xlane.f32.xlu0 %v336_v1 }
  0xeb   :  { %303 = vadd.xlane.f32.xlu2 %v276_v2  ;;  %295 = vadd.xlane.f32.xlu1 %v272_v3 }
  0xec   :  { %311 = vadd.xlane.f32.xlu0 %v280_v4 }
  0xf3   :  { %376 = vadd.xlane.f32.xlu2 %v347_v5  ;;  %356 = vadd.xlane.f32.xlu1 %v337_v6 }
  0xf4   :  { %372 = vadd.xlane.f32.xlu0 %v345_v7 }
  0xfb   :  { %380 = vadd.xlane.f32.xlu1 %v349_v8 }
  0xfc   :  { %378 = vadd.xlane.f32.xlu0 %v348_v9 }
 0x11e   :  { %v290_v10 = vpop.xlane.xlu2 %289  ;;  %v351_v11 = vpop.xlane.xlu1 %350 }
 0x11f   :  { %318 = vst.msk [vmem:[%s870_s5 + $0x20] sm:$0xff] %vm313_vm0, %v290_v10  ;;  %v282_v12 = vpop.xlane.xlu0 %281 }
 0x120   :  { %382 = vst.msk [vmem:[%s871_s6] sm:$0xff] %vm313_vm0, %v351_v11 }
 0x121   :  { %314 = vst.msk [vmem:[%s870_s5] sm:$0xff] %vm313_vm0, %v282_v12 }
 0x126   :  { %v359_v13 = vpop.xlane.xlu2 %358  ;;  %v375_v14 = vpop.xlane.xlu1 %374 }
 0x127   :  { %386 = vst.msk [vmem:[%s871_s6 + $0x20] sm:$0xff] %vm313_vm0, %v359_v13  ;;  %v306_v15 = vpop.xlane.xlu0 %305 }
 0x128   :  { %394 = vst.msk [vmem:[%s871_s6 + $0x60] sm:$0xff] %vm313_vm0, %v375_v14 }
 0x129   :  { %326 = vst.msk [vmem:[%s870_s5 + $0x60] sm:$0xff] %vm313_vm0, %v306_v15 }
 0x12e   :  { %v298_v16 = vpop.xlane.xlu2 %297  ;;  %v308_v17 = vpop.xlane.xlu1 %307 }
 0x12f   :  { %322 = vst.msk [vmem:[%s870_s5 + $0x40] sm:$0xff] %vm313_vm0, %v298_v16  ;;  %v367_v18 = vpop.xlane.xlu0 %366 }
 0x130   :  { %327 = vst.msk [vmem:[%s870_s5 + $0x68] sm:$0xff] %vm313_vm0, %v308_v17 }
 0x131   :  { %390 = vst.msk [vmem:[%s871_s6 + $0x40] sm:$0xff] %vm313_vm0, %v367_v18 }
 0x136   :  { %v292_v19 = vpop.xlane.xlu2 %291  ;;  %v369_v20 = vpop.xlane.xlu1 %368 }
 0x137   :  { %319 = vst.msk [vmem:[%s870_s5 + $0x28] sm:$0xff] %vm313_vm0, %v292_v19  ;;  %v284_v21 = vpop.xlane.xlu0 %283 }
 0x138   :  { %391 = vst.msk [vmem:[%s871_s6 + $0x48] sm:$0xff] %vm313_vm0, %v369_v20 }
 0x139   :  { %315 = vst.msk [vmem:[%s870_s5 + $0x8] sm:$0xff] %vm313_vm0, %v284_v21 }
 0x13e   :  { %v353_v22 = vpop.xlane.xlu2 %352  ;;  %v286_v23 = vpop.xlane.xlu1 %285 }
 0x13f   :  { %383 = vst.msk [vmem:[%s871_s6 + $0x8] sm:$0xff] %vm313_vm0, %v353_v22  ;;  %v361_v24 = vpop.xlane.xlu0 %360 }
 0x140   :  { %387 = vst.msk [vmem:[%s871_s6 + $0x28] sm:$0xff] %vm313_vm0, %v361_v24 }
 0x141   :  { %316 = vst.msk [vmem:[%s870_s5 + $0x10] sm:$0xff] %vm313_vm0, %v286_v23 }
 0x146   :  { %v310_v25 = vpop.xlane.xlu2 %309  ;;  %v363_v26 = vpop.xlane.xlu1 %362 }
 0x147   :  { %328 = vst.msk [vmem:[%s870_s5 + $0x70] sm:$0xff] %vm313_vm0, %v310_v25  ;;  %v300_v27 = vpop.xlane.xlu0 %299 }
 0x148   :  { %323 = vst.msk [vmem:[%s870_s5 + $0x48] sm:$0xff] %vm313_vm0, %v300_v27 }
 0x149   :  { %388 = vst.msk [vmem:[%s871_s6 + $0x30] sm:$0xff] %vm313_vm0, %v363_v26 }
 0x14e   :  { %v371_v28 = vpop.xlane.xlu2 %370  ;;  %v302_v29 = vpop.xlane.xlu1 %301 }
 0x14f   :  { %392 = vst.msk [vmem:[%s871_s6 + $0x50] sm:$0xff] %vm313_vm0, %v371_v28  ;;  %v294_v30 = vpop.xlane.xlu0 %293 }
 0x150   :  { %320 = vst.msk [vmem:[%s870_s5 + $0x30] sm:$0xff] %vm313_vm0, %v294_v30 }
 0x151   :  { %324 = vst.msk [vmem:[%s870_s5 + $0x50] sm:$0xff] %vm313_vm0, %v302_v29 }
 0x156   :  { %v365_v31 = vpop.xlane.xlu2 %364  ;;  %v288_v32 = vpop.xlane.xlu1 %287 }
 0x157   :  { %389 = vst.msk [vmem:[%s871_s6 + $0x38] sm:$0xff] %vm313_vm0, %v365_v31  ;;  %v355_v33 = vpop.xlane.xlu0 %354 }
 0x158   :  { %384 = vst.msk [vmem:[%s871_s6 + $0x10] sm:$0xff] %vm313_vm0, %v355_v33 }
 0x159   :  { %317 = vst.msk [vmem:[%s870_s5 + $0x18] sm:$0xff] %vm313_vm0, %v288_v32 }
 0x15e   :  { %v304_v34 = vpop.xlane.xlu2 %303  ;;  %v296_v35 = vpop.xlane.xlu1 %295 }
 0x15f   :  { %325 = vst.msk [vmem:[%s870_s5 + $0x58] sm:$0xff] %vm313_vm0, %v304_v34  ;;  %v312_v36 = vpop.xlane.xlu0 %311 }
 0x160   :  { %329 = vst.msk [vmem:[%s870_s5 + $0x78] sm:$0xff] %vm313_vm0, %v312_v36 }
 0x161   :  { %321 = vst.msk [vmem:[%s870_s5 + $0x38] sm:$0xff] %vm313_vm0, %v296_v35 }
 0x166   :  { %v377_v37 = vpop.xlane.xlu2 %376  ;;  %v357_v38 = vpop.xlane.xlu1 %356 }
 0x167   :  { %395 = vst.msk [vmem:[%s871_s6 + $0x68] sm:$0xff] %vm313_vm0, %v377_v37  ;;  %v373_v39 = vpop.xlane.xlu0 %372 }
 0x168   :  { %393 = vst.msk [vmem:[%s871_s6 + $0x58] sm:$0xff] %vm313_vm0, %v373_v39 }
 0x169   :  { %385 = vst.msk [vmem:[%s871_s6 + $0x18] sm:$0xff] %vm313_vm0, %v357_v38 }
 0x16e   :  { %v381_v40 = vpop.xlane.xlu1 %380 }
 0x16f   :  { %v379_v41 = vpop.xlane.xlu0 %378  ;;  %397 = vst.msk [vmem:[%s871_s6 + $0x78] sm:$0xff] %vm313_vm0, %v381_v40 }
 0x170   :  { %396 = vst.msk [vmem:[%s871_s6 + $0x70] sm:$0xff] %vm313_vm0, %v379_v41 }
 0x171   :  { %410 = vsyncpa [#allocation3], 1 }
 0x172   :  { %411 = vsyncpa [#allocation5], 1 }

// kernel: gat_forward.7
= control target key start
LH: loop header
LB: loop body
LE: loop exit
PB: predicated region body
PF: predicated region fallthrough
CT: control target
= control target key end

     0   :  { %vm281_vm0 = vcmask 7168   ;;  %s813_s1 = inlined_call_operand.vmem [shape: bf16[128,128], index: 1, kind: input, shape index: {}]   ;;  %s814_s0 = inlined_call_operand.vmem [shape: bf16[128,128], index: 0, kind: input, shape index: {}]   ;;  %s815_s2 = inlined_call_operand.vmem [shape: f32[1,128], index: 2, kind: input, shape index: {}]   ;;  %s816_s3 = inlined_call_operand.vmem [shape: f32[1,128], index: 3, kind: input, shape index: {}]   ;;  %s817_s4 = inlined_call_operand.vmem [shape: bf16[128,128], index: 4, kind: output, shape index: {0}]   ;;  %s818_s6 = inlined_call_operand.vmem [shape: f32[128,1], index: 6, kind: output, shape index: {2}]   ;;  %s819_s5 = inlined_call_operand.vmem [shape: f32[128,1], index: 5, kind: output, shape index: {1}]  }
   0x1   :  { %v457_v0 = vld [vmem:[%s813_s1 + $0x38] sm:$0xff]  ;;  %v456_v1 = vld [vmem:[%s813_s1 + $0x30] sm:$0xff]  ;;  %v455_v2 = vld [vmem:[%s813_s1 + $0x28] sm:$0xff] }
   0x2   :  { %148 = vmatpush.bf16.msra.mxu0 %v457_v0  ;;  %505 = vmatpush.bf16.msra.mxu1 %v457_v0  ;;  %v454_v3 = vld [vmem:[%s813_s1 + $0x20] sm:$0xff]  ;;  %v453_v4 = vld [vmem:[%s813_s1 + $0x18] sm:$0xff]  ;;  %v452_v5 = vld [vmem:[%s813_s1 + $0x10] sm:$0xff] }
   0x3   :  { %507 = vmatpush.bf16.msra.mxu3 %v457_v0  ;;  %506 = vmatpush.bf16.msra.mxu2 %v457_v0  ;;  %v451_v6 = vld [vmem:[%s813_s1 + $0x8] sm:$0xff]  ;;  %v450_v7 = vld [vmem:[%s813_s1] sm:$0xff]  ;;  %v444_v9 = vld [vmem:[%s814_s0 + $0x10] sm:$0xff] }
   0x4   :  { %v442_v8 = vld [vmem:[%s814_s0] sm:$0xff]  ;;  %v448_v10 = vld [vmem:[%s814_s0 + $0x30] sm:$0xff]  ;;  %v443_v12 = vld [vmem:[%s814_s0 + $0x8] sm:$0xff] }
   0x5   :  { %v446_v11 = vld [vmem:[%s814_s0 + $0x20] sm:$0xff]  ;;  %v445_v13 = vld [vmem:[%s814_s0 + $0x18] sm:$0xff]  ;;  %v447_v14 = vld [vmem:[%s814_s0 + $0x28] sm:$0xff] }
   0x6   :  { %149 = vmatpush.bf16.msra.mxu0 %v456_v1  ;;  %508 = vmatpush.bf16.msra.mxu1 %v456_v1  ;;  %v449_v15 = vld [vmem:[%s814_s0 + $0x38] sm:$0xff]  ;;  %v617_v16 = vld [vmem:[%s815_s2] ss:$0 sm:$0xff] }
   0x7   :  { %510 = vmatpush.bf16.msra.mxu3 %v456_v1  ;;  %509 = vmatpush.bf16.msra.mxu2 %v456_v1  ;;  %v622_v17 = vld [vmem:[%s816_s3] ss:$0 sm:$0xff] }
   0xa   :  { %150 = vmatpush.bf16.msra.mxu0 %v455_v2  ;;  %511 = vmatpush.bf16.msra.mxu1 %v455_v2 }
   0xb   :  { %513 = vmatpush.bf16.msra.mxu3 %v455_v2  ;;  %512 = vmatpush.bf16.msra.mxu2 %v455_v2 }
   0xe   :  { %151 = vmatpush.bf16.msra.mxu0 %v454_v3  ;;  %514 = vmatpush.bf16.msra.mxu1 %v454_v3 }
   0xf   :  { %516 = vmatpush.bf16.msra.mxu3 %v454_v3  ;;  %515 = vmatpush.bf16.msra.mxu2 %v454_v3 }
  0x12   :  { %152 = vmatpush.bf16.msra.mxu0 %v453_v4  ;;  %517 = vmatpush.bf16.msra.mxu1 %v453_v4 }
  0x13   :  { %519 = vmatpush.bf16.msra.mxu3 %v453_v4  ;;  %518 = vmatpush.bf16.msra.mxu2 %v453_v4 }
  0x16   :  { %153 = vmatpush.bf16.msra.mxu0 %v452_v5  ;;  %520 = vmatpush.bf16.msra.mxu1 %v452_v5 }
  0x17   :  { %522 = vmatpush.bf16.msra.mxu3 %v452_v5  ;;  %521 = vmatpush.bf16.msra.mxu2 %v452_v5 }
  0x1a   :  { %154 = vmatpush.bf16.msra.mxu0 %v451_v6  ;;  %523 = vmatpush.bf16.msra.mxu1 %v451_v6 }
  0x1b   :  { %525 = vmatpush.bf16.msra.mxu3 %v451_v6  ;;  %524 = vmatpush.bf16.msra.mxu2 %v451_v6 }
  0x1e   :  { %155 = vmatpush.bf16.msra.mxu0 %v450_v7  ;;  %526 = vmatpush.bf16.msra.mxu1 %v450_v7 }
  0x1f   :  { %528 = vmatpush.bf16.msra.mxu3 %v450_v7  ;;  %527 = vmatpush.bf16.msra.mxu2 %v450_v7 }
  0x21   :  { %156 = vmatmul.bf16.vlgmr.msra.gmra.mxu0 %v442_v8  ;;  %166 = vmatmul.bf16.vlgmr.msra.gmra.mxu1 %v444_v9 }
  0x22   :  { %186 = vmatmul.bf16.vlgmr.msra.gmra.mxu3 %v448_v10  ;;  %176 = vmatmul.bf16.vlgmr.msra.gmra.mxu2 %v446_v11 }
  0x31   :  { %161 = vmatmul.bf16.gmra.mxu0 %v443_v12  ;;  %171 = vmatmul.bf16.gmra.mxu1 %v445_v13 }
  0x32   :  { %181 = vmatmul.bf16.gmra.mxu2 %v447_v14  ;;  %191 = vmatmul.bf16.gmra.mxu3 %v449_v15 }
  0x9e   :  { %v157_v18 = vpop.f32.mrf.mxu0  ;;  %v167_v19 = vpop.f32.mrf.mxu1 }
  0x9f   :  { %v237_v20 = vmul.f32 %v617_v16, %v167_v19  ;;  %v302_v21 = vmul.f32 %v622_v17, %v157_v18  ;;  %v233_v22 = vmul.f32 %v617_v16, %v157_v18  ;;  %v306_v25 = vmul.f32 %v622_v17, %v167_v19 }
  0xa1   :  { %257 = vadd.xlane.f32.xlu2 %v237_v20  ;;  %318 = vadd.xlane.f32.xlu1 %v302_v21 }
  0xa2   :  { %249 = vadd.xlane.f32.xlu0 %v233_v22 }
  0xa5   :  { %v187_v23 = vpop.f32.mrf.mxu3  ;;  %v177_v24 = vpop.f32.mrf.mxu2 }
  0xa6   :  { %v159_v26 = vpop.f32.mrf.mxu0  ;;  %v169_v27 = vpop.f32.mrf.mxu1  ;;  %v314_v28 = vmul.f32 %v622_v17, %v187_v23  ;;  %v245_v29 = vmul.f32 %v617_v16, %v187_v23  ;;  %v241_v34 = vmul.f32 %v617_v16, %v177_v24  ;;  %v310_v37 = vmul.f32 %v622_v17, %v177_v24 }
  0xa7   :  { %v461_v30 = vpack.c.bf16 %v159_v26, %v157_v18  ;;  %v471_v31 = vpack.c.bf16 %v169_v27, %v167_v19  ;;  %v238_v45 = vmul.f32 %v617_v16, %v169_v27  ;;  %v234_v49 = vmul.f32 %v617_v16, %v159_v26 }
  0xa8   :  { %v303_v55 = vmul.f32 %v622_v17, %v159_v26  ;;  %v307_v56 = vmul.f32 %v622_v17, %v169_v27 }
  0xa9   :  { %462 = vst [vmem:[%s817_s4] sm:$0xff] %v461_v30   ;;  %326 = vadd.xlane.f32.xlu2 %v306_v25  ;;  %342 = vadd.xlane.f32.xlu1 %v314_v28 }
  0xaa   :  { %499 = vst [vmem:[%s817_s4 + $0x10] sm:$0xff] %v471_v31   ;;  %273 = vadd.xlane.f32.xlu0 %v245_v29 }
  0xad   :  { %v636_v32 = vpop.f32.mrf.mxu3  ;;  %v179_v33 = vpop.f32.mrf.mxu2 }
  0xae   :  { %v491_v35 = vpack.c.bf16 %v636_v32, %v187_v23  ;;  %v481_v36 = vpack.c.bf16 %v179_v33, %v177_v24  ;;  %v162_v38 = vpop.f32.mrf.mxu0  ;;  %v172_v39 = vpop.f32.mrf.mxu1  ;;  %v246_v40 = vmul.f32 %v617_v16, %v636_v32  ;;  %v311_v46 = vmul.f32 %v622_v17, %v179_v33 }
  0xaf   :  { %v235_v50 = vmul.f32 %v617_v16, %v162_v38  ;;  %v308_v58 = vmul.f32 %v622_v17, %v172_v39  ;;  %v242_v59 = vmul.f32 %v617_v16, %v179_v33  ;;  %v239_v62 = vmul.f32 %v617_v16, %v172_v39 }
  0xb0   :  { %503 = vst [vmem:[%s817_s4 + $0x30] sm:$0xff] %v491_v35   ;;  %v304_v1 = vmul.f32 %v622_v17, %v162_v38  ;;  %v315_v5 = vmul.f32 %v622_v17, %v636_v32 }
  0xb1   :  { %501 = vst [vmem:[%s817_s4 + $0x20] sm:$0xff] %v481_v36   ;;  %265 = vadd.xlane.f32.xlu2 %v241_v34  ;;  %275 = vadd.xlane.f32.xlu1 %v246_v40 }
  0xb2   :  { %334 = vadd.xlane.f32.xlu0 %v310_v37 }
  0xb5   :  { %v182_v41 = vpop.f32.mrf.mxu2  ;;  %v192_v42 = vpop.f32.mrf.mxu3 }
  0xb6   :  { %v164_v43 = vpop.f32.mrf.mxu0  ;;  %v174_v44 = vpop.f32.mrf.mxu1  ;;  %v247_v57 = vmul.f32 %v617_v16, %v192_v42  ;;  %v312_v60 = vmul.f32 %v622_v17, %v182_v41  ;;  %v243_v61 = vmul.f32 %v617_v16, %v182_v41  ;;  %v316_v9 = vmul.f32 %v622_v17, %v192_v42 }
  0xb7   :  { %v466_v47 = vpack.c.bf16 %v164_v43, %v162_v38  ;;  %v476_v48 = vpack.c.bf16 %v174_v44, %v172_v39  ;;  %v309_v63 = vmul.f32 %v622_v17, %v174_v44  ;;  %v236_v0 = vmul.f32 %v617_v16, %v164_v43 }
  0xb8   :  { %v240_v3 = vmul.f32 %v617_v16, %v174_v44  ;;  %v305_v6 = vmul.f32 %v622_v17, %v164_v43 }
  0xb9   :  { %259 = vadd.xlane.f32.xlu2 %v238_v45  ;;  %336 = vadd.xlane.f32.xlu1 %v311_v46  ;;  %498 = vst [vmem:[%s817_s4 + $0x8] sm:$0xff] %v466_v47  }
  0xba   :  { %251 = vadd.xlane.f32.xlu0 %v234_v49  ;;  %500 = vst [vmem:[%s817_s4 + $0x18] sm:$0xff] %v476_v48  }
  0xbd   :  { %v184_v51 = vpop.f32.mrf.mxu2  ;;  %v194_v52 = vpop.f32.mrf.mxu3 }
  0xbe   :  { %v486_v53 = vpack.c.bf16 %v184_v51, %v182_v41  ;;  %v496_v54 = vpack.c.bf16 %v194_v52, %v192_v42  ;;  %v244_v2 = vmul.f32 %v617_v16, %v184_v51  ;;  %v248_v4 = vmul.f32 %v617_v16, %v194_v52 }
  0xbf   :  { %v313_v7 = vmul.f32 %v622_v17, %v184_v51  ;;  %v317_v8 = vmul.f32 %v622_v17, %v194_v52 }
  0xc0   :  { %502 = vst [vmem:[%s817_s4 + $0x28] sm:$0xff] %v486_v53  }
  0xc1   :  { %320 = vadd.xlane.f32.xlu2 %v303_v55  ;;  %253 = vadd.xlane.f32.xlu1 %v235_v50  ;;  %504 = vst [vmem:[%s817_s4 + $0x38] sm:$0xff] %v496_v54  }
  0xc2   :  { %328 = vadd.xlane.f32.xlu0 %v307_v56 }
  0xc9   :  { %277 = vadd.xlane.f32.xlu2 %v247_v57  ;;  %330 = vadd.xlane.f32.xlu1 %v308_v58 }
  0xca   :  { %267 = vadd.xlane.f32.xlu0 %v242_v59 }
  0xd1   :  { %338 = vadd.xlane.f32.xlu2 %v312_v60  ;;  %269 = vadd.xlane.f32.xlu1 %v243_v61 }
  0xd2   :  { %261 = vadd.xlane.f32.xlu0 %v239_v62 }
  0xd9   :  { %332 = vadd.xlane.f32.xlu2 %v309_v63  ;;  %255 = vadd.xlane.f32.xlu1 %v236_v0 }
  0xda   :  { %322 = vadd.xlane.f32.xlu0 %v304_v1 }
  0xe1   :  { %271 = vadd.xlane.f32.xlu2 %v244_v2  ;;  %263 = vadd.xlane.f32.xlu1 %v240_v3 }
  0xe2   :  { %279 = vadd.xlane.f32.xlu0 %v248_v4 }
  0xe9   :  { %344 = vadd.xlane.f32.xlu2 %v315_v5  ;;  %324 = vadd.xlane.f32.xlu1 %v305_v6 }
  0xea   :  { %340 = vadd.xlane.f32.xlu0 %v313_v7 }
  0xf1   :  { %348 = vadd.xlane.f32.xlu1 %v317_v8 }
  0xf2   :  { %346 = vadd.xlane.f32.xlu0 %v316_v9 }
 0x114   :  { %v258_v10 = vpop.xlane.xlu2 %257  ;;  %v319_v11 = vpop.xlane.xlu1 %318 }
 0x115   :  { %286 = vst.msk [vmem:[%s819_s5 + $0x20] sm:$0xff] %vm281_vm0, %v258_v10  ;;  %v250_v12 = vpop.xlane.xlu0 %249 }
 0x116   :  { %350 = vst.msk [vmem:[%s818_s6] sm:$0xff] %vm281_vm0, %v319_v11 }
 0x117   :  { %282 = vst.msk [vmem:[%s819_s5] sm:$0xff] %vm281_vm0, %v250_v12 }
 0x11c   :  { %v327_v13 = vpop.xlane.xlu2 %326  ;;  %v343_v14 = vpop.xlane.xlu1 %342 }
 0x11d   :  { %354 = vst.msk [vmem:[%s818_s6 + $0x20] sm:$0xff] %vm281_vm0, %v327_v13  ;;  %v274_v15 = vpop.xlane.xlu0 %273 }
 0x11e   :  { %362 = vst.msk [vmem:[%s818_s6 + $0x60] sm:$0xff] %vm281_vm0, %v343_v14 }
 0x11f   :  { %294 = vst.msk [vmem:[%s819_s5 + $0x60] sm:$0xff] %vm281_vm0, %v274_v15 }
 0x124   :  { %v266_v16 = vpop.xlane.xlu2 %265  ;;  %v276_v17 = vpop.xlane.xlu1 %275 }
 0x125   :  { %290 = vst.msk [vmem:[%s819_s5 + $0x40] sm:$0xff] %vm281_vm0, %v266_v16  ;;  %v335_v18 = vpop.xlane.xlu0 %334 }
 0x126   :  { %295 = vst.msk [vmem:[%s819_s5 + $0x68] sm:$0xff] %vm281_vm0, %v276_v17 }
 0x127   :  { %358 = vst.msk [vmem:[%s818_s6 + $0x40] sm:$0xff] %vm281_vm0, %v335_v18 }
 0x12c   :  { %v260_v19 = vpop.xlane.xlu2 %259  ;;  %v337_v20 = vpop.xlane.xlu1 %336 }
 0x12d   :  { %287 = vst.msk [vmem:[%s819_s5 + $0x28] sm:$0xff] %vm281_vm0, %v260_v19  ;;  %v252_v21 = vpop.xlane.xlu0 %251 }
 0x12e   :  { %359 = vst.msk [vmem:[%s818_s6 + $0x48] sm:$0xff] %vm281_vm0, %v337_v20 }
 0x12f   :  { %283 = vst.msk [vmem:[%s819_s5 + $0x8] sm:$0xff] %vm281_vm0, %v252_v21 }
 0x134   :  { %v321_v22 = vpop.xlane.xlu2 %320  ;;  %v254_v23 = vpop.xlane.xlu1 %253 }
 0x135   :  { %351 = vst.msk [vmem:[%s818_s6 + $0x8] sm:$0xff] %vm281_vm0, %v321_v22  ;;  %v329_v24 = vpop.xlane.xlu0 %328 }
 0x136   :  { %355 = vst.msk [vmem:[%s818_s6 + $0x28] sm:$0xff] %vm281_vm0, %v329_v24 }
 0x137   :  { %284 = vst.msk [vmem:[%s819_s5 + $0x10] sm:$0xff] %vm281_vm0, %v254_v23 }
 0x13c   :  { %v278_v25 = vpop.xlane.xlu2 %277  ;;  %v331_v26 = vpop.xlane.xlu1 %330 }
 0x13d   :  { %296 = vst.msk [vmem:[%s819_s5 + $0x70] sm:$0xff] %vm281_vm0, %v278_v25  ;;  %v268_v27 = vpop.xlane.xlu0 %267 }
 0x13e   :  { %291 = vst.msk [vmem:[%s819_s5 + $0x48] sm:$0xff] %vm281_vm0, %v268_v27 }
 0x13f   :  { %356 = vst.msk [vmem:[%s818_s6 + $0x30] sm:$0xff] %vm281_vm0, %v331_v26 }
 0x144   :  { %v339_v28 = vpop.xlane.xlu2 %338  ;;  %v270_v29 = vpop.xlane.xlu1 %269 }
 0x145   :  { %360 = vst.msk [vmem:[%s818_s6 + $0x50] sm:$0xff] %vm281_vm0, %v339_v28  ;;  %v262_v30 = vpop.xlane.xlu0 %261 }
 0x146   :  { %288 = vst.msk [vmem:[%s819_s5 + $0x30] sm:$0xff] %vm281_vm0, %v262_v30 }
 0x147   :  { %292 = vst.msk [vmem:[%s819_s5 + $0x50] sm:$0xff] %vm281_vm0, %v270_v29 }
 0x14c   :  { %v333_v31 = vpop.xlane.xlu2 %332  ;;  %v256_v32 = vpop.xlane.xlu1 %255 }
 0x14d   :  { %357 = vst.msk [vmem:[%s818_s6 + $0x38] sm:$0xff] %vm281_vm0, %v333_v31  ;;  %v323_v33 = vpop.xlane.xlu0 %322 }
 0x14e   :  { %352 = vst.msk [vmem:[%s818_s6 + $0x10] sm:$0xff] %vm281_vm0, %v323_v33 }
 0x14f   :  { %285 = vst.msk [vmem:[%s819_s5 + $0x18] sm:$0xff] %vm281_vm0, %v256_v32 }
 0x154   :  { %v272_v34 = vpop.xlane.xlu2 %271  ;;  %v264_v35 = vpop.xlane.xlu1 %263 }
 0x155   :  { %293 = vst.msk [vmem:[%s819_s5 + $0x58] sm:$0xff] %vm281_vm0, %v272_v34  ;;  %v280_v36 = vpop.xlane.xlu0 %279 }
 0x156   :  { %297 = vst.msk [vmem:[%s819_s5 + $0x78] sm:$0xff] %vm281_vm0, %v280_v36 }
 0x157   :  { %289 = vst.msk [vmem:[%s819_s5 + $0x38] sm:$0xff] %vm281_vm0, %v264_v35 }
 0x15c   :  { %v345_v37 = vpop.xlane.xlu2 %344  ;;  %v325_v38 = vpop.xlane.xlu1 %324 }
 0x15d   :  { %363 = vst.msk [vmem:[%s818_s6 + $0x68] sm:$0xff] %vm281_vm0, %v345_v37  ;;  %v341_v39 = vpop.xlane.xlu0 %340 }
 0x15e   :  { %361 = vst.msk [vmem:[%s818_s6 + $0x58] sm:$0xff] %vm281_vm0, %v341_v39 }
 0x15f   :  { %353 = vst.msk [vmem:[%s818_s6 + $0x18] sm:$0xff] %vm281_vm0, %v325_v38 }
 0x164   :  { %v349_v40 = vpop.xlane.xlu1 %348 }
 0x165   :  { %v347_v41 = vpop.xlane.xlu0 %346  ;;  %365 = vst.msk [vmem:[%s818_s6 + $0x78] sm:$0xff] %vm281_vm0, %v349_v40 }
 0x166   :  { %364 = vst.msk [vmem:[%s818_s6 + $0x70] sm:$0xff] %vm281_vm0, %v347_v41 }

// kernel: gat_forward.9
= control target key start
LH: loop header
LB: loop body
LE: loop exit
PB: predicated region body
PF: predicated region fallthrough
CT: control target
= control target key end

     0   :  { %s558_s1 = inlined_call_operand.vmem [shape: bf16[128,128], index: 1, kind: input, shape index: {}]   ;;  %s559_s2 = inlined_call_operand.vmem [shape: bf16[128,128], index: 2, kind: input, shape index: {}]   ;;  %s560_s0 = inlined_call_operand.vmem [shape: bf16[8,128], index: 0, kind: input, shape index: {}]   ;;  %s561_s3 = inlined_call_operand.vmem [shape: f32[1,128], index: 3, kind: input, shape index: {}]   ;;  %s562_s4 = inlined_call_operand.vmem [shape: bf16[128,128], index: 4, kind: input, shape index: {}]   ;;  %s563_s5 = inlined_call_operand.vmem [shape: f32[1,128], index: 5, kind: input, shape index: {}]   ;;  %s564_s7 = inlined_call_operand.vmem [shape: f32[8,128], index: 7, kind: output, shape index: {1}]   ;;  %s565_s6 = inlined_call_operand.vmem [shape: f32[8,128], index: 6, kind: output, shape index: {0}]  }
   0x1   :  { %v408_v0 = vld [vmem:[%s558_s1 + $0x38] sm:$0xff]  ;;  %v407_v1 = vld [vmem:[%s558_s1 + $0x30] sm:$0xff]  ;;  %v406_v4 = vld [vmem:[%s558_s1 + $0x28] sm:$0xff] }
   0x2   :  { %96 = vmatpush.bf16.msra.mxu0 %v408_v0  ;;  %v416_v2 = vld [vmem:[%s559_s2 + $0x38] sm:$0xff]  ;;  %v415_v3 = vld [vmem:[%s559_s2 + $0x30] sm:$0xff]  ;;  %v414_v5 = vld [vmem:[%s559_s2 + $0x28] sm:$0xff] }
   0x3   :  { %191 = vmatpush.bf16.msra.mxu1 %v416_v2  ;;  %v405_v6 = vld [vmem:[%s558_s1 + $0x20] sm:$0xff]  ;;  %v404_v7 = vld [vmem:[%s558_s1 + $0x18] sm:$0xff]  ;;  %v403_v8 = vld [vmem:[%s558_s1 + $0x10] sm:$0xff] }
   0x4   :  { %v402_v9 = vld [vmem:[%s558_s1 + $0x8] sm:$0xff]  ;;  %v401_v10 = vld [vmem:[%s558_s1] sm:$0xff]  ;;  %v412_v13 = vld [vmem:[%s559_s2 + $0x18] sm:$0xff] }
   0x5   :  { %v31_v11 = vld [vmem:[%s560_s0] sm:$0xf]  ;;  %v411_v14 = vld [vmem:[%s559_s2 + $0x10] sm:$0xff]  ;;  %v410_v15 = vld [vmem:[%s559_s2 + $0x8] sm:$0xff] }
   0x6   :  { %97 = vmatpush.bf16.msra.mxu0 %v407_v1  ;;  %v413_v12 = vld [vmem:[%s559_s2 + $0x20] sm:$0xff]  ;;  %v424_v17 = vld [vmem:[%s562_s4 + $0x38] sm:$0xff]  ;;  %v423_v18 = vld [vmem:[%s562_s4 + $0x30] sm:$0xff] }
   0x7   :  { %192 = vmatpush.bf16.msra.mxu1 %v415_v3  ;;  %v409_v16 = vld [vmem:[%s559_s2] sm:$0xff]  ;;  %281 = vmatpush.bf16.msra.mxu2 %v424_v17  ;;  %v422_v19 = vld [vmem:[%s562_s4 + $0x28] sm:$0xff]  ;;  %v420_v30 = vld [vmem:[%s562_s4 + $0x18] sm:$0xff] }
   0x8   :  { %v421_v29 = vld [vmem:[%s562_s4 + $0x20] sm:$0xff]  ;;  %v419_v31 = vld [vmem:[%s562_s4 + $0x10] sm:$0xff]  ;;  %v418_v32 = vld [vmem:[%s562_s4 + $0x8] sm:$0xff] }
   0x9   :  { %v417_v33 = vld [vmem:[%s562_s4] sm:$0xff] }
   0xa   :  { %98 = vmatpush.bf16.msra.mxu0 %v406_v4  ;;  %v425_v34 = vld [vmem:[%s561_s3] ss:$0 sm:$0xff] }
   0xb   :  { %193 = vmatpush.bf16.msra.mxu1 %v414_v5  ;;  %282 = vmatpush.bf16.msra.mxu2 %v423_v18  ;;  %v426_v45 = vld [vmem:[%s563_s5] ss:$0 sm:$0xff] }
   0xe   :  { %99 = vmatpush.bf16.msra.mxu0 %v405_v6 }
   0xf   :  { %194 = vmatpush.bf16.msra.mxu1 %v413_v12  ;;  %283 = vmatpush.bf16.msra.mxu2 %v422_v19 }
  0x12   :  { %100 = vmatpush.bf16.msra.mxu0 %v404_v7 }
  0x13   :  { %195 = vmatpush.bf16.msra.mxu1 %v412_v13  ;;  %284 = vmatpush.bf16.msra.mxu2 %v421_v29 }
  0x16   :  { %101 = vmatpush.bf16.msra.mxu0 %v403_v8 }
  0x17   :  { %196 = vmatpush.bf16.msra.mxu1 %v411_v14  ;;  %285 = vmatpush.bf16.msra.mxu2 %v420_v30 }
  0x1a   :  { %102 = vmatpush.bf16.msra.mxu0 %v402_v9 }
  0x1b   :  { %197 = vmatpush.bf16.msra.mxu1 %v410_v15  ;;  %286 = vmatpush.bf16.msra.mxu2 %v419_v31 }
  0x1e   :  { %103 = vmatpush.bf16.msra.mxu0 %v401_v10 }
  0x1f   :  { %198 = vmatpush.bf16.msra.mxu1 %v409_v16  ;;  %287 = vmatpush.bf16.msra.mxu2 %v418_v32 }
  0x21   :  { %104 = vmatmul.bf16.vlgmr.msra.gmra.mxu0 %v31_v11 }
  0x23   :  { %288 = vmatpush.bf16.msra.mxu2 %v417_v33 }
  0x9e   :  { %v105_v20 = vpop.f32.mrf.mxu0 }
  0x9f   :  { %v116_v21 = vmul.f32 1.442695, %v105_v20  ;;  %vm115_vm0 = vcmp.gt.f32.partialorder %v105_v20, 0.0 }
  0xa1   :  { %427 = vpow2.f32 %v116_v21 }
  0xa6   :  { %v107_v22 = vpop.f32.mrf.mxu0 }
  0xa7   :  { %v428_v23 = vpop.eup %427 }
  0xa8   :  { %v335_v24 = vadd.f32 -1.0, %v428_v23 }
  0xaa   :  { %v119_v25 = vmul.f32 1.6732632, %v335_v24 }
  0xac   :  { %v120_v26 = vsel %vm115_vm0, %v105_v20, %v119_v25 }
  0xad   :  { %v121_v27 = vmul.f32 1.050701, %v120_v26 }
  0xaf   :  { %v122_v28 = vpack.c.bf16 %v121_v27, %v121_v27 }
  0xb1   :  { %199 = vmatmul.bf16.vlgmr.msra.gmra.mxu1 %v122_v28 }
 0x12e   :  { %v200_v35 = vpop.f32.mrf.mxu1 }
 0x12f   :  { %v201_v36 = vadd.f32 %v425_v34, %v200_v35 }
 0x131   :  { %v205_v37 = vmul.f32 1.442695, %v201_v36  ;;  %vm204_vm1 = vcmp.gt.f32.partialorder %v201_v36, 0.0 }
 0x133   :  { %429 = vpow2.f32 %v205_v37 }
 0x136   :  { %v202_v38 = vpop.f32.mrf.mxu1 }
 0x139   :  { %v430_v39 = vpop.eup %429 }
 0x13a   :  { %v368_v40 = vadd.f32 -1.0, %v430_v39 }
 0x13c   :  { %v208_v41 = vmul.f32 1.6732632, %v368_v40 }
 0x13e   :  { %v209_v42 = vsel %vm204_vm1, %v201_v36, %v208_v41 }
 0x13f   :  { %v210_v43 = vmul.f32 1.050701, %v209_v42 }
 0x141   :  { %211 = vst [vmem:[%s564_s7] sm:$0xff] %v210_v43  ;;  %v212_v44 = vpack.c.bf16 %v210_v43, %v210_v43 }
 0x143   :  { %289 = vmatmul.bf16.vlgmr.msra.gmra.mxu2 %v212_v44 }
 0x1c6   :  { %v290_v46 = vpop.f32.mrf.mxu2 }
 0x1c7   :  { %v291_v47 = vadd.f32 %v426_v45, %v290_v46 }
 0x1c9   :  { %294 = vst [vmem:[%s565_s6] sm:$0xff] %v291_v47 }
 0x1ce   :  { %v292_v48 = vpop.f32.mrf.mxu2 }

// kernel: gat_forward.6
= control target key start
LH: loop header
LB: loop body
LE: loop exit
PB: predicated region body
PF: predicated region fallthrough
CT: control target
= control target key end

     0   :  { %vm128_vm0 = vcmask 7168   ;;  %v1898_v0 = vmov -1e+30   ;;  %v1899_v1 = vmov 0.0   ;;  %s2831_s0 = inlined_call_operand.<no memory space> [shape: s32[1], index: 0, kind: input, shape index: {}]   ;;  %s2832_s1 = inlined_call_operand.<no memory space> [shape: s32[1,1], index: 1, kind: input, shape index: {}]   ;;  %s2833_s2 = inlined_call_operand.vmem [shape: f32[128,1], index: 2, kind: input, shape index: {}]   ;;  %s2834_s4 = inlined_call_operand.vmem [shape: f32[1,128], index: 4, kind: input, shape index: {}]   ;;  %s2835_s7 = inlined_call_operand.vmem [shape: bf16[128,128], index: 7, kind: output, shape index: {}]   ;;  %s2836_s3 = inlined_call_operand.vmem [shape: f32[1,128], index: 3, kind: input, shape index: {}]   ;;  %s2837_s6 = inlined_call_operand.vmem [shape: s8[128,128], index: 6, kind: input, shape index: {}]   ;;  %s2838_s5 = inlined_call_operand.vmem [shape: bf16[128,128], index: 5, kind: input, shape index: {}]  }
   0x1   :  { %p89_p0 = scmp.lt.s32.totalorder %s2832_s1, 0  ;;  %s1626_s28 = sshll.u32 %s2832_s1, 4  ;;  %129 = vst.msk [vmem:[#allocation2] sm:$0xff] %vm128_vm0, %v1898_v0 }
   0x2   :  { %p101_p1 = scmp.lt.s32.totalorder %s1626_s28, 15  ;;  %130 = vst.msk [vmem:[#allocation2 + $0x8] sm:$0xff] %vm128_vm0, %v1898_v0  ;;  %p1630_p2 = scmp.le.s32.totalorder %s2831_s0, 0 }
   0x3   :  { %s2891_s1 = smov (!%p89_p0, %s2832_s1), 0  ;;  %131 = vst.msk [vmem:[#allocation2 + $0x10] sm:$0xff] %vm128_vm0, %v1898_v0 }
   0x4   :  { %s2893_s28 = smov (!%p101_p1, %s1626_s28), 15  ;;  %132 = vst.msk [vmem:[#allocation2 + $0x18] sm:$0xff] %vm128_vm0, %v1898_v0  ;;  %s91_s10 = scalar_lea.vmem %s2836_s3, %s2891_s1 }
   0x5   :  { %s1628_s11 = sshll.u32 %s2891_s1, 3  ;;  %133 = vst.msk [vmem:[#allocation2 + $0x20] sm:$0xff] %vm128_vm0, %v1898_v0  ;;  %s1627_s12 = sshll.u32 %s2893_s28, 2 }
   0x6   :  { %s1966_s15 = scalar_lea.vmem %s2837_s6, %s1628_s11  ;;  %134 = vst.msk [vmem:[#allocation2 + $0x28] sm:$0xff] %vm128_vm0, %v1898_v0  ;;  %s1972_s18 = scalar_lea.vmem %s2838_s5, %s1627_s12 }
   0x7   :  { %135 = vst.msk [vmem:[#allocation2 + $0x30] sm:$0xff] %vm128_vm0, %v1898_v0 }
   0x8   :  { %136 = vst.msk [vmem:[#allocation2 + $0x38] sm:$0xff] %vm128_vm0, %v1898_v0 }
   0x9   :  { %137 = vst.msk [vmem:[#allocation2 + $0x40] sm:$0xff] %vm128_vm0, %v1898_v0 }
   0xa   :  { %138 = vst.msk [vmem:[#allocation2 + $0x48] sm:$0xff] %vm128_vm0, %v1898_v0 }
   0xb   :  { %139 = vst.msk [vmem:[#allocation2 + $0x50] sm:$0xff] %vm128_vm0, %v1898_v0 }
   0xc   :  { %140 = vst.msk [vmem:[#allocation2 + $0x58] sm:$0xff] %vm128_vm0, %v1898_v0 }
   0xd   :  { %141 = vst.msk [vmem:[#allocation2 + $0x60] sm:$0xff] %vm128_vm0, %v1898_v0 }
   0xe   :  { %142 = vst.msk [vmem:[#allocation2 + $0x68] sm:$0xff] %vm128_vm0, %v1898_v0 }
   0xf   :  { %143 = vst.msk [vmem:[#allocation2 + $0x70] sm:$0xff] %vm128_vm0, %v1898_v0 }
  0x10   :  { %144 = vst.msk [vmem:[#allocation2 + $0x78] sm:$0xff] %vm128_vm0, %v1898_v0 }
  0x11   :  { %145 = vst.msk [vmem:[#allocation3] sm:$0xff] %vm128_vm0, %v1899_v1 }
  0x12   :  { %146 = vst.msk [vmem:[#allocation3 + $0x8] sm:$0xff] %vm128_vm0, %v1899_v1 }
  0x13   :  { %147 = vst.msk [vmem:[#allocation3 + $0x10] sm:$0xff] %vm128_vm0, %v1899_v1 }
  0x14   :  { %148 = vst.msk [vmem:[#allocation3 + $0x18] sm:$0xff] %vm128_vm0, %v1899_v1 }
  0x15   :  { %149 = vst.msk [vmem:[#allocation3 + $0x20] sm:$0xff] %vm128_vm0, %v1899_v1 }
  0x16   :  { %150 = vst.msk [vmem:[#allocation3 + $0x28] sm:$0xff] %vm128_vm0, %v1899_v1 }
  0x17   :  { %151 = vst.msk [vmem:[#allocation3 + $0x30] sm:$0xff] %vm128_vm0, %v1899_v1 }
  0x18   :  { %152 = vst.msk [vmem:[#allocation3 + $0x38] sm:$0xff] %vm128_vm0, %v1899_v1 }
  0x19   :  { %153 = vst.msk [vmem:[#allocation3 + $0x40] sm:$0xff] %vm128_vm0, %v1899_v1 }
  0x1a   :  { %154 = vst.msk [vmem:[#allocation3 + $0x48] sm:$0xff] %vm128_vm0, %v1899_v1 }
  0x1b   :  { %155 = vst.msk [vmem:[#allocation3 + $0x50] sm:$0xff] %vm128_vm0, %v1899_v1 }
  0x1c   :  { %156 = vst.msk [vmem:[#allocation3 + $0x58] sm:$0xff] %vm128_vm0, %v1899_v1 }
  0x1d   :  { %157 = vst.msk [vmem:[#allocation3 + $0x60] sm:$0xff] %vm128_vm0, %v1899_v1 }
  0x1e   :  { %158 = vst.msk [vmem:[#allocation3 + $0x68] sm:$0xff] %vm128_vm0, %v1899_v1 }
  0x1f   :  { %159 = vst.msk [vmem:[#allocation3 + $0x70] sm:$0xff] %vm128_vm0, %v1899_v1 }
  0x20   :  { %160 = vst.msk [vmem:[#allocation3 + $0x78] sm:$0xff] %vm128_vm0, %v1899_v1 }
  0x21   :  { %161 = vst [vmem:[#allocation4 + $0x30] sm:$0xff] %v1899_v1 }
  0x22   :  { %162 = vst [vmem:[#allocation4] sm:$0xff] %v1899_v1 }
  0x23   :  { %163 = vst [vmem:[#allocation4 + $0x58] sm:$0xff] %v1899_v1 }
  0x24   :  { %164 = vst [vmem:[#allocation4 + $0x18] sm:$0xff] %v1899_v1 }
  0x25   :  { %165 = vst [vmem:[#allocation4 + $0x50] sm:$0xff] %v1899_v1 }
  0x26   :  { %166 = vst [vmem:[#allocation4 + $0x68] sm:$0xff] %v1899_v1 }
  0x27   :  { %167 = vst [vmem:[#allocation4 + $0x8] sm:$0xff] %v1899_v1 }
  0x28   :  { %168 = vst [vmem:[#allocation4 + $0x48] sm:$0xff] %v1899_v1 }
  0x29   :  { %169 = vst [vmem:[#allocation4 + $0x40] sm:$0xff] %v1899_v1 }
  0x2a   :  { %170 = vst [vmem:[#allocation4 + $0x20] sm:$0xff] %v1899_v1 }
  0x2b   :  { %171 = vst [vmem:[#allocation4 + $0x10] sm:$0xff] %v1899_v1 }
  0x2c   :  { %172 = vst [vmem:[#allocation4 + $0x38] sm:$0xff] %v1899_v1  ;;  %181 = sbr.rel (%p1630_p2) target bundleno = 612 (0x264), region = 29 }
  0x2d   :  { %173 = vst [vmem:[#allocation4 + $0x60] sm:$0xff] %v1899_v1 }
  0x2e   :  { %174 = vst [vmem:[#allocation4 + $0x70] sm:$0xff] %v1899_v1 }
  0x2f   :  { %175 = vst [vmem:[#allocation4 + $0x78] sm:$0xff] %v1899_v1 }
  0x30   :  { %176 = vst [vmem:[#allocation4 + $0x28] sm:$0xff] %v1899_v1 }
  0x31   :  { %v184_v2 = vld [vmem:[%s2833_s2 + $0x10] sm:$0xff]  ;;  %v182_v3 = vld [vmem:[%s2833_s2] sm:$0xff]  ;;  %v1900_v4 = vmov 0   ;;  %v185_v6 = vld [vmem:[%s2833_s2 + $0x18] sm:$0xff] }
  0x32   :  { %1763 = vset.pattern.permute.xlu1 %v1900_v4  ;;  %1762 = vset.pattern.permute.xlu0 %v1900_v4  ;;  %v186_v5 = vld [vmem:[%s2833_s2 + $0x20] sm:$0xff]  ;;  %v183_v7 = vld [vmem:[%s2833_s2 + $0x8] sm:$0xff]  ;;  %v189_v9 = vld [vmem:[%s2833_s2 + $0x38] sm:$0xff] }
  0x33   :  { %211 = vperm.xlu1 %1763, %v184_v2   ;;  %201 = vperm.xlu0 %1762, %v182_v3   ;;  %v187_v8 = vld [vmem:[%s2833_s2 + $0x28] sm:$0xff]  ;;  %v188_v10 = vld [vmem:[%s2833_s2 + $0x30] sm:$0xff]  ;;  %v190_v11 = vld [vmem:[%s2833_s2 + $0x40] sm:$0xff] }
  0x34   :  { %1764 = vset.pattern.permute.xlu2 %v1900_v4  ;;  %v192_v12 = vld [vmem:[%s2833_s2 + $0x50] sm:$0xff]  ;;  %v191_v13 = vld [vmem:[%s2833_s2 + $0x48] sm:$0xff]  ;;  %v193_v14 = vld [vmem:[%s2833_s2 + $0x58] sm:$0xff] }
  0x35   :  { %221 = vperm.xlu2 %1764, %v186_v5   ;;  %v195_v15 = vld [vmem:[%s2833_s2 + $0x68] sm:$0xff]  ;;  %v194_v16 = vld [vmem:[%s2833_s2 + $0x60] sm:$0xff]  ;;  %v196_v17 = vld [vmem:[%s2833_s2 + $0x70] sm:$0xff] }
  0x36   :  { %v197_v18 = vld [vmem:[%s2833_s2 + $0x78] sm:$0xff]  ;;  %v330_v19 = vld [vmem:[%s1966_s15] sm:$0xff]  ;;  %v331_v21 = vld [vmem:[%s1966_s15 + $0x8] sm:$0xff] }
  0x37   :  { %vm334_vm1 = vnez %v330_v19  ;;  %vm335_vm2 = vnez %v331_v21  ;;  %v2068_v38 = vld [vmem:[%s91_s10] ss:$0 sm:$0xff]  ;;  %v332_v42 = vld [vmem:[%s1966_s15 + $0x10] sm:$0xff]  ;;  %v333_v1 = vld [vmem:[%s1966_s15 + $0x18] sm:$0xff] }
  0x38   :  { %v338_v20 = vsel %vm334_vm1, 16843009, %v1900_v4  ;;  %v2058_v24 = vsel %vm335_vm2, 16843009, %v1900_v4  ;;  %vm336_vm7 = vnez %v332_v42  ;;  %vm337_vm11 = vnez %v333_v1 }
  0x39   :  { %v344_v22 = vunpack.c.2.s8 %v338_v20  ;;  %v342_v23 = vunpack.c.0.s8 %v338_v20  ;;  %v346_v27 = vunpack.c.0.s8 %v2058_v24  ;;  %v343_v30 = vunpack.c.1.s8 %v338_v20 }
  0x3a   :  { %v345_v32 = vunpack.c.3.s8 %v338_v20  ;;  %v349_v40 = vunpack.c.3.s8 %v2058_v24  ;;  %v348_v41 = vunpack.c.2.s8 %v2058_v24  ;;  %v2083_v60 = vsel %vm336_vm7, 16843009, %v1900_v4 }
  0x3b   :  { %216 = vperm.xlu1 %1763, %v185_v6   ;;  %206 = vperm.xlu0 %1762, %v183_v7   ;;  %v362_v25 = vpack.c.b16 %v344_v22, %v344_v22  ;;  %v358_v26 = vpack.c.b16 %v342_v23, %v342_v23  ;;  %v366_v31 = vpack.c.b16 %v346_v27, %v346_v27  ;;  %v347_v0 = vunpack.c.1.s8 %v2058_v24 }
  0x3c   :  { %v360_v33 = vpack.c.b16 %v343_v30, %v343_v30  ;;  %v364_v37 = vpack.c.b16 %v345_v32, %v345_v32  ;;  %v372_v53 = vpack.c.b16 %v349_v40, %v349_v40  ;;  %v370_v54 = vpack.c.b16 %v348_v41, %v348_v41 }
  0x3d   :  { %226 = vperm.xlu2 %1764, %v187_v8   ;;  %v363_v28 = vpack.c.b8 %v362_v25, %v362_v25  ;;  %v359_v29 = vpack.c.b8 %v358_v26, %v358_v26  ;;  %v367_v34 = vpack.c.b8 %v366_v31, %v366_v31  ;;  %v352_v5 = vunpack.c.2.s8 %v2083_v60 }
  0x3e   :  { %v361_v39 = vpack.c.b8 %v360_v33, %v360_v33  ;;  %v365_v49 = vpack.c.b8 %v364_v37, %v364_v37  ;;  %v373_v2 = vpack.c.b8 %v372_v53, %v372_v53  ;;  %v371_v3 = vpack.c.b8 %v370_v54, %v370_v54 }
  0x3f   :  { %vm392_vm3 = vnez %v363_v28  ;;  %vm390_vm4 = vnez %v359_v29  ;;  %vm394_vm5 = vnez %v367_v34  ;;  %v351_v6 = vunpack.c.1.s8 %v2083_v60 }
  0x40   :  { %v408_v35 = vsel %vm392_vm3, 16843009, %v1900_v4  ;;  %v406_v36 = vsel %vm390_vm4, 16843009, %v1900_v4  ;;  %vm391_vm6 = vnez %v361_v39  ;;  %v410_v52 = vsel %vm394_vm5, 16843009, %v1900_v4 }
  0x41   :  { %v424_v44 = vunpack.c.0.s8 %v408_v35  ;;  %v422_v45 = vunpack.c.0.s8 %v406_v36  ;;  %v407_v58 = vsel %vm391_vm6, 16843009, %v1900_v4  ;;  %vm2078_vm10 = vnez %v365_v49 }
  0x42   :  { %v426_v63 = vunpack.c.0.s8 %v410_v52  ;;  %vm397_vm13 = vnez %v373_v2  ;;  %vm396_vm14 = vnez %v371_v3  ;;  %v2101_v21 = vsel %vm337_vm11, 16843009, %v1900_v4 }
  0x43   :  { %236 = vperm.xlu1 %1763, %v189_v9   ;;  %231 = vperm.xlu0 %1762, %v188_v10   ;;  %vm440_vm8 = vcmp.ne.s32.totalorder %v424_v44, 0  ;;  %vm438_vm9 = vcmp.ne.s32.totalorder %v422_v45, 0  ;;  %v350_v24 = vunpack.c.0.s8 %v2083_v60  ;;  %v413_v26 = vsel %vm397_vm13, 16843009, %v1900_v4 }
  0x44   :  { %vm442_vm12 = vcmp.ne.s32.totalorder %v426_v63, 0  ;;  %v412_v27 = vsel %vm396_vm14, 16843009, %v1900_v4  ;;  %v355_v31 = vunpack.c.1.s8 %v2101_v21  ;;  %v354_v32 = vunpack.c.0.s8 %v2101_v21 }
  0x45   :  { %241 = vperm.xlu2 %1764, %v190_v11   ;;  %v429_v37 = vunpack.c.0.s8 %v413_v26  ;;  %v428_v40 = vunpack.c.0.s8 %v412_v27  ;;  %v374_v41 = vpack.c.b16 %v350_v24, %v350_v24 }
  0x46   :  { %v384_v45 = vpack.c.b16 %v355_v31, %v355_v31 }
  0x47   :  { %vm445_vm5 = vcmp.ne.s32.totalorder %v429_v37, 0  ;;  %vm444_vm6 = vcmp.ne.s32.totalorder %v428_v40, 0  ;;  %v375_v53 = vpack.c.b8 %v374_v41, %v374_v41 }
  0x48   :  { %v385_v59 = vpack.c.b8 %v384_v45, %v384_v45 }
  0x49   :  { %vm398_vm7 = vnez %v375_v53 }
  0x4b   :  { %251 = vperm.xlu1 %1763, %v192_v12   ;;  %246 = vperm.xlu0 %1762, %v191_v13   ;;  %v423_v12 = vunpack.c.0.s8 %v407_v58 }
  0x4d   :  { %256 = vperm.xlu2 %1764, %v193_v14   ;;  %v409_v14 = vsel %vm2078_vm10, 16843009, %v1900_v4  ;;  %vm439_vm15 = vcmp.ne.s32.totalorder %v423_v12, 0 }
  0x4e   :  { %v425_v23 = vunpack.c.0.s8 %v409_v14 }
  0x50   :  { %vm2114_vm1 = vcmp.ne.s32.totalorder %v425_v23, 0 }
  0x53   :  { %266 = vperm.xlu1 %1763, %v195_v15   ;;  %261 = vperm.xlu0 %1762, %v194_v16   ;;  %v368_v15 = vpack.c.b16 %v347_v0, %v347_v0 }
  0x55   :  { %271 = vperm.xlu2 %1764, %v196_v17   ;;  %v378_v17 = vpack.c.b16 %v352_v5, %v352_v5  ;;  %v369_v28 = vpack.c.b8 %v368_v15, %v368_v15 }
  0x57   :  { %v379_v29 = vpack.c.b8 %v378_v17, %v378_v17  ;;  %vm395_vm2 = vnez %v369_v28  ;;  %v414_v17 = vsel %vm398_vm7, 16843009, %v1900_v4  ;;  %v356_v28 = vunpack.c.2.s8 %v2101_v21 }
  0x58   :  { %v411_v52 = vsel %vm395_vm2, 16843009, %v1900_v4 }
  0x59   :  { %vm400_vm3 = vnez %v379_v29  ;;  %v427_v5 = vunpack.c.0.s8 %v411_v52  ;;  %v386_v41 = vpack.c.b16 %v356_v28, %v356_v28 }
  0x5b   :  { %276 = vperm.xlu0 %1762, %v197_v18   ;;  %v376_v18 = vpack.c.b16 %v351_v6, %v351_v6  ;;  %vm443_vm11 = vcmp.ne.s32.totalorder %v427_v5, 0 }
  0x5d   :  { %v377_v30 = vpack.c.b8 %v376_v18, %v376_v18 }
  0x5f   :  { %vm399_vm4 = vnez %v377_v30 }
  0x8f   :  { %v222_v43 = vpop.permute.xlu2 %221 }
  0x90   :  { %v286_v46 = vadd.f32 %v2068_v38, %v222_v43 }
  0x92   :  { %v302_v57 = vmul.f32 0.2, %v286_v46 }
  0x94   :  { %v318_v11 = vmax.f32 %v286_v46, %v302_v57  ;;  %v382_v46 = vpack.c.b16 %v354_v32, %v354_v32  ;;  %v415_v57 = vsel %vm399_vm4, 16843009, %v1900_v4  ;;  %v430_v32 = vunpack.c.0.s8 %v414_v17  ;;  %v2197_v17 = vld [vmem:[#allocation2 + $0x8] sm:$0xff] }
  0x95   :  { %v431_v6 = vunpack.c.0.s8 %v415_v57 }
  0x96   :  { %v2103_v22 = vsel %vm442_vm12, %v318_v11, -1e+30 }
  0x97   :  { %v227_v16 = vpop.permute.xlu2 %226  ;;  %vm447_vm12 = vcmp.ne.s32.totalorder %v431_v6, 0 }
  0x98   :  { %v287_v42 = vadd.f32 %v2068_v38, %v227_v16 }
  0x9a   :  { %v303_v58 = vmul.f32 0.2, %v287_v42 }
  0x9c   :  { %v319_v16 = vmax.f32 %v287_v42, %v303_v58 }
  0x9e   :  { %v2146_v30 = vsel %vm443_vm11, %v319_v16, -1e+30  ;;  %v2195_v16 = vld [vmem:[#allocation2 + $0x20] sm:$0xff] }
  0xa5   :  { %v212_v47 = vpop.permute.xlu1 %211  ;;  %v202_v48 = vpop.permute.xlu0 %201 }
  0xa6   :  { %v284_v50 = vadd.f32 %v2068_v38, %v212_v47  ;;  %v282_v51 = vadd.f32 %v2068_v38, %v202_v48 }
  0xa8   :  { %v300_v55 = vmul.f32 0.2, %v284_v50  ;;  %v298_v56 = vmul.f32 0.2, %v282_v51 }
  0xaa   :  { %v316_v61 = vmax.f32 %v284_v50, %v300_v55  ;;  %v314_v62 = vmax.f32 %v282_v51, %v298_v56  ;;  %v353_v50 = vunpack.c.3.s8 %v2083_v60  ;;  %v242_v51 = vpop.permute.xlu2 %241  ;;  %v416_v56 = vsel %vm400_vm3, 16843009, %v1900_v4 }
  0xab   :  { %v432_v3 = vunpack.c.0.s8 %v416_v56  ;;  %v290_v12 = vadd.f32 %v2068_v38, %v242_v51 }
  0xac   :  { %v2089_v7 = vsel %vm440_vm8, %v316_v61, -1e+30  ;;  %v2091_v8 = vsel %vm438_vm9, %v314_v62, -1e+30  ;;  %v383_v61 = vpack.c.b8 %v382_v46, %v382_v46  ;;  %v357_v62 = vunpack.c.3.s8 %v2101_v21 }
  0xad   :  { %v217_v9 = vpop.permute.xlu1 %216  ;;  %490 = vmax.xlane.f32.xlu0 %v2089_v7  ;;  %486 = vmax.xlane.f32.xlu1 %v2091_v8  ;;  %v207_v10 = vpop.permute.xlu0 %206  ;;  %v380_v11 = vpack.c.b16 %v353_v50, %v353_v50  ;;  %vm403_vm8 = vnez %v385_v59  ;;  %vm448_vm10 = vcmp.ne.s32.totalorder %v432_v3, 0  ;;  %v306_v24 = vmul.f32 0.2, %v290_v12 }
  0xae   :  { %v283_v13 = vadd.f32 %v2068_v38, %v207_v10  ;;  %v285_v19 = vadd.f32 %v2068_v38, %v217_v9  ;;  %vm402_vm9 = vnez %v383_v61  ;;  %v387_v50 = vpack.c.b8 %v386_v41, %v386_v41 }
  0xaf   :  { %v418_v23 = vsel %vm402_vm9, 16843009, %v1900_v4  ;;  %v381_v26 = vpack.c.b8 %v380_v11, %v380_v11  ;;  %v322_v40 = vmax.f32 %v290_v12, %v306_v24  ;;  %v2179_v11 = vld [vmem:[#allocation2] sm:$0xff]  ;;  %v2181_v12 = vld [vmem:[#allocation2 + $0x10] sm:$0xff]  ;;  %v2211_v24 = vld [vmem:[#allocation2 + $0x38] sm:$0xff] }
  0xb0   :  { %v299_v20 = vmul.f32 0.2, %v283_v13  ;;  %v301_v33 = vmul.f32 0.2, %v285_v19  ;;  %v434_v37 = vunpack.c.0.s8 %v418_v23  ;;  %vm404_vm3 = vnez %v387_v50 }
  0xb1   :  { %vm401_vm13 = vnez %v381_v26  ;;  %v2215_v26 = vld [vmem:[#allocation2 + $0x30] sm:$0xff] }
  0xb2   :  { %v315_v25 = vmax.f32 %v283_v13, %v299_v20  ;;  %v317_v49 = vmax.f32 %v285_v19, %v301_v33  ;;  %v388_v13 = vpack.c.b16 %v357_v62, %v357_v62  ;;  %v419_v20 = vsel %vm403_vm8, 16843009, %v1900_v4 }
  0xb3   :  { %vm450_vm2 = vcmp.ne.s32.totalorder %v434_v37, 0  ;;  %v2234_v37 = vld [vmem:[#allocation2 + $0x50] sm:$0xff] }
  0xb4   :  { %v2110_v34 = vsel %vm439_vm15, %v315_v25, -1e+30  ;;  %v2130_v60 = vsel %vm2114_vm1, %v317_v49, -1e+30  ;;  %v257_v25 = vpop.permute.xlu2 %256  ;;  %v389_v27 = vpack.c.b8 %v388_v13, %v388_v13  ;;  %vm446_vm15 = vcmp.ne.s32.totalorder %v430_v32, 0 }
  0xb5   :  { %v237_v35 = vpop.permute.xlu1 %236  ;;  %494 = vmax.xlane.f32.xlu1 %v2103_v22  ;;  %488 = vmax.xlane.f32.xlu2 %v2110_v34  ;;  %v232_v36 = vpop.permute.xlu0 %231  ;;  %v293_v42 = vadd.f32 %v2068_v38, %v257_v25  ;;  %v2158_v49 = vsel %vm446_vm15, %v322_v40, -1e+30  ;;  %v2213_v25 = vld [vmem:[#allocation2 + $0x18] sm:$0xff] }
  0xb6   :  { %v289_v43 = vadd.f32 %v2068_v38, %v237_v35  ;;  %v288_v44 = vadd.f32 %v2068_v38, %v232_v36  ;;  %v435_v36 = vunpack.c.0.s8 %v419_v20  ;;  %vm405_vm14 = vnez %v389_v27 }
  0xb7   :  { %v309_v51 = vmul.f32 0.2, %v293_v42 }
  0xb8   :  { %v305_v47 = vmul.f32 0.2, %v289_v43  ;;  %v304_v48 = vmul.f32 0.2, %v288_v44  ;;  %vm451_vm1 = vcmp.ne.s32.totalorder %v435_v36, 0 }
  0xb9   :  { %v325_v62 = vmax.f32 %v293_v42, %v309_v51 }
  0xba   :  { %v321_v54 = vmax.f32 %v289_v43, %v305_v47  ;;  %v320_v55 = vmax.f32 %v288_v44, %v304_v48  ;;  %v417_v47 = vsel %vm401_vm13, 16843009, %v1900_v4  ;;  %v421_v48 = vsel %vm405_vm14, 16843009, %v1900_v4 }
  0xbb   :  { %v433_v56 = vunpack.c.0.s8 %v417_v47  ;;  %v437_v57 = vunpack.c.0.s8 %v421_v48  ;;  %v2255_v47 = vld [vmem:[#allocation2 + $0x40] sm:$0xff] }
  0xbc   :  { %v2126_v63 = vsel %vm445_vm5, %v321_v54, -1e+30  ;;  %v2132_v0 = vsel %vm444_vm6, %v320_v55, -1e+30  ;;  %v272_v54 = vpop.permute.xlu2 %271  ;;  %v2257_v48 = vld [vmem:[#allocation2 + $0x60] sm:$0xff] }
  0xbd   :  { %v252_v1 = vpop.permute.xlu1 %251  ;;  %500 = vmax.xlane.f32.xlu1 %v2126_v63  ;;  %492 = vmax.xlane.f32.xlu2 %v2130_v60  ;;  %v247_v2 = vpop.permute.xlu0 %246  ;;  %v296_v59 = vadd.f32 %v2068_v38, %v272_v54  ;;  %vm449_vm4 = vcmp.ne.s32.totalorder %v433_v56, 0  ;;  %vm453_vm5 = vcmp.ne.s32.totalorder %v437_v57, 0 }
  0xbe   :  { %v292_v9 = vadd.f32 %v2068_v38, %v252_v1  ;;  %498 = vmax.xlane.f32.xlu0 %v2132_v0  ;;  %v291_v10 = vadd.f32 %v2068_v38, %v247_v2  ;;  %v420_v2 = vsel %vm404_vm3, 16843009, %v1900_v4  ;;  %v2170_v5 = vsel %vm449_vm4, %v325_v62, -1e+30  ;;  %v2283_v62 = vld [vmem:[#allocation2 + $0x78] sm:$0xff] }
  0xbf   :  { %v312_v3 = vmul.f32 0.2, %v296_v59 }
  0xc0   :  { %v308_v14 = vmul.f32 0.2, %v292_v9  ;;  %v307_v15 = vmul.f32 0.2, %v291_v10 }
  0xc2   :  { %v324_v18 = vmax.f32 %v292_v9, %v308_v14  ;;  %v323_v19 = vmax.f32 %v291_v10, %v307_v15  ;;  %v436_v9 = vunpack.c.0.s8 %v420_v2  ;;  %v328_v10 = vmax.f32 %v296_v59, %v312_v3 }
  0xc4   :  { %v2144_v29 = vsel %vm448_vm10, %v324_v18, -1e+30  ;;  %v2148_v31 = vsel %vm447_vm12, %v323_v19, -1e+30  ;;  %vm452_vm6 = vcmp.ne.s32.totalorder %v436_v9, 0 }
  0xc5   :  { %v267_v33 = vpop.permute.xlu1 %266  ;;  %506 = vmax.xlane.f32.xlu1 %v2144_v29  ;;  %496 = vmax.xlane.f32.xlu2 %v2146_v30  ;;  %v262_v35 = vpop.permute.xlu0 %261 }
  0xc6   :  { %v295_v39 = vadd.f32 %v2068_v38, %v267_v33  ;;  %504 = vmax.xlane.f32.xlu0 %v2148_v31  ;;  %v294_v21 = vadd.f32 %v2068_v38, %v262_v35 }
  0xc8   :  { %v311_v43 = vmul.f32 0.2, %v295_v39  ;;  %v310_v44 = vmul.f32 0.2, %v294_v21 }
  0xca   :  { %v327_v45 = vmax.f32 %v295_v39, %v311_v43  ;;  %v326_v46 = vmax.f32 %v294_v21, %v310_v44  ;;  %v2236_v39 = vld [vmem:[#allocation2 + $0x28] sm:$0xff] }
  0xcb   :  { %v2238_v21 = vld [vmem:[#allocation2 + $0x48] sm:$0xff] }
  0xcc   :  { %v2160_v52 = vsel %vm451_vm1, %v327_v45, -1e+30  ;;  %v2162_v53 = vsel %vm450_vm2, %v326_v46, -1e+30  ;;  %v2253_v46 = vld [vmem:[#allocation2 + $0x68] sm:$0xff] }
  0xcd   :  { %512 = vmax.xlane.f32.xlu1 %v2160_v52  ;;  %502 = vmax.xlane.f32.xlu2 %v2158_v49  ;;  %v277_v55 = vpop.permute.xlu0 %276 }
  0xce   :  { %510 = vmax.xlane.f32.xlu0 %v2162_v53  ;;  %v297_v58 = vadd.f32 %v2068_v38, %v277_v55  ;;  %v2176_v38 = vsel %vm452_vm6, %v328_v10, -1e+30 }
  0xd0   :  { %v313_v61 = vmul.f32 0.2, %v297_v58 }
  0xd2   :  { %v329_v1 = vmax.f32 %v297_v58, %v313_v61  ;;  %v2281_v61 = vld [vmem:[#allocation2 + $0x58] sm:$0xff] }
  0xd4   :  { %v2172_v6 = vsel %vm453_vm5, %v329_v1, -1e+30 }
  0xd5   :  { %508 = vmax.xlane.f32.xlu2 %v2170_v5 }
  0xd6   :  { %516 = vmax.xlane.f32.xlu0 %v2172_v6 }
  0xdd   :  { %514 = vmax.xlane.f32.xlu2 %v2176_v38 }
 0x120   :  { %v487_v4 = vpop.xlane.xlu1 %486  ;;  %v491_v13 = vpop.xlane.xlu0 %490 }
 0x121   :  { %v2184_v14 = vmax.f32 %v2179_v11, %v487_v4  ;;  %v2187_v15 = vmax.f32 %v2181_v12, %v491_v13 }
 0x123   :  { %1072 = vst.msk [vmem:[#allocation2] sm:$0xff] %vm128_vm0, %v2184_v14  ;;  %584 = vperm.xlu1 %1763, %v2184_v14   ;;  %594 = vperm.xlu0 %1762, %v2187_v15   ;;  %v536_v59 = vsub.f32 %v2181_v12, %v2187_v15  ;;  %v534_v4 = vsub.f32 %v2179_v11, %v2184_v14  ;;  %v2306_v14 = vld [vmem:[#allocation2 + $0x70] sm:$0xff] }
 0x124   :  { %1074 = vst.msk [vmem:[#allocation2 + $0x10] sm:$0xff] %vm128_vm0, %v2187_v15 }
 0x125   :  { %v554_v2 = vmul.f32 1.442695, %v536_v59  ;;  %v550_v15 = vmul.f32 1.442695, %v534_v4 }
 0x127   :  { %1766 = vpow2.f32 %v554_v2  ;;  %v1685_v2 = vld [vmem:[%s1972_s18 + $0x30] sm:$0xff] }
 0x128   :  { %v495_v18 = vpop.xlane.xlu1 %494  ;;  %v489_v19 = vpop.xlane.xlu2 %488  ;;  %1768 = vpow2.f32 %v550_v15 }
 0x129   :  { %v2200_v20 = vmax.f32 %v2195_v16, %v495_v18  ;;  %v2203_v23 = vmax.f32 %v2197_v17, %v489_v19 }
 0x12b   :  { %1076 = vst.msk [vmem:[#allocation2 + $0x20] sm:$0xff] %vm128_vm0, %v2200_v20  ;;  %589 = vperm.xlu2 %1764, %v2203_v23   ;;  %604 = vperm.xlu0 %1762, %v2200_v20   ;;  %v535_v12 = vsub.f32 %v2197_v17, %v2203_v23  ;;  %v538_v11 = vsub.f32 %v2195_v16, %v2200_v20 }
 0x12c   :  { %1073 = vst.msk [vmem:[#allocation2 + $0x8] sm:$0xff] %vm128_vm0, %v2203_v23 }
 0x12d   :  { %v552_v18 = vmul.f32 1.442695, %v535_v12  ;;  %v2311_v23 = vpop.eup %1766 }
 0x12f   :  { %1770 = vpow2.f32 %v552_v18  ;;  %v1682_v18 = vld [vmem:[%s1972_s18 + $0x18] sm:$0xff] }
 0x130   :  { %v501_v27 = vpop.xlane.xlu1 %500  ;;  %v493_v28 = vpop.xlane.xlu2 %492 }
 0x131   :  { %v2218_v32 = vmax.f32 %v2211_v24, %v501_v27  ;;  %v2221_v33 = vmax.f32 %v2213_v25, %v493_v28  ;;  %v499_v35 = vpop.xlane.xlu0 %498  ;;  %v558_v27 = vmul.f32 1.442695, %v538_v11 }
 0x132   :  { %v2224_v36 = vmax.f32 %v2215_v26, %v499_v35 }
 0x133   :  { %1079 = vst.msk [vmem:[#allocation2 + $0x38] sm:$0xff] %vm128_vm0, %v2218_v32  ;;  %599 = vperm.xlu1 %1763, %v2221_v33   ;;  %619 = vperm.xlu0 %1762, %v2218_v32   ;;  %v537_v28 = vsub.f32 %v2213_v25, %v2221_v33  ;;  %1772 = vpow2.f32 %v558_v27  ;;  %v541_v20 = vsub.f32 %v2211_v24, %v2218_v32  ;;  %v1679_v27 = vld [vmem:[%s1972_s18] sm:$0xff] }
 0x134   :  { %1075 = vst.msk [vmem:[#allocation2 + $0x18] sm:$0xff] %vm128_vm0, %v2221_v33 }
 0x135   :  { %1078 = vst.msk [vmem:[#allocation2 + $0x30] sm:$0xff] %vm128_vm0, %v2224_v36  ;;  %v556_v25 = vmul.f32 1.442695, %v537_v28 }
 0x137   :  { %1774 = vpow2.f32 %v556_v25 }
 0x138   :  { %v507_v40 = vpop.xlane.xlu1 %506  ;;  %v497_v41 = vpop.xlane.xlu2 %496 }
 0x139   :  { %v2241_v42 = vmax.f32 %v2234_v37, %v507_v40  ;;  %v523_v43 = vmax.f32 %v2236_v39, %v497_v41  ;;  %v505_v44 = vpop.xlane.xlu0 %504  ;;  %v2325_v40 = vpop.eup %1768  ;;  %v564_v41 = vmul.f32 1.442695, %v541_v20 }
 0x13a   :  { %v2245_v45 = vmax.f32 %v2238_v21, %v505_v44  ;;  %v2327_v44 = vpop.eup %1770 }
 0x13b   :  { %1082 = vst.msk [vmem:[#allocation2 + $0x50] sm:$0xff] %vm128_vm0, %v2241_v42  ;;  %609 = vperm.xlu2 %1764, %v523_v43   ;;  %614 = vperm.xlu1 %1763, %v2224_v36   ;;  %v539_v16 = vsub.f32 %v2236_v39, %v523_v43  ;;  %v1686_v39 = vld [vmem:[%s1972_s18 + $0x38] sm:$0xff]  ;;  %v544_v32 = vsub.f32 %v2234_v37, %v2241_v42 }
 0x13c   :  { %1077 = vst.msk [vmem:[#allocation2 + $0x28] sm:$0xff] %vm128_vm0, %v523_v43  ;;  %991 = vmatpush.bf16.msra.mxu0 %v1686_v39  ;;  %1734 = vmatpush.bf16.msra.mxu1 %v1686_v39 }
 0x13d   :  { %1081 = vst.msk [vmem:[#allocation2 + $0x48] sm:$0xff] %vm128_vm0, %v2245_v45  ;;  %v560_v33 = vmul.f32 1.442695, %v539_v16  ;;  %1735 = vmatpush.bf16.msra.mxu2 %v1686_v39  ;;  %1736 = vmatpush.bf16.msra.mxu3 %v1686_v39 }
 0x13f   :  { %1776 = vpow2.f32 %v560_v33 }
 0x140   :  { %v513_v50 = vpop.xlane.xlu1 %512  ;;  %v503_v51 = vpop.xlane.xlu2 %502  ;;  %1778 = vpow2.f32 %v564_v41  ;;  %992 = vmatpush.bf16.msra.mxu0 %v1685_v2  ;;  %1737 = vmatpush.bf16.msra.mxu1 %v1685_v2 }
 0x141   :  { %v2260_v54 = vmax.f32 %v2253_v46, %v513_v50  ;;  %v2263_v55 = vmax.f32 %v2255_v47, %v503_v51  ;;  %v511_v56 = vpop.xlane.xlu0 %510  ;;  %v2329_v50 = vpop.eup %1772  ;;  %v540_v51 = vsub.f32 %v2215_v26, %v2224_v36  ;;  %1738 = vmatpush.bf16.msra.mxu2 %v1685_v2  ;;  %1739 = vmatpush.bf16.msra.mxu3 %v1685_v2 }
 0x142   :  { %v2266_v57 = vmax.f32 %v2257_v48, %v511_v56  ;;  %v2341_v43 = vpop.eup %1774  ;;  %v570_v56 = vmul.f32 1.442695, %v544_v32 }
 0x143   :  { %v547_v58 = vsub.f32 %v2253_v46, %v2260_v54  ;;  %1085 = vst.msk [vmem:[#allocation2 + $0x68] sm:$0xff] %vm128_vm0, %v2260_v54  ;;  %624 = vperm.xlu2 %1764, %v2263_v55   ;;  %629 = vperm.xlu1 %1763, %v2245_v45   ;;  %v542_v24 = vsub.f32 %v2255_v47, %v2263_v55  ;;  %v562_v26 = vmul.f32 1.442695, %v540_v51 }
 0x144   :  { %1080 = vst.msk [vmem:[#allocation2 + $0x40] sm:$0xff] %vm128_vm0, %v2263_v55  ;;  %644 = vperm.xlu0 %1762, %v2266_v57   ;;  %v543_v55 = vsub.f32 %v2238_v21, %v2245_v45  ;;  %v1684_v21 = vld [vmem:[%s1972_s18 + $0x28] sm:$0xff] }
 0x145   :  { %1084 = vst.msk [vmem:[#allocation2 + $0x60] sm:$0xff] %vm128_vm0, %v2266_v57  ;;  %v566_v36 = vmul.f32 1.442695, %v542_v24  ;;  %v2343_v59 = vpop.eup %1776  ;;  %1780 = vpow2.f32 %v562_v26  ;;  %993 = vmatpush.bf16.msra.mxu0 %v1684_v21  ;;  %1740 = vmatpush.bf16.msra.mxu1 %v1684_v21 }
 0x146   :  { %v2345_v47 = vpop.eup %1778  ;;  %1741 = vmatpush.bf16.msra.mxu2 %v1684_v21  ;;  %1742 = vmatpush.bf16.msra.mxu3 %v1684_v21 }
 0x147   :  { %1782 = vpow2.f32 %v566_v36 }
 0x148   :  { %v509_v1 = vpop.xlane.xlu2 %508  ;;  %1784 = vpow2.f32 %v570_v56 }
 0x149   :  { %v2286_v3 = vmax.f32 %v2281_v61, %v509_v1  ;;  %v517_v9 = vpop.xlane.xlu0 %516 }
 0x14a   :  { %v2289_v10 = vmax.f32 %v2283_v62, %v517_v9 }
 0x14b   :  { %1083 = vst.msk [vmem:[#allocation2 + $0x58] sm:$0xff] %vm128_vm0, %v2286_v3  ;;  %649 = vperm.xlu2 %1764, %v2260_v54   ;;  %634 = vperm.xlu1 %1763, %v2241_v42   ;;  %v545_v37 = vsub.f32 %v2281_v61, %v2286_v3  ;;  %v568_v42 = vmul.f32 1.442695, %v543_v55  ;;  %v2355_v9 = vpop.eup %1780  ;;  %v546_v61 = vsub.f32 %v2257_v48, %v2266_v57  ;;  %v1681_v48 = vld [vmem:[%s1972_s18 + $0x10] sm:$0xff] }
 0x14c   :  { %v549_v13 = vsub.f32 %v2283_v62, %v2289_v10  ;;  %1087 = vst.msk [vmem:[#allocation2 + $0x78] sm:$0xff] %vm128_vm0, %v2289_v10  ;;  %639 = vperm.xlu0 %1762, %v2286_v3   ;;  %v1683_v3 = vld [vmem:[%s1972_s18 + $0x20] sm:$0xff] }
 0x14d   :  { %v572_v1 = vmul.f32 1.442695, %v545_v37  ;;  %v2357_v4 = vpop.eup %1782  ;;  %1786 = vpow2.f32 %v568_v42  ;;  %v574_v12 = vmul.f32 1.442695, %v546_v61  ;;  %994 = vmatpush.bf16.msra.mxu0 %v1683_v3  ;;  %1743 = vmatpush.bf16.msra.mxu1 %v1683_v3 }
 0x14e   :  { %v2360_v45 = vpop.eup %1784  ;;  %1744 = vmatpush.bf16.msra.mxu2 %v1683_v3  ;;  %1745 = vmatpush.bf16.msra.mxu3 %v1683_v3 }
 0x14f   :  { %1788 = vpow2.f32 %v572_v1 }
 0x150   :  { %v515_v19 = vpop.xlane.xlu2 %514  ;;  %1790 = vpow2.f32 %v574_v12 }
 0x151   :  { %v2309_v17 = vmax.f32 %v2306_v14, %v515_v19  ;;  %995 = vmatpush.bf16.msra.mxu0 %v1682_v18  ;;  %1746 = vmatpush.bf16.msra.mxu1 %v1682_v18  ;;  %v1680_v19 = vld [vmem:[%s1972_s18 + $0x8] sm:$0xff] }
 0x152   :  { %1747 = vmatpush.bf16.msra.mxu2 %v1682_v18  ;;  %1748 = vmatpush.bf16.msra.mxu3 %v1682_v18 }
 0x153   :  { %v548_v35 = vsub.f32 %v2306_v14, %v2309_v17  ;;  %1086 = vst.msk [vmem:[#allocation2 + $0x70] sm:$0xff] %vm128_vm0, %v2309_v17  ;;  %654 = vperm.xlu2 %1764, %v2309_v17   ;;  %659 = vperm.xlu1 %1763, %v2289_v10   ;;  %v2368_v11 = vpop.eup %1786 }
 0x154   :  { %835 = vperm.xlu0 %1762, %v2311_v23  }
 0x155   :  { %v2370_v15 = vpop.eup %1788  ;;  %996 = vmatpush.bf16.msra.mxu0 %v1681_v48  ;;  %1749 = vmatpush.bf16.msra.mxu1 %v1681_v48 }
 0x156   :  { %v2376_v57 = vpop.eup %1790  ;;  %1750 = vmatpush.bf16.msra.mxu2 %v1681_v48  ;;  %1751 = vmatpush.bf16.msra.mxu3 %v1681_v48 }
 0x159   :  { %997 = vmatpush.bf16.msra.mxu0 %v1680_v19  ;;  %1752 = vmatpush.bf16.msra.mxu1 %v1680_v19 }
 0x15a   :  { %1753 = vmatpush.bf16.msra.mxu2 %v1680_v19  ;;  %1754 = vmatpush.bf16.msra.mxu3 %v1680_v19 }
 0x15b   :  { %825 = vperm.xlu2 %1764, %v2325_v40   ;;  %830 = vperm.xlu1 %1763, %v2327_v44  }
 0x15c   :  { %845 = vperm.xlu0 %1762, %v2329_v50  }
 0x15d   :  { %998 = vmatpush.bf16.msra.mxu0 %v1679_v27  ;;  %1755 = vmatpush.bf16.msra.mxu1 %v1679_v27 }
 0x15e   :  { %1756 = vmatpush.bf16.msra.mxu2 %v1679_v27  ;;  %1757 = vmatpush.bf16.msra.mxu3 %v1679_v27 }
 0x163   :  { %840 = vperm.xlu2 %1764, %v2341_v43   ;;  %850 = vperm.xlu1 %1763, %v2343_v59  }
 0x164   :  { %860 = vperm.xlu0 %1762, %v2345_v47  }
 0x16b   :  { %855 = vperm.xlu2 %1764, %v2355_v9   ;;  %865 = vperm.xlu1 %1763, %v2357_v4  }
 0x16c   :  { %875 = vperm.xlu0 %1762, %v2360_v45  }
 0x173   :  { %870 = vperm.xlu2 %1764, %v2368_v11   ;;  %880 = vperm.xlu1 %1763, %v2370_v15  }
 0x17b   :  { %885 = vperm.xlu2 %1764, %v2376_v57  }
 0x185   :  { %v590_v28 = vpop.permute.xlu2 %589 }
 0x186   :  { %v663_v16 = vsub.f32 %v2110_v34, %v590_v28 }
 0x188   :  { %v680_v20 = vmul.f32 1.442695, %v663_v16 }
 0x18a   :  { %1792 = vpow2.f32 %v680_v20 }
 0x190   :  { %v1793_v55 = vpop.eup %1792 }
 0x195   :  { %v585_v25 = vpop.permute.xlu1 %584  ;;  %v595_v41 = vpop.permute.xlu0 %594 }
 0x196   :  { %v662_v33 = vsub.f32 %v2091_v8, %v585_v25  ;;  %v610_v51 = vpop.permute.xlu2 %609  ;;  %v664_v39 = vsub.f32 %v2089_v7, %v595_v41 }
 0x197   :  { %v667_v26 = vsub.f32 %v2146_v30, %v610_v51 }
 0x198   :  { %v678_v24 = vmul.f32 1.442695, %v662_v33  ;;  %v682_v32 = vmul.f32 1.442695, %v664_v39 }
 0x199   :  { %v688_v36 = vmul.f32 1.442695, %v667_v26 }
 0x19a   :  { %1794 = vpow2.f32 %v678_v24 }
 0x19b   :  { %1796 = vpow2.f32 %v682_v32 }
 0x19c   :  { %1798 = vpow2.f32 %v688_v36 }
 0x19d   :  { %v605_v56 = vpop.permute.xlu0 %604 }
 0x19e   :  { %v666_v34 = vsub.f32 %v2103_v22, %v605_v56  ;;  %v625_v42 = vpop.permute.xlu2 %624 }
 0x19f   :  { %v670_v7 = vsub.f32 %v2158_v49, %v625_v42 }
 0x1a0   :  { %v1795_v37 = vpop.eup %1794  ;;  %v686_v1 = vmul.f32 1.442695, %v666_v34 }
 0x1a1   :  { %742 = vadd.xlane.f32.xlu0 %v1795_v37  ;;  %v919_v8 = vpack.c.bf16 %v1793_v55, %v1795_v37  ;;  %v1797_v2 = vpop.eup %1796  ;;  %v694_v12 = vmul.f32 1.442695, %v670_v7 }
 0x1a2   :  { %1800 = vpow2.f32 %v686_v1  ;;  %746 = vadd.xlane.f32.xlu1 %v1797_v2  ;;  %v1799_v22 = vpop.eup %1798 }
 0x1a3   :  { %999 = vmatmul.bf16.vlgmr.msra.gmra.mxu0 %v919_v8 }
 0x1a4   :  { %744 = vadd.xlane.f32.xlu2 %v1793_v55 }
 0x1a5   :  { %v600_v30 = vpop.permute.xlu1 %599  ;;  %v620_v61 = vpop.permute.xlu0 %619 }
 0x1a6   :  { %v665_v21 = vsub.f32 %v2130_v60, %v600_v30  ;;  %v669_v3 = vsub.f32 %v2126_v63, %v620_v61  ;;  %v650_v28 = vpop.permute.xlu2 %649 }
 0x1a7   :  { %v675_v63 = vsub.f32 %v2160_v52, %v650_v28  ;;  %v578_v28 = vmul.f32 1.442695, %v548_v35 }
 0x1a8   :  { %v684_v18 = vmul.f32 1.442695, %v665_v21  ;;  %v1801_v48 = vpop.eup %1800  ;;  %v692_v19 = vmul.f32 1.442695, %v669_v3 }
 0x1a9   :  { %v921_v27 = vpack.c.bf16 %v1799_v22, %v1801_v48  ;;  %v704_v51 = vmul.f32 1.442695, %v675_v63 }
 0x1aa   :  { %1802 = vpow2.f32 %v684_v18  ;;  %752 = vadd.xlane.f32.xlu1 %v1799_v22 }
 0x1ab   :  { %1804 = vpow2.f32 %v694_v12  ;;  %1009 = vmatmul.bf16.vlgmr.msra.gmra.mxu1 %v921_v27 }
 0x1ac   :  { %750 = vadd.xlane.f32.xlu2 %v1801_v48  ;;  %1806 = vpow2.f32 %v692_v19 }
 0x1ad   :  { %v615_v49 = vpop.permute.xlu1 %614 }
 0x1ae   :  { %v668_v16 = vsub.f32 %v2132_v0, %v615_v49  ;;  %v655_v34 = vpop.permute.xlu2 %654  ;;  %v580_v49 = vmul.f32 1.442695, %v549_v13 }
 0x1af   :  { %v676_v7 = vsub.f32 %v2176_v38, %v655_v34 }
 0x1b0   :  { %v1803_v60 = vpop.eup %1802  ;;  %v690_v20 = vmul.f32 1.442695, %v668_v16 }
 0x1b1   :  { %748 = vadd.xlane.f32.xlu0 %v1803_v60  ;;  %v920_v25 = vpack.c.bf16 %v1803_v60, %v1797_v2  ;;  %v1805_v33 = vpop.eup %1804  ;;  %v706_v3 = vmul.f32 1.442695, %v676_v7 }
 0x1b2   :  { %v1807_v41 = vpop.eup %1806  ;;  %1808 = vpow2.f32 %v690_v20  ;;  %758 = vadd.xlane.f32.xlu1 %v1805_v33 }
 0x1b3   :  { %1004 = vmatmul.bf16.gmra.mxu0 %v920_v25  ;;  %1810 = vpow2.f32 %v704_v51  ;;  %v710_v51 = vld [vmem:[#allocation3] sm:$0xff] }
 0x1b4   :  { %756 = vadd.xlane.f32.xlu2 %v1807_v41 }
 0x1b5   :  { %v630_v39 = vpop.permute.xlu1 %629 }
 0x1b6   :  { %v671_v24 = vsub.f32 %v2148_v31, %v630_v39  ;;  %v645_v32 = vpop.permute.xlu0 %644  ;;  %v826_v60 = vpop.permute.xlu2 %825  ;;  %v712_v39 = vld [vmem:[#allocation3 + $0x10] sm:$0xff] }
 0x1b7   :  { %v674_v26 = vsub.f32 %v2162_v53, %v645_v32  ;;  %v711_v32 = vld [vmem:[#allocation3 + $0x8] sm:$0xff] }
 0x1b8   :  { %v696_v0 = vmul.f32 1.442695, %v671_v24  ;;  %v1809_v36 = vpop.eup %1808  ;;  %v726_v24 = vmul.f32 %v2325_v40, %v710_v51  ;;  %v807_v40 = vld [vmem:[#allocation4 + $0x30] sm:$0xff] }
 0x1b9   :  { %v702_v56 = vmul.f32 1.442695, %v674_v26  ;;  %754 = vadd.xlane.f32.xlu0 %v1809_v36  ;;  %v922_v52 = vpack.c.bf16 %v1807_v41, %v1809_v36  ;;  %v1811_v1 = vpop.eup %1810 }
 0x1ba   :  { %1812 = vpow2.f32 %v696_v0  ;;  %v728_v0 = vmul.f32 %v2311_v23, %v712_v39  ;;  %v716_v39 = vld [vmem:[#allocation3 + $0x30] sm:$0xff] }
 0x1bb   :  { %1814 = vpow2.f32 %v702_v56  ;;  %1014 = vmatmul.bf16.gmra.mxu1 %v922_v52  ;;  %v727_v52 = vmul.f32 %v2327_v44, %v711_v32 }
 0x1bd   :  { %v635_v55 = vpop.permute.xlu1 %634 }
 0x1be   :  { %v672_v37 = vsub.f32 %v2144_v29, %v635_v55  ;;  %v640_v42 = vpop.permute.xlu0 %639  ;;  %v2417_v62 = vpop.permute.xlu2 %840 }
 0x1bf   :  { %v673_v31 = vsub.f32 %v2170_v5, %v640_v42  ;;  %v715_v42 = vld [vmem:[#allocation3 + $0x28] sm:$0xff] }
 0x1c0   :  { %v1813_v8 = vpop.eup %1812  ;;  %v698_v2 = vmul.f32 1.442695, %v672_v37 }
 0x1c1   :  { %v1815_v53 = vpop.eup %1814  ;;  %v700_v30 = vmul.f32 1.442695, %v673_v31  ;;  %v923_v21 = vpack.c.bf16 %v1813_v8, %v1805_v33  ;;  %760 = vadd.xlane.f32.xlu0 %v1813_v8  ;;  %v731_v31 = vmul.f32 %v2343_v59, %v715_v42  ;;  %v808_v59 = vld [vmem:[#allocation4] sm:$0xff] }
 0x1c2   :  { %1816 = vpow2.f32 %v698_v2  ;;  %v925_v61 = vpack.c.bf16 %v1811_v1, %v1815_v53  ;;  %v903_v2 = vmul.f32 %v826_v60, %v807_v40 }
 0x1c3   :  { %1818 = vpow2.f32 %v700_v30  ;;  %1019 = vmatmul.bf16.vlgmr.msra.gmra.mxu2 %v923_v21  ;;  %v713_v21 = vld [vmem:[#allocation3 + $0x18] sm:$0xff] }
 0x1c4   :  { %1029 = vmatmul.bf16.vlgmr.msra.gmra.mxu3 %v925_v61  ;;  %1820 = vpow2.f32 %v706_v3  ;;  %v718_v3 = vld [vmem:[#allocation3 + $0x40] sm:$0xff] }
 0x1c5   :  { %v660_v22 = vpop.permute.xlu1 %659 }
 0x1c6   :  { %v677_v29 = vsub.f32 %v2172_v6, %v660_v22  ;;  %v576_v6 = vmul.f32 1.442695, %v547_v58  ;;  %v2415_v54 = vpop.permute.xlu0 %835  ;;  %v2421_v14 = vpop.permute.xlu2 %855  ;;  %v729_v22 = vmul.f32 %v2341_v43, %v713_v21 }
 0x1c8   :  { %v1817_v12 = vpop.eup %1816  ;;  %v708_v18 = vmul.f32 1.442695, %v677_v29  ;;  %v717_v29 = vld [vmem:[#allocation3 + $0x38] sm:$0xff] }
 0x1c9   :  { %v1819_v5 = vpop.eup %1818  ;;  %762 = vadd.xlane.f32.xlu2 %v1817_v12  ;;  %766 = vadd.xlane.f32.xlu0 %v1815_v53 }
 0x1ca   :  { %1822 = vpow2.f32 %v708_v18  ;;  %764 = vadd.xlane.f32.xlu1 %v1819_v5  ;;  %v1821_v38 = vpop.eup %1820  ;;  %v924_v19 = vpack.c.bf16 %v1819_v5, %v1817_v12  ;;  %v811_v18 = vld [vmem:[#allocation4 + $0x50] sm:$0xff] }
 0x1cb   :  { %1824 = vpow2.f32 %v576_v6 }
 0x1cc   :  { %1826 = vpow2.f32 %v580_v49 }
 0x1cd   :  { %1828 = vpow2.f32 %v578_v28  ;;  %v831_v58 = vpop.permute.xlu1 %830 }
 0x1ce   :  { %v846_v10 = vpop.permute.xlu0 %845  ;;  %v2427_v63 = vpop.permute.xlu2 %870 }
 0x1cf   :  { %v907_v49 = vmul.f32 %v846_v10, %v811_v18  ;;  %v723_v18 = vld [vmem:[#allocation3 + $0x68] sm:$0xff] }
 0x1d0   :  { %v1823_v48 = vpop.eup %1822 }
 0x1d1   :  { %768 = vadd.xlane.f32.xlu2 %v1811_v1  ;;  %v926_v27 = vpack.c.bf16 %v1823_v48, %v1821_v38  ;;  %772 = vadd.xlane.f32.xlu0 %v1823_v48  ;;  %v2406_v16 = vpop.eup %1824  ;;  %v714_v1 = vld [vmem:[#allocation3 + $0x20] sm:$0xff]  ;;  %v733_v48 = vmul.f32 %v2345_v47, %v717_v29  ;;  %v732_v47 = vmul.f32 %v2355_v9, %v716_v39  ;;  %v813_v9 = vld [vmem:[#allocation4 + $0x8] sm:$0xff] }
 0x1d2   :  { %770 = vadd.xlane.f32.xlu1 %v1821_v38  ;;  %v2409_v20 = vpop.eup %1826  ;;  %v730_v23 = vmul.f32 %v2329_v50, %v714_v1  ;;  %v734_v50 = vmul.f32 %v2357_v4, %v718_v3 }
 0x1d3   :  { %1024 = vmatmul.bf16.gmra.mxu2 %v924_v19  ;;  %v2412_v46 = vpop.eup %1828  ;;  %v904_v19 = vmul.f32 %v831_v58, %v808_v59  ;;  %v812_v58 = vld [vmem:[#allocation4 + $0x68] sm:$0xff] }
 0x1d4   :  { %1034 = vmatmul.bf16.gmra.mxu3 %v926_v27 }
 0x1d5   :  { %v2419_v13 = vpop.permute.xlu1 %850 }
 0x1d6   :  { %v2423_v17 = vpop.permute.xlu0 %860  ;;  %v2433_v41 = vpop.permute.xlu2 %885 }
 0x1dd   :  { %v2425_v35 = vpop.permute.xlu1 %865 }
 0x1de   :  { %v2429_v25 = vpop.permute.xlu0 %875 }
 0x1e5   :  { %890 = vperm.xlu0 %1762, %v2406_v16   ;;  %v2431_v33 = vpop.permute.xlu1 %880 }
 0x1e9   :  { %900 = vperm.xlu2 %1764, %v2409_v20  }
 0x1eb   :  { %895 = vperm.xlu1 %1763, %v2412_v46  }
 0x214   :  { %v743_v26 = vpop.xlane.xlu0 %742 }
 0x215   :  { %v774_v36 = vadd.f32 %v743_v26, %v726_v24  ;;  %v747_v56 = vpop.xlane.xlu1 %746  ;;  %v809_v24 = vld [vmem:[#allocation4 + $0x58] sm:$0xff] }
 0x216   :  { %v776_v55 = vadd.f32 %v747_v56, %v728_v0  ;;  %v905_v10 = vmul.f32 %v2415_v54, %v809_v24  ;;  %v908_v0 = vmul.f32 %v2419_v13, %v812_v58  ;;  %v909_v54 = vmul.f32 %v2421_v14, %v813_v9 }
 0x217   :  { %791 = vst.msk [vmem:[#allocation3] sm:$0xff] %vm128_vm0, %v774_v36  ;;  %v745_v34 = vpop.xlane.xlu2 %744 }
 0x218   :  { %v775_v37 = vadd.f32 %v745_v34, %v727_v52  ;;  %793 = vst.msk [vmem:[#allocation3 + $0x10] sm:$0xff] %vm128_vm0, %v776_v55  ;;  %v719_v55 = vld [vmem:[#allocation3 + $0x48] sm:$0xff] }
 0x219   :  { %v735_v42 = vmul.f32 %v2368_v11, %v719_v55 }
 0x21a   :  { %792 = vst.msk [vmem:[#allocation3 + $0x8] sm:$0xff] %vm128_vm0, %v775_v37  ;;  %v810_v37 = vld [vmem:[#allocation4 + $0x18] sm:$0xff] }
 0x21d   :  { %v753_v8 = vpop.xlane.xlu1 %752 }
 0x21e   :  { %v779_v53 = vadd.f32 %v753_v8, %v731_v31  ;;  %v906_v31 = vmul.f32 %v2417_v62, %v810_v37  ;;  %v720_v8 = vld [vmem:[#allocation3 + $0x50] sm:$0xff]  ;;  %v822_v37 = vld [vmem:[#allocation4 + $0x28] sm:$0xff] }
 0x21f   :  { %v751_v44 = vpop.xlane.xlu2 %750 }
 0x220   :  { %v778_v7 = vadd.f32 %v751_v44, %v730_v23  ;;  %v1000_v30 = vpop.f32.mrf.mxu0  ;;  %796 = vst.msk [vmem:[#allocation3 + $0x28] sm:$0xff] %vm128_vm0, %v779_v53  ;;  %v721_v53 = vld [vmem:[#allocation3 + $0x58] sm:$0xff]  ;;  %v722_v44 = vld [vmem:[#allocation3 + $0x60] sm:$0xff] }
 0x221   :  { %v1040_v61 = vadd.f32 %v1000_v30, %v903_v2  ;;  %v736_v30 = vmul.f32 %v2360_v45, %v720_v8  ;;  %v737_v21 = vmul.f32 %v2370_v15, %v721_v53  ;;  %v738_v62 = vmul.f32 %v2376_v57, %v722_v44  ;;  %v725_v15 = vld [vmem:[#allocation3 + $0x78] sm:$0xff] }
 0x222   :  { %795 = vst.msk [vmem:[#allocation3 + $0x20] sm:$0xff] %vm128_vm0, %v778_v7 }
 0x223   :  { %1056 = vst [vmem:[#allocation4 + $0x30] sm:$0xff] %v1040_v61  ;;  %v814_v61 = vld [vmem:[#allocation4 + $0x48] sm:$0xff] }
 0x224   :  { %v749_v12 = vpop.xlane.xlu0 %748 }
 0x225   :  { %v777_v5 = vadd.f32 %v749_v12, %v729_v22  ;;  %v759_v38 = vpop.xlane.xlu1 %758  ;;  %v910_v12 = vmul.f32 %v2423_v17, %v814_v61 }
 0x226   :  { %v782_v27 = vadd.f32 %v759_v38, %v734_v50  ;;  %v724_v50 = vld [vmem:[#allocation3 + $0x70] sm:$0xff]  ;;  %v819_v38 = vld [vmem:[#allocation4 + $0x60] sm:$0xff] }
 0x227   :  { %794 = vst.msk [vmem:[#allocation3 + $0x18] sm:$0xff] %vm128_vm0, %v777_v5  ;;  %v757_v6 = vpop.xlane.xlu2 %756  ;;  %v815_v5 = vld [vmem:[#allocation4 + $0x40] sm:$0xff] }
 0x228   :  { %v781_v28 = vadd.f32 %v757_v6, %v733_v48  ;;  %v1002_v60 = vpop.f32.mrf.mxu0  ;;  %799 = vst.msk [vmem:[#allocation3 + $0x40] sm:$0xff] %vm128_vm0, %v782_v27  ;;  %v1010_v51 = vpop.f32.mrf.mxu1  ;;  %v739_v48 = vmul.f32 %v2406_v16, %v723_v18  ;;  %v740_v27 = vmul.f32 %v2412_v46, %v724_v50  ;;  %v741_v6 = vmul.f32 %v2409_v20, %v725_v15  ;;  %v816_v20 = vld [vmem:[#allocation4 + $0x20] sm:$0xff] }
 0x229   :  { %v1041_v43 = vadd.f32 %v1002_v60, %v904_v19  ;;  %v1044_v4 = vadd.f32 %v1010_v51, %v907_v49  ;;  %v911_v17 = vmul.f32 %v2425_v35, %v815_v5  ;;  %v912_v46 = vmul.f32 %v2427_v63, %v816_v20 }
 0x22a   :  { %798 = vst.msk [vmem:[#allocation3 + $0x38] sm:$0xff] %vm128_vm0, %v781_v28 }
 0x22b   :  { %1057 = vst [vmem:[#allocation4] sm:$0xff] %v1041_v43  ;;  %v915_v43 = vmul.f32 %v2433_v41, %v819_v38 }
 0x22c   :  { %1060 = vst [vmem:[#allocation4 + $0x50] sm:$0xff] %v1044_v4  ;;  %v755_v32 = vpop.xlane.xlu0 %754 }
 0x22d   :  { %v780_v26 = vadd.f32 %v755_v32, %v732_v47  ;;  %v817_v32 = vld [vmem:[#allocation4 + $0x10] sm:$0xff] }
 0x22f   :  { %797 = vst.msk [vmem:[#allocation3 + $0x30] sm:$0xff] %vm128_vm0, %v780_v26  ;;  %v913_v26 = vmul.f32 %v2429_v25, %v817_v32 }
 0x230   :  { %v1005_v36 = vpop.f32.mrf.mxu0  ;;  %v1012_v52 = vpop.f32.mrf.mxu1 }
 0x231   :  { %v1042_v56 = vadd.f32 %v1005_v36, %v905_v10  ;;  %v1045_v34 = vadd.f32 %v1012_v52, %v908_v0  ;;  %v820_v0 = vld [vmem:[#allocation4 + $0x70] sm:$0xff] }
 0x233   :  { %1058 = vst [vmem:[#allocation4 + $0x58] sm:$0xff] %v1042_v56 }
 0x234   :  { %1061 = vst [vmem:[#allocation4 + $0x68] sm:$0xff] %v1045_v34  ;;  %v761_v1 = vpop.xlane.xlu0 %760  ;;  %v818_v34 = vld [vmem:[#allocation4 + $0x38] sm:$0xff] }
 0x235   :  { %v783_v40 = vadd.f32 %v761_v1, %v735_v42  ;;  %v821_v1 = vld [vmem:[#allocation4 + $0x78] sm:$0xff]  ;;  %v914_v63 = vmul.f32 %v2431_v33, %v818_v34 }
 0x237   :  { %800 = vst.msk [vmem:[#allocation3 + $0x48] sm:$0xff] %vm128_vm0, %v783_v40 }
 0x238   :  { %v1007_v13 = vpop.f32.mrf.mxu0  ;;  %v1015_v2 = vpop.f32.mrf.mxu1 }
 0x239   :  { %v1043_v23 = vadd.f32 %v1007_v13, %v906_v31  ;;  %v1046_v7 = vadd.f32 %v1015_v2, %v909_v54 }
 0x23b   :  { %1059 = vst [vmem:[#allocation4 + $0x18] sm:$0xff] %v1043_v23 }
 0x23c   :  { %1062 = vst [vmem:[#allocation4 + $0x8] sm:$0xff] %v1046_v7  ;;  %v763_v11 = vpop.xlane.xlu2 %762  ;;  %v767_v22 = vpop.xlane.xlu0 %766 }
 0x23d   :  { %v784_v14 = vadd.f32 %v763_v11, %v736_v30  ;;  %v765_v3 = vpop.xlane.xlu1 %764  ;;  %v786_v59 = vadd.f32 %v767_v22, %v738_v62 }
 0x23e   :  { %v785_v29 = vadd.f32 %v765_v3, %v737_v21 }
 0x23f   :  { %801 = vst.msk [vmem:[#allocation3 + $0x50] sm:$0xff] %vm128_vm0, %v784_v14 }
 0x240   :  { %802 = vst.msk [vmem:[#allocation3 + $0x58] sm:$0xff] %vm128_vm0, %v785_v29  ;;  %v1017_v45 = vpop.f32.mrf.mxu1 }
 0x241   :  { %803 = vst.msk [vmem:[#allocation3 + $0x60] sm:$0xff] %vm128_vm0, %v786_v59  ;;  %v1047_v57 = vadd.f32 %v1017_v45, %v910_v12 }
 0x243   :  { %1063 = vst [vmem:[#allocation4 + $0x48] sm:$0xff] %v1047_v57 }
 0x244   :  { %v769_v19 = vpop.xlane.xlu2 %768  ;;  %v773_v60 = vpop.xlane.xlu0 %772 }
 0x245   :  { %v787_v49 = vadd.f32 %v769_v19, %v739_v48  ;;  %v771_v28 = vpop.xlane.xlu1 %770  ;;  %v789_v39 = vadd.f32 %v773_v60, %v741_v6 }
 0x246   :  { %v788_v51 = vadd.f32 %v771_v28, %v740_v27  ;;  %v1020_v4 = vpop.f32.mrf.mxu2 }
 0x247   :  { %804 = vst.msk [vmem:[#allocation3 + $0x68] sm:$0xff] %vm128_vm0, %v787_v49  ;;  %v1048_v24 = vadd.f32 %v1020_v4, %v911_v17  ;;  %v1030_v16 = vpop.f32.mrf.mxu3 }
 0x248   :  { %805 = vst.msk [vmem:[#allocation3 + $0x70] sm:$0xff] %vm128_vm0, %v788_v51  ;;  %v1052_v47 = vadd.f32 %v1030_v16, %v915_v43 }
 0x249   :  { %806 = vst.msk [vmem:[#allocation3 + $0x78] sm:$0xff] %vm128_vm0, %v789_v39 }
 0x24a   :  { %1064 = vst [vmem:[#allocation4 + $0x40] sm:$0xff] %v1048_v24 }
 0x24b   :  { %1068 = vst [vmem:[#allocation4 + $0x60] sm:$0xff] %v1052_v47 }
 0x24c   :  { %v901_v42 = vpop.permute.xlu2 %900 }
 0x24d   :  { %v918_v31 = vmul.f32 %v901_v42, %v822_v37 }
 0x24e   :  { %v1022_v35 = vpop.f32.mrf.mxu2 }
 0x24f   :  { %v1049_v58 = vadd.f32 %v1022_v35, %v912_v46  ;;  %v1032_v41 = vpop.f32.mrf.mxu3 }
 0x251   :  { %1065 = vst [vmem:[#allocation4 + $0x20] sm:$0xff] %v1049_v58 }
 0x256   :  { %v1025_v10 = vpop.f32.mrf.mxu2 }
 0x257   :  { %v1050_v36 = vadd.f32 %v1025_v10, %v913_v26  ;;  %v1035_v56 = vpop.f32.mrf.mxu3  ;;  %v891_v52 = vpop.permute.xlu0 %890 }
 0x258   :  { %v916_v55 = vmul.f32 %v891_v52, %v820_v0 }
 0x259   :  { %1066 = vst [vmem:[#allocation4 + $0x10] sm:$0xff] %v1050_v36 }
 0x25a   :  { %v1053_v9 = vadd.f32 %v1032_v41, %v916_v55 }
 0x25c   :  { %1069 = vst [vmem:[#allocation4 + $0x70] sm:$0xff] %v1053_v9 }
 0x25d   :  { %v896_v40 = vpop.permute.xlu1 %895 }
 0x25e   :  { %v917_v54 = vmul.f32 %v896_v40, %v821_v1  ;;  %v1027_v13 = vpop.f32.mrf.mxu2 }
 0x25f   :  { %v1051_v25 = vadd.f32 %v1027_v13, %v914_v63  ;;  %v1037_v8 = vpop.f32.mrf.mxu3 }
 0x260   :  { %v1054_v23 = vadd.f32 %v1035_v56, %v917_v54  ;;  %v1055_v2 = vadd.f32 %v1037_v8, %v918_v31 }
 0x261   :  { %1067 = vst [vmem:[#allocation4 + $0x38] sm:$0xff] %v1051_v25 }
 0x262   :  { %1070 = vst [vmem:[#allocation4 + $0x78] sm:$0xff] %v1054_v23 }
 0x263   :  { %1071 = vst [vmem:[#allocation4 + $0x28] sm:$0xff] %v1055_v2 }
 0x264 PF:  { %v1095_v53 = vld [vmem:[#allocation3 + $0x20] sm:$0xff]  ;;  %v2477_v44 = vld [vmem:[#allocation3 + $0x10] sm:$0xff]  ;;  %v1901_v30 = vmov 0   ;;  %v2482_v21 = vld [vmem:[#allocation3 + $0x28] sm:$0xff] }
 0x265   :  { %v2479_v7 = vld [vmem:[#allocation3] sm:$0xff]  ;;  %1832 = vset.pattern.permute.xlu2 %v1901_v30  ;;  %1831 = vset.pattern.permute.xlu1 %v1901_v30  ;;  %1834 = vrcp.f32 %v1095_v53  ;;  %v1172_v33 = vand.u32 2147483647, %v1095_v53  ;;  %v1174_v11 = vand.u32 2147483648, %v1095_v53  ;;  %v1144_v62 = vand.u32 2147483647, %v2477_v44 }
 0x266   :  { %1830 = vset.pattern.permute.xlu0 %v1901_v30  ;;  %1836 = vrcp.f32 %v2477_v44  ;;  %v1146_v61 = vand.u32 2147483648, %v2477_v44  ;;  %v2487_v14 = vld [vmem:[#allocation3 + $0x18] sm:$0xff]  ;;  %vm1168_vm0 = vweird.f32 %v1095_v53  ;;  %v1116_v3 = vand.u32 2147483647, %v2479_v7  ;;  %v2494_v59 = vld [vmem:[#allocation3 + $0x8] sm:$0xff]  ;;  %v2515_v6 = vld [vmem:[#allocation3 + $0x40] sm:$0xff] }
 0x267   :  { %1838 = vrcp.f32 %v2479_v7  ;;  %vm1140_vm7 = vweird.f32 %v2477_v44  ;;  %v1118_v22 = vand.u32 2147483648, %v2479_v7  ;;  %v1188_v29 = vand.u32 2147483648, %v2482_v21  ;;  %v2615_v12 = vld [vmem:[#allocation3 + $0x30] sm:$0xff] }
 0x268   :  { %1840 = vrcp.f32 %v2482_v21  ;;  %vm2496_vm8 = vcmp.eq.f32.partialorder %v1172_v33, 8.507059e+37  ;;  %v1175_v18 = vor.u32 1.1754944e-38, %v1174_v11  ;;  %vm1112_vm9 = vweird.f32 %v2479_v7  ;;  %v2598_v11 = vld [vmem:[#allocation3 + $0x38] sm:$0xff] }
 0x269   :  { %1842 = vrcp.f32 %v2487_v14  ;;  %vm2502_vm10 = vcmp.eq.f32.partialorder %v1144_v62, 8.507059e+37  ;;  %v1147_v15 = vor.u32 1.1754944e-38, %v1146_v61  ;;  %vm1182_vm11 = vweird.f32 %v2482_v21 }
 0x26a   :  { %v1186_v5 = vand.u32 2147483647, %v2482_v21  ;;  %v1160_v57 = vand.u32 2147483648, %v2487_v14  ;;  %vm2509_vm12 = vcmp.eq.f32.partialorder %v1116_v3, 8.507059e+37  ;;  %v1158_v27 = vand.u32 2147483647, %v2487_v14 }
 0x26b   :  { %v1835_v45 = vpop.eup %1834  ;;  %1844 = vrcp.f32 %v2494_v59  ;;  %v1119_v28 = vor.u32 1.1754944e-38, %v1118_v22  ;;  %v2518_v60 = vor.u32 1.1754944e-38, %v1188_v29  ;;  %vm1154_vm13 = vweird.f32 %v2487_v14 }
 0x26c   :  { %v1837_v38 = vpop.eup %1836  ;;  %v1164_v48 = vmul.f32 %v1835_v45, %v1095_v53  ;;  %vm1169_vm14 = vweird.f32 %v1835_v45  ;;  %v2525_v24 = vor.u32 1.1754944e-38, %v1160_v57  ;;  %1846 = vrcp.f32 %v2515_v6 }
 0x26d   :  { %v1839_v17 = vpop.eup %1838  ;;  %v1136_v49 = vmul.f32 %v1837_v38, %v2477_v44  ;;  %vm1141_vm1 = vweird.f32 %v1837_v38  ;;  %vm2532_vm3 = vcmp.eq.f32.partialorder %v1186_v5, 8.507059e+37  ;;  %vm2536_vm4 = vcmp.eq.f32.partialorder %v1158_v27, 8.507059e+37  ;;  %vm2542_vm5 = vmor %vm1168_vm0, %vm1169_vm14  ;;  %v2624_v5 = vld [vmem:[#allocation3 + $0x58] sm:$0xff] }
 0x26e   :  { %v1165_v43 = vsub.f32 1.0, %v1164_v48  ;;  %v1108_v51 = vmul.f32 %v1839_v17, %v2479_v7  ;;  %v2523_v39 = vpop.eup %1840  ;;  %vm1113_vm2 = vweird.f32 %v1839_v17  ;;  %v1130_v10 = vand.u32 2147483647, %v2494_v59  ;;  %vm2553_vm6 = vmor %vm1140_vm7, %vm1141_vm1 }
 0x26f   :  { %v1137_v4 = vsub.f32 1.0, %v1136_v49  ;;  %v2528_v16 = vpop.eup %1842  ;;  %v1178_v46 = vmul.f32 %v2523_v39, %v2482_v21  ;;  %v1132_v0 = vand.u32 2147483648, %v2494_v59  ;;  %vm1183_vm0 = vweird.f32 %v2523_v39  ;;  %vm2561_vm14 = vmor %vm1112_vm9, %vm1113_vm2 }
 0x270   :  { %v1166_v47 = vmul.f32 %v1835_v45, %v1165_v43  ;;  %v1109_v20 = vsub.f32 1.0, %v1108_v51  ;;  %v1150_v26 = vmul.f32 %v2528_v16, %v2487_v14  ;;  %vm1155_vm15 = vweird.f32 %v2528_v16  ;;  %vm2578_vm9 = vmor %vm1182_vm11, %vm1183_vm0 }
 0x271   :  { %v1138_v32 = vmul.f32 %v1837_v38, %v1137_v4  ;;  %v1845_v36 = vpop.eup %1844  ;;  %v1179_v34 = vsub.f32 1.0, %v1178_v46  ;;  %vm2863_vm11 = vweird.f32 %v2494_v59  ;;  %v1133_v22 = vor.u32 1.1754944e-38, %v1132_v0 }
 0x272   :  { %v1167_v56 = vadd.f32 %v1835_v45, %v1166_v47  ;;  %v1110_v55 = vmul.f32 %v1839_v17, %v1109_v20  ;;  %v1151_v9 = vsub.f32 1.0, %v1150_v26  ;;  %v1122_v1 = vmul.f32 %v1845_v36, %v2494_v59  ;;  %v2570_v54 = vpop.eup %1846 }
 0x273   :  { %v1139_v37 = vadd.f32 %v1837_v38, %v1138_v32  ;;  %v1180_v31 = vmul.f32 %v2523_v39, %v1179_v34  ;;  %vm1127_vm7 = vweird.f32 %v1845_v36  ;;  %v1220_v33 = vmul.f32 %v2570_v54, %v2515_v6 }
 0x274   :  { %v1171_v63 = vsel %vm2542_vm5, %v1835_v45, %v1167_v56  ;;  %v1111_v40 = vadd.f32 %v1839_v17, %v1110_v55  ;;  %v1152_v23 = vmul.f32 %v2528_v16, %v1151_v9  ;;  %v1123_v2 = vsub.f32 1.0, %v1122_v1  ;;  %v2675_v56 = vld [vmem:[#allocation3 + $0x70] sm:$0xff] }
 0x275   :  { %v1176_v13 = vsel %vm2496_vm8, %v1175_v18, %v1171_v63  ;;  %v1143_v25 = vsel %vm2553_vm6, %v1837_v38, %v1139_v37  ;;  %v1181_v7 = vadd.f32 %v2523_v39, %v1180_v31  ;;  %vm2592_vm8 = vmor %vm1154_vm13, %vm1155_vm15  ;;  %v1221_v29 = vsub.f32 1.0, %v1220_v33  ;;  %v2681_v63 = vld [vmem:[#allocation3 + $0x68] sm:$0xff] }
 0x276   :  { %1369 = vperm.xlu2 %1832, %v1176_v13   ;;  %v1148_v53 = vsel %vm2502_vm10, %v1147_v15, %v1143_v25  ;;  %v1115_v44 = vsel %vm2561_vm14, %v1839_v17, %v1111_v40  ;;  %v1153_v62 = vadd.f32 %v2528_v16, %v1152_v23  ;;  %v1124_v61 = vmul.f32 %v1845_v36, %v1123_v2  ;;  %vm2610_vm13 = vmor %vm2863_vm11, %vm1127_vm7 }
 0x277   :  { %1359 = vperm.xlu1 %1831, %v1148_v53   ;;  %v1120_v21 = vsel %vm2509_vm12, %v1119_v28, %v1115_v44  ;;  %vm1224_vm10 = vweird.f32 %v2515_v6  ;;  %v1185_v14 = vsel %vm2578_vm9, %v2523_v39, %v1181_v7  ;;  %vm1225_vm12 = vweird.f32 %v2570_v54 }
 0x278   :  { %1349 = vperm.xlu0 %1830, %v1120_v21   ;;  %v1157_v18 = vsel %vm2592_vm8, %v2528_v16, %v1153_v62  ;;  %v1125_v45 = vadd.f32 %v1845_v36, %v1124_v61  ;;  %v1230_v50 = vand.u32 2147483648, %v2515_v6  ;;  %1848 = vrcp.f32 %v2598_v11  ;;  %vm2636_vm1 = vmor %vm1224_vm10, %vm1225_vm12  ;;  %v1335_v61 = vld [vmem:[#allocation4 + $0x50] sm:$0xff] }
 0x279   :  { %vm1131_vm15 = vcmp.eq.f32.partialorder %v1130_v10, 8.507059e+37  ;;  %v1222_v59 = vmul.f32 %v2570_v54, %v1221_v29  ;;  %v1228_v15 = vand.u32 2147483647, %v2515_v6  ;;  %v1190_v57 = vsel %vm2532_vm3, %v2518_v60, %v1185_v14  ;;  %v2645_v60 = vld [vmem:[#allocation3 + $0x50] sm:$0xff] }
 0x27a   :  { %v1162_v38 = vsel %vm2536_vm4, %v2525_v24, %v1157_v18  ;;  %v1129_v48 = vsel %vm2610_vm13, %v1845_v36, %v1125_v45  ;;  %1850 = vrcp.f32 %v2615_v12  ;;  %v1214_v17 = vand.u32 2147483647, %v2598_v11  ;;  %v2653_v24 = vld [vmem:[#allocation3 + $0x48] sm:$0xff] }
 0x27b   :  { %v1223_v27 = vadd.f32 %v2570_v54, %v1222_v59  ;;  %v1216_v49 = vand.u32 2147483648, %v2598_v11  ;;  %v1200_v28 = vand.u32 2147483647, %v2615_v12  ;;  %v1134_v43 = vsel %vm1131_vm15, %v1133_v22, %v1129_v48 }
 0x27c   :  { %v1231_v51 = vor.u32 1.1754944e-38, %v1230_v50  ;;  %v1202_v6 = vand.u32 2147483648, %v2615_v12  ;;  %1852 = vrcp.f32 %v2624_v5  ;;  %vm1229_vm2 = vcmp.eq.f32.partialorder %v1228_v15, 8.507059e+37 }
 0x27d   :  { %v1227_v39 = vsel %vm2636_vm1, %v2570_v54, %v1223_v27  ;;  %v1270_v4 = vand.u32 2147483647, %v2624_v5  ;;  %vm1210_vm3 = vweird.f32 %v2598_v11  ;;  %vm1196_vm4 = vweird.f32 %v2615_v12  ;;  %v1103_v27 = vld [vmem:[#allocation3 + $0x60] sm:$0xff] }
 0x27e   :  { %1374 = vperm.xlu2 %1832, %v1190_v57   ;;  %v1849_v16 = vpop.eup %1848  ;;  %v1272_v47 = vand.u32 2147483648, %v2624_v5  ;;  %1854 = vrcp.f32 %v2645_v60  ;;  %vm2660_vm5 = vcmp.eq.f32.partialorder %v1214_v17, 8.507059e+37  ;;  %v1217_v35 = vor.u32 1.1754944e-38, %v1216_v49 }
 0x27f   :  { %1364 = vperm.xlu1 %1831, %v1162_v38   ;;  %v1206_v20 = vmul.f32 %v1849_v16, %v2598_v11  ;;  %vm2664_vm6 = vcmp.eq.f32.partialorder %v1200_v28, 8.507059e+37  ;;  %v1232_v32 = vsel %vm1229_vm2, %v1231_v51, %v1227_v39  ;;  %v1203_v26 = vor.u32 1.1754944e-38, %v1202_v6 }
 0x280   :  { %1354 = vperm.xlu0 %1830, %v1134_v43   ;;  %v1851_v41 = vpop.eup %1850  ;;  %vm1266_vm0 = vweird.f32 %v2624_v5  ;;  %1856 = vrcp.f32 %v2653_v24  ;;  %vm1211_vm14 = vweird.f32 %v1849_v16  ;;  %vm2671_vm7 = vcmp.eq.f32.partialorder %v1270_v4, 8.507059e+37  ;;  %v1106_v4 = vld [vmem:[#allocation3 + $0x78] sm:$0xff] }
 0x281   :  { %v1207_v10 = vsub.f32 1.0, %v1206_v20  ;;  %v1192_v0 = vmul.f32 %v1851_v41, %v2615_v12  ;;  %v1273_v55 = vor.u32 1.1754944e-38, %v1272_v47  ;;  %vm1252_vm9 = vweird.f32 %v2645_v60  ;;  %vm2686_vm10 = vmor %vm1210_vm3, %vm1211_vm14 }
 0x282   :  { %v1853_v52 = vpop.eup %1852  ;;  %v1256_v34 = vand.u32 2147483647, %v2645_v60  ;;  %v1258_v37 = vand.u32 2147483648, %v2645_v60  ;;  %vm1197_vm8 = vweird.f32 %v1851_v41  ;;  %v1242_v54 = vand.u32 2147483647, %v2653_v24 }
 0x283   :  { %v1208_v42 = vmul.f32 %v1849_v16, %v1207_v10  ;;  %v1193_v9 = vsub.f32 1.0, %v1192_v0  ;;  %v1262_v1 = vmul.f32 %v1853_v52, %v2624_v5  ;;  %vm1267_vm11 = vweird.f32 %v1853_v52  ;;  %vm2697_vm13 = vmor %vm1196_vm4, %vm1197_vm8 }
 0x284   :  { %v1855_v40 = vpop.eup %1854  ;;  %v1244_v13 = vand.u32 2147483648, %v2653_v24  ;;  %1858 = vrcp.f32 %v2675_v56  ;;  %vm2701_vm15 = vcmp.eq.f32.partialorder %v1256_v34, 8.507059e+37  ;;  %vm1238_vm1 = vweird.f32 %v2653_v24  ;;  %vm2714_vm2 = vmor %vm1266_vm0, %vm1267_vm11 }
 0x285   :  { %v1209_v25 = vadd.f32 %v1849_v16, %v1208_v42  ;;  %v1194_v8 = vmul.f32 %v1851_v41, %v1193_v9  ;;  %v1263_v23 = vsub.f32 1.0, %v1262_v1  ;;  %v1248_v2 = vmul.f32 %v1855_v40, %v2645_v60 }
 0x286   :  { %1389 = vperm.xlu2 %1832, %v1232_v32   ;;  %v1857_v53 = vpop.eup %1856  ;;  %vm1253_vm12 = vweird.f32 %v1855_v40  ;;  %1860 = vrcp.f32 %v2681_v63  ;;  %v1259_v14 = vor.u32 1.1754944e-38, %v1258_v37  ;;  %vm2719_vm3 = vcmp.eq.f32.partialorder %v1242_v54, 8.507059e+37 }
 0x287   :  { %v1213_v30 = vsel %vm2686_vm10, %v1849_v16, %v1209_v25  ;;  %v1195_v33 = vadd.f32 %v1851_v41, %v1194_v8  ;;  %v1264_v11 = vmul.f32 %v1853_v52, %v1263_v23  ;;  %v1249_v21 = vsub.f32 1.0, %v1248_v2  ;;  %vm2730_vm4 = vmor %vm1252_vm9, %vm1253_vm12 }
 0x288   :  { %v1218_v62 = vsel %vm2660_vm5, %v1217_v35, %v1213_v30  ;;  %v1234_v3 = vmul.f32 %v1857_v53, %v2653_v24  ;;  %v1245_v45 = vor.u32 1.1754944e-38, %v1244_v13  ;;  %vm1239_vm5 = vweird.f32 %v1857_v53 }
 0x289   :  { %1384 = vperm.xlu1 %1831, %v1218_v62   ;;  %v1199_v29 = vsel %vm2697_vm13, %v1851_v41, %v1195_v33  ;;  %v1265_v12 = vadd.f32 %v1853_v52, %v1264_v11  ;;  %v1250_v18 = vmul.f32 %v1855_v40, %v1249_v21  ;;  %vm1308_vm0 = vweird.f32 %v2675_v56  ;;  %vm2748_vm14 = vmor %vm1238_vm1, %vm1239_vm5  ;;  %v1334_v41 = vld [vmem:[#allocation4 + $0x18] sm:$0xff] }
 0x28a   :  { %v1859_v50 = vpop.eup %1858  ;;  %v1204_v59 = vsel %vm2664_vm6, %v1203_v26, %v1199_v29  ;;  %v1235_v5 = vsub.f32 1.0, %v1234_v3  ;;  %v1312_v19 = vand.u32 2147483647, %v2675_v56  ;;  %v1314_v60 = vand.u32 2147483648, %v2675_v56 }
 0x28b   :  { %1379 = vperm.xlu0 %1830, %v1204_v59   ;;  %v1269_v57 = vsel %vm2714_vm2, %v1853_v52, %v1265_v12  ;;  %v1251_v38 = vadd.f32 %v1855_v40, %v1250_v18  ;;  %v1304_v48 = vmul.f32 %v1859_v50, %v2675_v56  ;;  %vm1294_vm6 = vweird.f32 %v2681_v63  ;;  %v1336_v18 = vld [vmem:[#allocation4 + $0x68] sm:$0xff] }
 0x28c   :  { %v1861_v17 = vpop.eup %1860  ;;  %v1274_v49 = vsel %vm2671_vm7, %v1273_v55, %v1269_v57  ;;  %v1236_v28 = vmul.f32 %v1857_v53, %v1235_v5  ;;  %vm1309_vm9 = vweird.f32 %v1859_v50  ;;  %v1300_v20 = vand.u32 2147483648, %v2681_v63 }
 0x28d   :  { %v1255_v43 = vsel %vm2730_vm4, %v1855_v40, %v1251_v38  ;;  %v1305_v6 = vsub.f32 1.0, %v1304_v48  ;;  %v1290_v39 = vmul.f32 %v1861_v17, %v2681_v63  ;;  %1862 = vrcp.f32 %v1103_v27  ;;  %vm2761_vm8 = vmor %vm1308_vm0, %vm1309_vm9 }
 0x28e   :  { %1404 = vperm.xlu2 %1832, %v1274_v49   ;;  %v1260_v16 = vsel %vm2701_vm15, %v1259_v14, %v1255_v43  ;;  %v1237_v47 = vadd.f32 %v1857_v53, %v1236_v28  ;;  %vm1295_vm7 = vweird.f32 %v1861_v17  ;;  %v1298_v24 = vand.u32 2147483647, %v2681_v63  ;;  %v2774_v14 = vld [vmem:[%s2834_s4] ss:$0 sm:$0xff]  ;;  %v1331_v28 = vld [vmem:[#allocation4 + $0x30] sm:$0xff] }
 0x28f   :  { %v1306_v46 = vmul.f32 %v1859_v50, %v1305_v6  ;;  %v1291_v35 = vsub.f32 1.0, %v1290_v39  ;;  %v1315_v32 = vor.u32 1.1754944e-38, %v1314_v60  ;;  %1864 = vrcp.f32 %v1106_v4  ;;  %vm1296_vm11 = vmor %vm1294_vm6, %vm1295_vm7 }
 0x290   :  { %v1241_v58 = vsel %vm2748_vm14, %v1857_v53, %v1237_v47  ;;  %vm1313_vm10 = vcmp.eq.f32.partialorder %v1312_v19, 8.507059e+37  ;;  %v1301_v36 = vor.u32 1.1754944e-38, %v1300_v20  ;;  %vm1299_vm13 = vcmp.eq.f32.partialorder %v1298_v24, 8.507059e+37 }
 0x291   :  { %1399 = vperm.xlu1 %1831, %v1260_v16   ;;  %v1246_v26 = vsel %vm2719_vm3, %v1245_v45, %v1241_v58  ;;  %v1307_v10 = vadd.f32 %v1859_v50, %v1306_v46  ;;  %v1292_v0 = vmul.f32 %v1861_v17, %v1291_v35  ;;  %vm1280_vm12 = vweird.f32 %v1103_v27 }
 0x292   :  { %v1286_v40 = vand.u32 2147483648, %v1103_v27  ;;  %v1284_v63 = vand.u32 2147483647, %v1103_v27  ;;  %vm1322_vm2 = vweird.f32 %v1106_v4  ;;  %v1328_v53 = vand.u32 2147483648, %v1106_v4 }
 0x293   :  { %1394 = vperm.xlu0 %1830, %v1246_v26   ;;  %v1311_v56 = vsel %vm2761_vm8, %v1859_v50, %v1307_v10  ;;  %v1293_v52 = vadd.f32 %v1861_v17, %v1292_v0  ;;  %v1863_v55 = vpop.eup %1862  ;;  %v1326_v30 = vand.u32 2147483647, %v1106_v4 }
 0x294   :  { %v1316_v34 = vsel %vm1313_vm10, %v1315_v32, %v1311_v56  ;;  %v1276_v42 = vmul.f32 %v1863_v55, %v1103_v27  ;;  %vm1281_vm15 = vweird.f32 %v1863_v55  ;;  %v1287_v8 = vor.u32 1.1754944e-38, %v1286_v40  ;;  %v1332_v32 = vld [vmem:[#allocation4] sm:$0xff] }
 0x295   :  { %v1297_v37 = vsel %vm1296_vm11, %v1861_v17, %v1293_v52  ;;  %v1865_v9 = vpop.eup %1864  ;;  %vm1282_vm1 = vmor %vm1280_vm12, %vm1281_vm15  ;;  %vm1285_vm3 = vcmp.eq.f32.partialorder %v1284_v63, 8.507059e+37  ;;  %v1329_v11 = vor.u32 1.1754944e-38, %v1328_v53  ;;  %vm1327_vm0 = vcmp.eq.f32.partialorder %v1326_v30, 8.507059e+37  ;;  %v1333_v17 = vld [vmem:[#allocation4 + $0x58] sm:$0xff]  ;;  %v1337_v53 = vld [vmem:[#allocation4 + $0x8] sm:$0xff] }
 0x296   :  { %1419 = vperm.xlu2 %1832, %v1316_v34   ;;  %v1302_v1 = vsel %vm1299_vm13, %v1301_v36, %v1297_v37  ;;  %v1277_v31 = vsub.f32 1.0, %v1276_v42  ;;  %v1318_v54 = vmul.f32 %v1865_v9, %v1106_v4  ;;  %vm1323_vm4 = vweird.f32 %v1865_v9  ;;  %v1342_v36 = vld [vmem:[#allocation4 + $0x38] sm:$0xff]  ;;  %v1339_v34 = vld [vmem:[#allocation4 + $0x40] sm:$0xff] }
 0x297   :  { %vm1324_vm5 = vmor %vm1322_vm2, %vm1323_vm4 }
 0x298   :  { %v1278_v13 = vmul.f32 %v1863_v55, %v1277_v31  ;;  %v1319_v25 = vsub.f32 1.0, %v1318_v54 }
 0x299   :  { %1414 = vperm.xlu1 %1831, %v1302_v1  }
 0x29a   :  { %v1279_v23 = vadd.f32 %v1863_v55, %v1278_v13  ;;  %v1320_v2 = vmul.f32 %v1865_v9, %v1319_v25 }
 0x29c   :  { %v1283_v44 = vsel %vm1282_vm1, %v1863_v55, %v1279_v23  ;;  %v1321_v7 = vadd.f32 %v1865_v9, %v1320_v2 }
 0x29d   :  { %v1288_v33 = vsel %vm1285_vm3, %v1287_v8, %v1283_v44  ;;  %v1338_v8 = vld [vmem:[#allocation4 + $0x48] sm:$0xff] }
 0x29e   :  { %1409 = vperm.xlu0 %1830, %v1288_v33   ;;  %v1325_v21 = vsel %vm1324_vm5, %v1865_v9, %v1321_v7 }
 0x29f   :  { %v1330_v62 = vsel %vm1327_vm0, %v1329_v11, %v1325_v21 }
 0x2a6   :  { %1424 = vperm.xlu0 %1830, %v1330_v62  }
 0x2d0   :  { %v1370_v3 = vpop.permute.xlu2 %1369 }
 0x2d1   :  { %v1431_v22 = vmul.f32 %v1370_v3, %v1335_v61 }
 0x2d3   :  { %v1451_v29 = vadd.f32 %v2774_v14, %v1431_v22 }
 0x2d5   :  { %v1487_v12 = vmul.f32 1.442695, %v1451_v29  ;;  %vm1467_vm6 = vcmp.gt.f32.partialorder %v1451_v29, 0.0 }
 0x2d7   :  { %1866 = vpow2.f32 %v1487_v12 }
 0x2d8   :  { %v1375_v45 = vpop.permute.xlu2 %1374 }
 0x2d9   :  { %v1432_v50 = vmul.f32 %v1375_v45, %v1336_v18 }
 0x2db   :  { %v1452_v59 = vadd.f32 %v2774_v14, %v1432_v50 }
 0x2dd   :  { %v1867_v15 = vpop.eup %1866  ;;  %v1489_v5 = vmul.f32 1.442695, %v1452_v59  ;;  %vm1468_vm14 = vcmp.gt.f32.partialorder %v1452_v59, 0.0 }
 0x2de   :  { %v1667_v57 = vadd.f32 -1.0, %v1867_v15 }
 0x2df   :  { %1868 = vpow2.f32 %v1489_v5 }
 0x2e0   :  { %v1531_v38 = vmul.f32 1.6732632, %v1667_v57  ;;  %v1390_v43 = vpop.permute.xlu2 %1389  ;;  %v1341_v57 = vld [vmem:[#allocation4 + $0x10] sm:$0xff] }
 0x2e1   :  { %v1435_v63 = vmul.f32 %v1390_v43, %v1339_v34 }
 0x2e2   :  { %v1547_v19 = vsel %vm1467_vm6, %v1451_v29, %v1531_v38 }
 0x2e3   :  { %v1563_v60 = vmul.f32 1.050701, %v1547_v19  ;;  %v2789_v23 = vadd.f32 %v2774_v14, %v1435_v63 }
 0x2e5   :  { %v1869_v48 = vpop.eup %1868  ;;  %v1495_v29 = vmul.f32 1.442695, %v2789_v23  ;;  %vm1471_vm15 = vcmp.gt.f32.partialorder %v2789_v23, 0.0 }
 0x2e6   :  { %v1668_v27 = vadd.f32 -1.0, %v1869_v48  ;;  %v1340_v48 = vld [vmem:[#allocation4 + $0x20] sm:$0xff] }
 0x2e8   :  { %v1532_v49 = vmul.f32 1.6732632, %v1668_v27  ;;  %v1405_v56 = vpop.permute.xlu2 %1404 }
 0x2e9   :  { %v1360_v51 = vpop.permute.xlu1 %1359  ;;  %v1438_v9 = vmul.f32 %v1405_v56, %v1342_v36 }
 0x2ea   :  { %v1548_v6 = vsel %vm1468_vm14, %v1452_v59, %v1532_v49  ;;  %v1429_v39 = vmul.f32 %v1360_v51, %v1333_v17  ;;  %v1350_v4 = vpop.permute.xlu0 %1349 }
 0x2eb   :  { %v1564_v16 = vmul.f32 1.050701, %v1548_v6  ;;  %v1427_v47 = vmul.f32 %v1350_v4, %v1331_v28  ;;  %v2786_v13 = vadd.f32 %v2774_v14, %v1438_v9 }
 0x2ec   :  { %v1449_v20 = vadd.f32 %v2774_v14, %v1429_v39 }
 0x2ed   :  { %v1700_v46 = vpack.c.bf16 %v1564_v16, %v1563_v60  ;;  %v1447_v35 = vadd.f32 %v2774_v14, %v1427_v47  ;;  %v1501_v33 = vmul.f32 1.442695, %v2786_v13  ;;  %vm1474_vm12 = vcmp.gt.f32.partialorder %v2786_v13, 0.0 }
 0x2ee   :  { %v1483_v24 = vmul.f32 1.442695, %v1449_v20  ;;  %vm1465_vm9 = vcmp.gt.f32.partialorder %v1449_v20, 0.0 }
 0x2ef   :  { %1728 = vst [vmem:[%s2835_s7 + $0x10] sm:$0xff] %v1700_v46   ;;  %v1479_v58 = vmul.f32 1.442695, %v1447_v35  ;;  %vm1463_vm7 = vcmp.gt.f32.partialorder %v1447_v35, 0.0 }
 0x2f0   :  { %1870 = vpow2.f32 %v1483_v24  ;;  %v1420_v24 = vpop.permute.xlu2 %1419 }
 0x2f1   :  { %1872 = vpow2.f32 %v1479_v58  ;;  %v1365_v26 = vpop.permute.xlu1 %1364 }
 0x2f2   :  { %v1430_v10 = vmul.f32 %v1365_v26, %v1334_v41  ;;  %v1355_v0 = vpop.permute.xlu0 %1354  ;;  %v1344_v26 = vld [vmem:[#allocation4 + $0x70] sm:$0xff] }
 0x2f3   :  { %v1428_v52 = vmul.f32 %v1355_v0, %v1332_v32 }
 0x2f4   :  { %v1450_v55 = vadd.f32 %v2774_v14, %v1430_v10 }
 0x2f5   :  { %v1448_v37 = vadd.f32 %v2774_v14, %v1428_v52 }
 0x2f6   :  { %v1871_v42 = vpop.eup %1870  ;;  %v1485_v1 = vmul.f32 1.442695, %v1450_v55  ;;  %vm1466_vm8 = vcmp.gt.f32.partialorder %v1450_v55, 0.0 }
 0x2f7   :  { %v1873_v40 = vpop.eup %1872  ;;  %v1481_v31 = vmul.f32 1.442695, %v1448_v37  ;;  %v1665_v54 = vadd.f32 -1.0, %v1871_v42  ;;  %vm1464_vm10 = vcmp.gt.f32.partialorder %v1448_v37, 0.0 }
 0x2f8   :  { %1874 = vpow2.f32 %v1485_v1  ;;  %v1663_v25 = vadd.f32 -1.0, %v1873_v40 }
 0x2f9   :  { %1876 = vpow2.f32 %v1481_v31  ;;  %v1529_v44 = vmul.f32 1.6732632, %v1665_v54 }
 0x2fa   :  { %v1527_v11 = vmul.f32 1.6732632, %v1663_v25  ;;  %1878 = vpow2.f32 %v1501_v33 }
 0x2fb   :  { %v1385_v2 = vpop.permute.xlu1 %1384  ;;  %v1545_v18 = vsel %vm1465_vm9, %v1449_v20, %v1529_v44 }
 0x2fc   :  { %v1434_v7 = vmul.f32 %v1385_v2, %v1338_v8  ;;  %v1543_v15 = vsel %vm1463_vm7, %v1447_v35, %v1527_v11  ;;  %v1561_v19 = vmul.f32 1.050701, %v1545_v18  ;;  %v1345_v35 = vld [vmem:[#allocation4 + $0x78] sm:$0xff]  ;;  %v1343_v8 = vld [vmem:[#allocation4 + $0x60] sm:$0xff] }
 0x2fd   :  { %v1380_v21 = vpop.permute.xlu0 %1379  ;;  %v1559_v60 = vmul.f32 1.050701, %v1543_v15  ;;  %v1441_v52 = vmul.f32 %v1420_v24, %v1345_v35 }
 0x2fe   :  { %v1875_v30 = vpop.eup %1874  ;;  %v1454_v3 = vadd.f32 %v2774_v14, %v1434_v7  ;;  %v1433_v22 = vmul.f32 %v1380_v21, %v1337_v53 }
 0x2ff   :  { %v1877_v62 = vpop.eup %1876  ;;  %v1666_v61 = vadd.f32 -1.0, %v1875_v30  ;;  %v2805_v54 = vadd.f32 %v2774_v14, %v1441_v52 }
 0x300   :  { %v1664_v12 = vadd.f32 -1.0, %v1877_v62  ;;  %v1493_v50 = vmul.f32 1.442695, %v1454_v3  ;;  %v1453_v59 = vadd.f32 %v2774_v14, %v1433_v22  ;;  %v1879_v20 = vpop.eup %1878  ;;  %vm1470_vm11 = vcmp.gt.f32.partialorder %v1454_v3, 0.0 }
 0x301   :  { %v1530_v45 = vmul.f32 1.6732632, %v1666_v61  ;;  %v1674_v0 = vadd.f32 -1.0, %v1879_v20  ;;  %vm1477_vm5 = vcmp.gt.f32.partialorder %v2805_v54, 0.0 }
 0x302   :  { %v1528_v5 = vmul.f32 1.6732632, %v1664_v12  ;;  %1880 = vpow2.f32 %v1493_v50  ;;  %v1491_v49 = vmul.f32 1.442695, %v1453_v59  ;;  %vm1469_vm13 = vcmp.gt.f32.partialorder %v1453_v59, 0.0 }
 0x303   :  { %v1546_v38 = vsel %vm1466_vm8, %v1450_v55, %v1530_v45  ;;  %v1400_v28 = vpop.permute.xlu1 %1399  ;;  %1882 = vpow2.f32 %v1495_v29  ;;  %v1538_v40 = vmul.f32 1.6732632, %v1674_v0 }
 0x304   :  { %v1562_v27 = vmul.f32 1.050701, %v1546_v38  ;;  %v1544_v17 = vsel %vm1464_vm10, %v1448_v37, %v1528_v5  ;;  %v1437_v51 = vmul.f32 %v1400_v28, %v1341_v57  ;;  %1884 = vpow2.f32 %v1491_v49  ;;  %v1346_v38 = vld [vmem:[#allocation4 + $0x28] sm:$0xff] }
 0x305   :  { %v1560_v43 = vmul.f32 1.050701, %v1544_v17  ;;  %v1395_v39 = vpop.permute.xlu0 %1394  ;;  %v1554_v62 = vsel %vm1474_vm12, %v2786_v13, %v1538_v40 }
 0x306   :  { %v1695_v6 = vpack.c.bf16 %v1562_v27, %v1561_v19  ;;  %v1457_v16 = vadd.f32 %v2774_v14, %v1437_v51  ;;  %v1436_v47 = vmul.f32 %v1395_v39, %v1340_v48  ;;  %v1570_v50 = vmul.f32 1.050701, %v1554_v62 }
 0x307   :  { %v1690_v4 = vpack.c.bf16 %v1560_v43, %v1559_v60 }
 0x308   :  { %1727 = vst [vmem:[%s2835_s7 + $0x8] sm:$0xff] %v1695_v6   ;;  %v1881_v46 = vpop.eup %1880  ;;  %v1499_v58 = vmul.f32 1.442695, %v1457_v16  ;;  %v1456_v41 = vadd.f32 %v2774_v14, %v1436_v47  ;;  %vm1473_vm1 = vcmp.gt.f32.partialorder %v1457_v16, 0.0 }
 0x309   :  { %1691 = vst [vmem:[%s2835_s7] sm:$0xff] %v1690_v4   ;;  %v1670_v32 = vadd.f32 -1.0, %v1881_v46  ;;  %v1883_v10 = vpop.eup %1882 }
 0x30a   :  { %1886 = vpow2.f32 %v1499_v58  ;;  %v1497_v36 = vmul.f32 1.442695, %v1456_v41  ;;  %v1885_v56 = vpop.eup %1884  ;;  %v1671_v9 = vadd.f32 -1.0, %v1883_v10  ;;  %vm1472_vm2 = vcmp.gt.f32.partialorder %v1456_v41, 0.0 }
 0x30b   :  { %v1534_v55 = vmul.f32 1.6732632, %v1670_v32  ;;  %v1415_v34 = vpop.permute.xlu1 %1414  ;;  %v1669_v37 = vadd.f32 -1.0, %v1885_v56 }
 0x30c   :  { %1888 = vpow2.f32 %v1497_v36  ;;  %v1440_v42 = vmul.f32 %v1415_v34, %v1344_v26  ;;  %v1535_v7 = vmul.f32 1.6732632, %v1671_v9 }
 0x30d   :  { %v1550_v1 = vsel %vm1470_vm11, %v1454_v3, %v1534_v55  ;;  %v1533_v31 = vmul.f32 1.6732632, %v1669_v37  ;;  %v1507_v3 = vmul.f32 1.442695, %v2805_v54 }
 0x30e   :  { %v1460_v63 = vadd.f32 %v2774_v14, %v1440_v42  ;;  %v1566_v25 = vmul.f32 1.050701, %v1550_v1  ;;  %v1551_v45 = vsel %vm1471_vm15, %v2789_v23, %v1535_v7 }
 0x30f   :  { %v1549_v53 = vsel %vm1469_vm13, %v1453_v59, %v1533_v31  ;;  %v1567_v19 = vmul.f32 1.050701, %v1551_v45 }
 0x310   :  { %v1887_v2 = vpop.eup %1886  ;;  %v1505_v44 = vmul.f32 1.442695, %v1460_v63  ;;  %v1565_v30 = vmul.f32 1.050701, %v1549_v53  ;;  %v1410_v11 = vpop.permute.xlu0 %1409  ;;  %vm1476_vm3 = vcmp.gt.f32.partialorder %v1460_v63, 0.0 }
 0x311   :  { %v1673_v33 = vadd.f32 -1.0, %v1887_v2  ;;  %v1439_v61 = vmul.f32 %v1410_v11, %v1343_v8 }
 0x312   :  { %v1889_v21 = vpop.eup %1888  ;;  %1890 = vpow2.f32 %v1505_v44  ;;  %v1705_v22 = vpack.c.bf16 %v1566_v25, %v1565_v30 }
 0x313   :  { %v1537_v29 = vmul.f32 1.6732632, %v1673_v33  ;;  %v1672_v12 = vadd.f32 -1.0, %v1889_v21  ;;  %v1459_v18 = vadd.f32 %v2774_v14, %v1439_v61  ;;  %1892 = vpow2.f32 %v1507_v3 }
 0x314   :  { %1729 = vst [vmem:[%s2835_s7 + $0x18] sm:$0xff] %v1705_v22  }
 0x315   :  { %v1553_v59 = vsel %vm1473_vm1, %v1457_v16, %v1537_v29  ;;  %v1536_v15 = vmul.f32 1.6732632, %v1672_v12  ;;  %v1503_v5 = vmul.f32 1.442695, %v1459_v18  ;;  %vm1475_vm4 = vcmp.gt.f32.partialorder %v1459_v18, 0.0 }
 0x316   :  { %v1569_v13 = vmul.f32 1.050701, %v1553_v59 }
 0x317   :  { %v1552_v57 = vsel %vm1472_vm2, %v1456_v41, %v1536_v15  ;;  %1894 = vpow2.f32 %v1503_v5 }
 0x318   :  { %v1891_v48 = vpop.eup %1890  ;;  %v1715_v27 = vpack.c.bf16 %v1570_v50, %v1569_v13  ;;  %v1568_v17 = vmul.f32 1.050701, %v1552_v57  ;;  %v1425_v23 = vpop.permute.xlu0 %1424 }
 0x319   :  { %v1676_v49 = vadd.f32 -1.0, %v1891_v48  ;;  %v1442_v60 = vmul.f32 %v1425_v23, %v1346_v38  ;;  %v1893_v6 = vpop.eup %1892 }
 0x31a   :  { %1731 = vst [vmem:[%s2835_s7 + $0x28] sm:$0xff] %v1715_v27   ;;  %v1710_v28 = vpack.c.bf16 %v1568_v17, %v1567_v19  ;;  %v1677_v20 = vadd.f32 -1.0, %v1893_v6 }
 0x31b   :  { %v1540_v43 = vmul.f32 1.6732632, %v1676_v49  ;;  %v1462_v51 = vadd.f32 %v2774_v14, %v1442_v60 }
 0x31c   :  { %1730 = vst [vmem:[%s2835_s7 + $0x20] sm:$0xff] %v1710_v28   ;;  %v1541_v41 = vmul.f32 1.6732632, %v1677_v20 }
 0x31d   :  { %v1895_v39 = vpop.eup %1894  ;;  %v1509_v4 = vmul.f32 1.442695, %v1462_v51  ;;  %v1556_v16 = vsel %vm1476_vm3, %v1460_v63, %v1540_v43  ;;  %vm1478_vm0 = vcmp.gt.f32.partialorder %v1462_v51, 0.0 }
 0x31e   :  { %v1675_v47 = vadd.f32 -1.0, %v1895_v39  ;;  %v1572_v35 = vmul.f32 1.050701, %v1556_v16  ;;  %v1557_v14 = vsel %vm1477_vm5, %v2805_v54, %v1541_v41 }
 0x31f   :  { %1896 = vpow2.f32 %v1509_v4  ;;  %v1573_v56 = vmul.f32 1.050701, %v1557_v14 }
 0x320   :  { %v1539_v46 = vmul.f32 1.6732632, %v1675_v47 }
 0x322   :  { %v1555_v24 = vsel %vm1475_vm4, %v1459_v18, %v1539_v46 }
 0x323   :  { %v1571_v58 = vmul.f32 1.050701, %v1555_v24 }
 0x325   :  { %v1897_v32 = vpop.eup %1896  ;;  %v1720_v26 = vpack.c.bf16 %v1572_v35, %v1571_v58 }
 0x326   :  { %v1678_v10 = vadd.f32 -1.0, %v1897_v32 }
 0x327   :  { %1732 = vst [vmem:[%s2835_s7 + $0x30] sm:$0xff] %v1720_v26  }
 0x328   :  { %v1542_v0 = vmul.f32 1.6732632, %v1678_v10 }
 0x32a   :  { %v1558_v36 = vsel %vm1478_vm0, %v1462_v51, %v1542_v0 }
 0x32b   :  { %v1574_v52 = vmul.f32 1.050701, %v1558_v36 }
 0x32d   :  { %v1725_v55 = vpack.c.bf16 %v1574_v52, %v1573_v56 }
 0x32f   :  { %1733 = vst [vmem:[%s2835_s7 + $0x38] sm:$0xff] %v1725_v55  }

</bundles_post_ra>
